<compile_context>
chip_gen: v7x
topology: tpu7x:2x2x1
jax: 0.10.0
libtpu: 0.0.40
codegen_flags: <defaults>
</compile_context>

<pallas_src>
import functools
import math

import jax
import jax.numpy as jnp
from jax.experimental import pallas as pl
from jax.experimental.pallas import tpu as pltpu


def _qkv_attention_kernel(q_ref, k_ref, v_ref, out_ref, *, l_true):
    """One grid step: a block of heads x one query tile, full (padded) keys."""
    _, ch, _ = q_ref.shape
    l_kv = k_ref.shape[-1]

    # Fold the full 1/sqrt(ch) scale into q only (reference scales q and k by
    # ch**-0.25 each; mathematically identical, half the VPU passes).
    scale = 1.0 / math.sqrt(ch)
    q = q_ref[...] * scale          # stays in the input dtype (bf16-friendly)
    k = k_ref[...]
    v = v_ref[...]

    # scores[h, t, s] = sum_c q[h, c, t] * k[h, c, s]   ('bct,bcs->bts')
    # dot_general contracts on the ch axis directly -> no XLU transpose.
    scores = jax.lax.dot_general(
        q, k,
        dimension_numbers=(((1,), (1,)), ((0,), (0,))),
        preferred_element_type=jnp.float32,
    )                                                    # (H, TQ, L) f32

    # Mask padded key columns (length was padded up to a multiple of 128).
    if l_true < l_kv:
        col = jax.lax.broadcasted_iota(jnp.int32, scores.shape, 2)
        scores = jnp.where(col < l_true, scores, -1e30)

    # Softmax over keys in f32 (matches the reference's .float()).
    m = jnp.max(scores, axis=-1, keepdims=True)
    e = jnp.exp(scores - m)
    denom = jnp.sum(e, axis=-1, keepdims=True)           # (H, TQ, 1), >= 1
    # Reciprocal of the tiny (H, TQ, 1) denominator then a single vmul over the
    # big (TQ, L) tile, instead of a full-tile divide.  approx=True would push
    # it to the EUP but costs accuracy; the denominator is tiny so exact is free.
    w = e * pl.reciprocal(denom, approx=False)
    # Match reference: probabilities cast back to the input dtype before the
    # second matmul (keeps the MXU in bf16 for bf16 inputs).
    w = w.astype(v.dtype)

    # a[h, c, t] = sum_s w[h, t, s] * v[h, c, s]         ('bts,bcs->bct')
    a = jax.lax.dot_general(
        v, w,
        dimension_numbers=(((2,), (2,)), ((0,), (0,))),
        preferred_element_type=jnp.float32,
    )                                                    # (H, ch, TQ) f32

    out_ref[...] = a.astype(out_ref.dtype)


def _choose_tiles(num_hb, ch, l_pad, in_bytes, budget_bytes=14 * 1024 * 1024):
    """Pick (heads-per-block, query-tile) that fill the MXU / (8,128) tiles for
    small ch but keep the per-step VMEM working set (double-buffered blocks +
    f32 score tile) under every TPU generation's scoped-VMEM limit."""
    if l_pad <= 512:
        tq_cands = [l_pad]
    else:
        tq_cands = [t for t in (512, 256, 128) if l_pad % t == 0] or [l_pad]

    def cost(h, tq):
        io = 2 * h * ch * (2 * tq + 2 * l_pad) * in_bytes   # q,out + k,v (double-buffered)
        scratch = h * tq * l_pad * (8 + in_bytes)           # scores/exp f32 + w
        scratch += 4 * h * ch * tq                          # f32 accumulator
        return io + scratch

    for tq in tq_cands:
        h_best = 0
        for h in range(1, num_hb + 1):
            if num_hb % h == 0 and cost(h, tq) <= budget_bytes:
                h_best = h
        if h_best:
            return h_best, tq
    return 1, tq_cands[-1]


def qkv_attention(qkv, num_heads):
    """Pallas implementation of QKVAttention.forward."""
    bs, width, length = qkv.shape
    assert width % (3 * num_heads) == 0
    ch = width // (3 * num_heads)
    B = bs * num_heads

    # Pad length to a multiple of 128 so loads/stores are lane-dense; padded
    # key columns are masked inside the kernel, padded query rows sliced off.
    l_pad = -(-length // 128) * 128
    qkv_p = qkv if l_pad == length else jnp.pad(
        qkv, ((0, 0), (0, 0), (0, l_pad - length)))

    # (bs, num_heads*3*ch, L) -> (bs*num_heads, 3, ch, L); index 0/1/2 of the
    # second axis selects q/k/v, matching the reference's split(ch, dim=1).
    qkv_r = qkv_p.reshape(B, 3, ch, l_pad)

    h_blk, tq = _choose_tiles(B, ch, l_pad, qkv.dtype.itemsize)
    grid = (B // h_blk, l_pad // tq)

    kernel = functools.partial(_qkv_attention_kernel, l_true=length)

    out = pl.pallas_call(
        kernel,
        out_shape=jax.ShapeDtypeStruct((B, ch, l_pad), qkv.dtype),
        grid_spec=pl.GridSpec(
            grid=grid,
            in_specs=[
                # q: only the current query tile.
                pl.BlockSpec((h_blk, None, ch, tq), lambda h, t: (h, 0, 0, t)),
                # k, v: full (padded) length; block index constant along the
                # query-tile axis so Pallas keeps them resident in VMEM.
                pl.BlockSpec((h_blk, None, ch, l_pad), lambda h, t: (h, 1, 0, 0)),
                pl.BlockSpec((h_blk, None, ch, l_pad), lambda h, t: (h, 2, 0, 0)),
            ],
            out_specs=pl.BlockSpec((h_blk, ch, tq), lambda h, t: (h, 0, t)),
        ),
        compiler_params=pltpu.CompilerParams(
            dimension_semantics=("parallel", "arbitrary"),
            vmem_limit_bytes=32 * 1024 * 1024,
        ),
    )(qkv_r, qkv_r, qkv_r)

    if l_pad != length:
        out = out[:, :, :length]
    return out.reshape(bs, num_heads * ch, length)


def qkv_attention_ref(qkv, num_heads):
    """Plain-JAX reference mirroring the PyTorch module."""
    bs, width, length = qkv.shape
    ch = width // (3 * num_heads)
    qkv_r = qkv.reshape(bs * num_heads, 3 * ch, length)
    q, k, v = qkv_r[:, :ch], qkv_r[:, ch:2 * ch], qkv_r[:, 2 * ch:]
    scale = 1.0 / math.sqrt(math.sqrt(ch))
    weight = jnp.einsum("bct,bcs->bts", q * scale, k * scale)
    weight = jax.nn.softmax(weight.astype(jnp.float32), axis=-1).astype(weight.dtype)
    a = jnp.einsum("bts,bcs->bct", weight, v)
    return a.reshape(bs, -1, length)


if __name__ == "__main__":
    # Small, module-consistent shapes: bs=2, num_heads=4, ch=8, length=16
    # => width = 3 * num_heads * ch = 96
    bs, num_heads, ch, length = 2, 4, 8, 16
    width = 3 * num_heads * ch

    key = jax.random.PRNGKey(0)
    qkv = jax.random.normal(key, (bs, width, length), dtype=jnp.float32)

    out = jax.block_until_ready(qkv_attention(qkv, num_heads))
    ref = qkv_attention_ref(qkv, num_heads)

    assert out.shape == (bs, num_heads * ch, length)
    # Small slack vs 1e-5: padding/masking and dot_general reorder reductions.
    assert jnp.allclose(out, ref, atol=1e-4, rtol=1e-4), "mismatch vs reference"

    print("KERNEL_OK")
</pallas_src>

<mosaic_0001>
module attributes {stable_mosaic.version = 11 : i64} {
  func.func @_qkv_attention_kernel(%arg0: i32, %arg1: i32, %arg2: memref<8x1x8x128xf32, #tpu.memory_space<vmem>>, %arg3: memref<8x1x8x128xf32, #tpu.memory_space<vmem>>, %arg4: memref<8x1x8x128xf32, #tpu.memory_space<vmem>>, %arg5: memref<8x8x128xf32, #tpu.memory_space<vmem>>) attributes {dimension_semantics = [#tpu.dimension_semantics<parallel>, #tpu.dimension_semantics<arbitrary>], iteration_bounds = array<i64: 1, 1>, scalar_prefetch = 0 : i64, scratch_operands = 0 : i64, tpu.core_type = #tpu.core_type<tc>, window_params = [{transform_indices = @transform_0, window_bounds = array<i64: 8, 1, 8, 128>}, {transform_indices = @transform_1, window_bounds = array<i64: 8, 1, 8, 128>}, {transform_indices = @transform_2, window_bounds = array<i64: 8, 1, 8, 128>}, {transform_indices = @transform_3, window_bounds = array<i64: 8, 8, 128>}]} {
    %c0 = arith.constant 0 : index
    %c0_0 = arith.constant 0 : index
    %c0_1 = arith.constant 0 : index
    %c0_2 = arith.constant 0 : index
    %0 = vector.load %arg2[%c0, %c0_0, %c0_1, %c0_2] : memref<8x1x8x128xf32, #tpu.memory_space<vmem>>, vector<8x1x8x128xf32>
    %1 = vector.shape_cast %0 : vector<8x1x8x128xf32> to vector<8x8x128xf32>
    %cst = arith.constant 0.353553385 : f32
    %2 = vector.broadcast %cst : f32 to vector<8x8x128xf32>
    %3 = arith.mulf %1, %2 : vector<8x8x128xf32>
    %c0_3 = arith.constant 0 : index
    %c0_4 = arith.constant 0 : index
    %c0_5 = arith.constant 0 : index
    %c0_6 = arith.constant 0 : index
    %4 = vector.load %arg3[%c0_3, %c0_4, %c0_5, %c0_6] : memref<8x1x8x128xf32, #tpu.memory_space<vmem>>, vector<8x1x8x128xf32>
    %5 = vector.shape_cast %4 : vector<8x1x8x128xf32> to vector<8x8x128xf32>
    %c0_7 = arith.constant 0 : index
    %c0_8 = arith.constant 0 : index
    %c0_9 = arith.constant 0 : index
    %c0_10 = arith.constant 0 : index
    %6 = vector.load %arg4[%c0_7, %c0_8, %c0_9, %c0_10] : memref<8x1x8x128xf32, #tpu.memory_space<vmem>>, vector<8x1x8x128xf32>
    %7 = vector.shape_cast %6 : vector<8x1x8x128xf32> to vector<8x8x128xf32>
    %cst_11 = arith.constant dense<0.000000e+00> : vector<8x128x128xf32>
    %8 = tpu.matmul %3, %5, %cst_11 {dimension_numbers = #tpu.dot_dimension_numbers<[1], [1], [2], [2], [0, 0, 0, 2, 1, 2], [0], [0]>} : vector<8x8x128xf32>, vector<8x8x128xf32>, vector<8x128x128xf32> -> vector<8x128x128xf32>
    %9 = tpu.iota {dimensions = array<i32: 2>} : vector<8x128x128xi32>
    %c16_i32 = arith.constant 16 : i32
    %10 = vector.broadcast %c16_i32 : i32 to vector<8x128x128xi32>
    %11 = arith.cmpi slt, %9, %10 : vector<8x128x128xi32>
    %cst_12 = arith.constant -1.000000e+30 : f32
    %12 = vector.broadcast %cst_12 : f32 to vector<8x128x128xf32>
    %13 = arith.select %11, %8, %12 : vector<8x128x128xi1>, vector<8x128x128xf32>
    %cst_13 = arith.constant dense<0xFF800000> : vector<8x128xf32>
    %14 = vector.multi_reduction <maximumf>, %13, %cst_13 [2] : vector<8x128x128xf32> to vector<8x128xf32>
    %15 = vector.shape_cast %14 : vector<8x128xf32> to vector<8x128x1xf32>
    %16 = vector.broadcast %15 : vector<8x128x1xf32> to vector<8x128x128xf32>
    %17 = arith.subf %13, %16 : vector<8x128x128xf32>
    %18 = math.exp %17 : vector<8x128x128xf32>
    %cst_14 = arith.constant dense<0.000000e+00> : vector<8x128xf32>
    %19 = vector.multi_reduction <add>, %18, %cst_14 [2] : vector<8x128x128xf32> to vector<8x128xf32>
    %20 = vector.shape_cast %19 : vector<8x128xf32> to vector<8x128x1xf32>
    %21 = tpu.reciprocal %20 : vector<8x128x1xf32> -> vector<8x128x1xf32>
    %22 = vector.broadcast %21 : vector<8x128x1xf32> to vector<8x128x128xf32>
    %23 = arith.mulf %18, %22 : vector<8x128x128xf32>
    %cst_15 = arith.constant dense<0.000000e+00> : vector<8x8x128xf32>
    %24 = tpu.matmul %7, %23, %cst_15 {dimension_numbers = #tpu.dot_dimension_numbers<[2], [2], [1], [1], [0, 0, 0, 1, 1, 1], [0], [0]>} : vector<8x8x128xf32>, vector<8x128x128xf32>, vector<8x8x128xf32> -> vector<8x8x128xf32>
    %c0_16 = arith.constant 0 : index
    %c0_17 = arith.constant 0 : index
    %c0_18 = arith.constant 0 : index
    %25 = vector.load %arg5[%c0_16, %c0_17, %c0_18] : memref<8x8x128xf32, #tpu.memory_space<vmem>>, vector<8x8x128xf32>
    tpu.vector_store %arg5[%c0_16, %c0_17, %c0_18], %24 {strides = array<i32>} : memref<8x8x128xf32, #tpu.memory_space<vmem>>, vector<8x8x128xf32>,
    return
  }
  func.func @transform_0(%arg0: i32, %arg1: i32) -> (i32, i32, i32, i32) {
    %c0_i32 = arith.constant 0 : i32
    %c0_i32_0 = arith.constant 0 : i32
    %c0_i32_1 = arith.constant 0 : i32
    return %arg0, %c0_i32, %c0_i32_0, %arg1 : i32, i32, i32, i32
  }
  func.func @transform_1(%arg0: i32, %arg1: i32) -> (i32, i32, i32, i32) {
    %c1_i32 = arith.constant 1 : i32
    %c0_i32 = arith.constant 0 : i32
    %c0_i32_0 = arith.constant 0 : i32
    %c0_i32_1 = arith.constant 0 : i32
    return %arg0, %c1_i32, %c0_i32, %c0_i32_0 : i32, i32, i32, i32
  }
  func.func @transform_2(%arg0: i32, %arg1: i32) -> (i32, i32, i32, i32) {
    %c2_i32 = arith.constant 2 : i32
    %c0_i32 = arith.constant 0 : i32
    %c0_i32_0 = arith.constant 0 : i32
    %c0_i32_1 = arith.constant 0 : i32
    return %arg0, %c2_i32, %c0_i32, %c0_i32_0 : i32, i32, i32, i32
  }
  func.func @transform_3(%arg0: i32, %arg1: i32) -> (i32, i32, i32) {
    %c0_i32 = arith.constant 0 : i32
    %c0_i32_0 = arith.constant 0 : i32
    return %arg0, %c0_i32, %arg1 : i32, i32, i32
  }
}

</mosaic_0001>

<bundles_post_ra>
// kernel: tpu_custom_call.1
= control target key start
LH: loop header
LB: loop body
LE: loop exit
PB: predicated region body
PF: predicated region fallthrough
CT: control target
= control target key end

     0   :  { %8 = vsyncpa [#allocation3], 0  ;;  %s7427_s0 = inlined_call_operand.hbm [shape: f32[8,3,8,128], index: 0, kind: input, shape index: {}]   ;;  %s7428_s1 = inlined_call_operand.hbm [shape: f32[8,3,8,128], index: 1, kind: input, shape index: {}]   ;;  %s7429_s2 = inlined_call_operand.hbm [shape: f32[8,3,8,128], index: 2, kind: input, shape index: {}]   ;;  %s7430_s3 = inlined_call_operand.hbm [shape: f32[8,8,128], index: 3, kind: output, shape index: {}]  }
   0x1   :  { %9 = vsyncpa [#allocation6], 0 }
   0x2   :  { %10 = vsyncpa [#allocation4], 0  ;;  %s5495_s14 = scalar_lea.hbm %s7428_s1, 128  ;;  %s5462_s15 = smov [#allocation5]  }
   0x3   :  { %s29_s16 = sshll.u32 %s5462_s15, 4  ;;  %s5463_s17 = smov [#allocation2]   ;;  %s30_s16 = int_to_ptr.vmem [resolvable:$true] %s29_s16 }
   0x4   :  { %s16_s18 = sshll.u32 %s5463_s17, 4  ;;  %s5386_s21 = scalar_lea.hbm %s7428_s1, 1152  ;;  %s5497_s18 = int_to_ptr.vmem [resolvable:$true] %s16_s18 }
   0x5   :  { %p5363_p0 = scmp.ne.s32.totalorder %s5495_s14, %s5386_s21  ;;  %s5364_s24 = scalar_lea.hbm %s7428_s1, 3072 }
   0x6   :  { %p5365_p1 = scmp.lt.u32.totalorder %s5495_s14, %s7428_s1  ;;  %p5366_p2 = scmp.lt.u32.totalorder %s5364_s24, %s5386_s21 }
   0x7   :  { %p5368_p4 = scmp.lt.u32.totalorder %s5386_s21, %s5495_s14 }
   0x8   :  { %p5367_p3 = por %p5366_p2, %p5365_p1 }
   0xa   :  { %p5369_p5 = por %p5368_p4, %p5367_p3 }
   0xc   :  { %p5370_p6 = pnand %p5369_p5, %p5363_p0 }
   0xe   :  { %5373 = shalt.err (!%p5370_p6)
}
   0xf   :  { %s5374_s27 = scalar_lea.vmem %s30_s16, 1024  ;;  %p5379_p8 = scmp.lt.s32.totalorder %s30_s16, %s30_s16 }
  0x10   :  { %p5375_p7 = scmp.ne.s32.totalorder %s30_s16, %s5374_s27  ;;  %p5380_p9 = scmp.lt.s32.totalorder %s5374_s27, %s5374_s27 }
  0x12   :  { %p5381_p10 = por %p5380_p9, %p5379_p8 }
  0x14   :  { %p5382_p11 = pnand %p5381_p10, %p5375_p7 }
  0x16   :  { %5385 = shalt.err (!%p5382_p11)
}
  0x17   :  { %s5464_s28 = smov 384   ;;  %s5465_s29 = smov 128  }
  0x18   :  { %s5466_s30 = smov 8   ;;  %s5387_s5 = scalar_lea.hbm %s7427_s0, 1024 }
  0x19   :  { %35 = dma.hbm_to_vmem [thread:$0]  %s5495_s14, 1024, %s30_s16, [#allocation6], %s5464_s28, %s5465_s29, %s5466_s30  }
  0x1a   :  { %p5388_p12 = scmp.ne.s32.totalorder %s7427_s0, %s5387_s5  ;;  %s5389_s10 = scalar_lea.hbm %s7427_s0, 3072 }
  0x1b   :  { %p5390_p13 = scmp.lt.u32.totalorder %s5389_s10, %s5387_s5  ;;  %p5391_p0 = scmp.lt.u32.totalorder %s5387_s5, %s7427_s0 }
  0x1d   :  { %p5392_p1 = por %p5391_p0, %p5390_p13 }
  0x1f   :  { %p5393_p2 = pnand %p5392_p1, %p5388_p12 }
  0x21   :  { %5396 = shalt.err (!%p5393_p2)
}
  0x22   :  { %s5397_s13 = scalar_lea.vmem %s5497_s18, 1024  ;;  %p5402_p4 = scmp.lt.s32.totalorder %s5497_s18, %s5497_s18 }
  0x23   :  { %p5398_p3 = scmp.ne.s32.totalorder %s5497_s18, %s5397_s13  ;;  %p5403_p5 = scmp.lt.s32.totalorder %s5397_s13, %s5397_s13 }
  0x25   :  { %p5404_p6 = por %p5403_p5, %p5402_p4 }
  0x27   :  { %p5405_p7 = pnand %p5404_p6, %p5398_p3 }
  0x29   :  { %5408 = shalt.err (!%p5405_p7)
}
  0x2a   :  { %22 = dma.hbm_to_vmem [thread:$0]  %s7427_s0, 1024, %s5497_s18, [#allocation3], %s5464_s28, %s5465_s29, %s5466_s30  }
  0x2b   :  { %s41_s19 = scalar_lea.hbm %s7429_s2, 256  ;;  %s5467_s20 = smov [#allocation7]  }
  0x2c   :  { %s42_s21 = sshll.u32 %s5467_s20, 4  ;;  %s5433_s24 = scalar_lea.hbm %s7429_s2, 1280  ;;  %s43_s21 = int_to_ptr.vmem [resolvable:$true] %s42_s21 }
  0x2d   :  { %p5410_p8 = scmp.ne.s32.totalorder %s41_s19, %s5433_s24  ;;  %s5411_s27 = scalar_lea.hbm %s7429_s2, 3072 }
  0x2e   :  { %p5412_p9 = scmp.lt.u32.totalorder %s41_s19, %s7429_s2  ;;  %p5413_p10 = scmp.lt.u32.totalorder %s5411_s27, %s5433_s24 }
  0x2f   :  { %p5415_p12 = scmp.lt.u32.totalorder %s5433_s24, %s41_s19 }
  0x30   :  { %p5414_p11 = por %p5413_p10, %p5412_p9 }
  0x32   :  { %p5416_p13 = por %p5415_p12, %p5414_p11 }
  0x34   :  { %p5417_p0 = pnand %p5416_p13, %p5410_p8 }
  0x36   :  { %5420 = shalt.err (!%p5417_p0)
}
  0x37   :  { %s5421_s0 = scalar_lea.vmem %s43_s21, 1024  ;;  %p5426_p2 = scmp.lt.s32.totalorder %s43_s21, %s43_s21 }
  0x38   :  { %p5422_p1 = scmp.ne.s32.totalorder %s43_s21, %s5421_s0  ;;  %p5427_p3 = scmp.lt.s32.totalorder %s5421_s0, %s5421_s0 }
  0x3a   :  { %p5428_p4 = por %p5427_p3, %p5426_p2 }
  0x3c   :  { %p5429_p5 = pnand %p5428_p4, %p5422_p1 }
  0x3e   :  { %5432 = shalt.err (!%p5429_p5)
}
  0x3f   :  { %48 = dma.hbm_to_vmem [thread:$0]  %s41_s19, 1024, %s43_s21, [#allocation6], %s5464_s28, %s5465_s29, %s5466_s30  }
  0x40   :  { %5456 = dma.done.wait [#allocation3], 1024  }
  0x41   :  { %5457 = vsyncadd [#allocation3], 4294966272 }
  0x42   :  { %5458 = dma.done.wait [#allocation6], 2048  }
  0x43   :  { %5459 = vsyncadd [#allocation6], 4294965248  ;;  %v58_v0 = vld [vmem:[#allocation2] sm:$0xff]  ;;  %v60_v1 = vld [vmem:[#allocation2 + $0x10] sm:$0xff]  ;;  %vm122_vm0 = vcmask 64512   ;;  %vm5469_vm2 = vmmov 0  }
  0x44   :  { %v66_v2 = vmul.f32 0.35355338, %v58_v0  ;;  %v68_v3 = vmul.f32 0.35355338, %v60_v1  ;;  %v74_v4 = vld [vmem:[#allocation5] sm:$0xff]  ;;  %v59_v5 = vld [vmem:[#allocation2 + $0x8] sm:$0xff] }
  0x45   :  { %4160 = vmatprep.subr.mxu0 %v74_v4  ;;  %v61_v6 = vld [vmem:[#allocation2 + $0x18] sm:$0xff]  ;;  %v67_v7 = vmul.f32 0.35355338, %v59_v5  ;;  %v75_v9 = vld [vmem:[#allocation5 + $0x8] sm:$0xff]  ;;  %v76_v10 = vld [vmem:[#allocation5 + $0x10] sm:$0xff]  ;;  %s5471_s2 = smov [#allocation8]  }
  0x46   :  { %90 = vxpose.xlu0.b32.start.end [1/1] (short) %v66_v2, 128  ;;  %541 = vxpose.xlu1.b32.start.end [1/1] (short) %v68_v3, 128  ;;  %v69_v8 = vmul.f32 0.35355338, %v61_v6  ;;  %v5553_v11 = vld [vmem:[#allocation5 + $0x18] sm:$0xff]  ;;  %v62_v12 = vld [vmem:[#allocation2 + $0x20] sm:$0xff]  ;;  %v63_v13 = vld [vmem:[#allocation2 + $0x28] sm:$0xff]  ;;  %s3747_s18 = sshll.u32 %s5471_s2, 4  ;;  %s3748_s18 = int_to_ptr.vmem [resolvable:$true] %s3747_s18 }
  0x47   :  { %4161 = vmatpush3.msra.mxu0 %v74_v4  ;;  %4186 = vmatprep.subr.mxu1 %v75_v9  ;;  %v70_v14 = vmul.f32 0.35355338, %v62_v12  ;;  %v71_v15 = vmul.f32 0.35355338, %v63_v13  ;;  %v78_v24 = vld [vmem:[#allocation5 + $0x20] sm:$0xff]  ;;  %v64_v43 = vld [vmem:[#allocation2 + $0x30] sm:$0xff]  ;;  %p5439_p7 = scmp.lt.s32.totalorder %s3748_s18, %s3748_s18 }
  0x48   :  { %4187 = vmatpush3.msra.mxu1 %v75_v9  ;;  %4212 = vmatprep.subr.mxu0 %v76_v10  ;;  %v65_v44 = vld [vmem:[#allocation2 + $0x38] sm:$0xff]  ;;  %v72_v46 = vmul.f32 0.35355338, %v64_v43  ;;  %v5580_v57 = vld [vmem:[#allocation5 + $0x28] sm:$0xff]  ;;  %s5434_s28 = scalar_lea.vmem %s3748_s18, 1024 }
  0x49   :  { %4238 = vmatprep.subr.mxu1 %v5553_v11  ;;  %v73_v48 = vmul.f32 0.35355338, %v65_v44  ;;  %p5435_p6 = scmp.ne.s32.totalorder %s3748_s18, %s5434_s28  ;;  %p5440_p8 = scmp.lt.s32.totalorder %s5434_s28, %s5434_s28 }
  0x4b   :  { %p5441_p9 = por %p5440_p8, %p5439_p7 }
  0x4d   :  { %p5442_p10 = pnand %p5441_p9, %p5435_p6 }
  0x83   :  { %316 = vxpose.xlu0.b32.start.end [1/1] (short) %v67_v7, 128  ;;  %766 = vxpose.xlu1.b32.start.end [1/1] (short) %v69_v8, 128 }
  0xc0   :  { %991 = vxpose.xlu0.b32.start.end [1/1] (short) %v70_v14, 128  ;;  %1216 = vxpose.xlu1.b32.start.end [1/1] (short) %v71_v15, 128 }
  0xc6   :  { %v106_v16 = vpop.trf.xlu0  ;;  %v557_v17 = vpop.trf.xlu1 }
  0xc7   :  { %4162 = vmatprep.mubr.msk.f32.mxu0 %vm122_vm0, %v106_v16 }
  0xca   :  { %v107_v18 = vpop.trf.xlu0  ;;  %v558_v19 = vpop.trf.xlu1 }
  0xcb   :  { %4163 = vmatmul.mubr.msk.f32.vlgmr.msra.gmra.mrb[0].mxu0 %vm122_vm0, %v107_v18 }
  0xcc   :  { %4213 = vmatpush3.msra.mxu0 %v76_v10 }
  0xcd   :  { %4264 = vmatprep.subr.mxu0 %v78_v24 }
  0xce   :  { %v108_v20 = vpop.trf.xlu0  ;;  %v559_v21 = vpop.trf.xlu1 }
  0xcf   :  { %4165 = vmatprep.mubr.msk.f32.mxu0 %vm122_vm0, %v108_v20 }
  0xd2   :  { %v109_v22 = vpop.trf.xlu0  ;;  %v560_v23 = vpop.trf.xlu1 }
  0xd3   :  { %4166 = vmatmul.mubr.msk.f32.gmra.mrb[2].mxu0 %vm122_vm0, %v109_v22 }
  0xd6   :  { %v110_v25 = vpop.trf.xlu0  ;;  %v561_v26 = vpop.trf.xlu1 }
  0xd7   :  { %4168 = vmatprep.mubr.msk.f32.mxu0 %vm122_vm0, %v110_v25 }
  0xda   :  { %v111_v27 = vpop.trf.xlu0  ;;  %v562_v28 = vpop.trf.xlu1 }
  0xdb   :  { %4169 = vmatmul.mubr.msk.f32.gmra.mrb[4].mxu0 %vm122_vm0, %v111_v27 }
  0xde   :  { %v112_v29 = vpop.trf.xlu0  ;;  %v563_v30 = vpop.trf.xlu1 }
  0xdf   :  { %4171 = vmatprep.mubr.msk.f32.mxu0 %vm122_vm0, %v112_v29 }
  0xe2   :  { %v113_v31 = vpop.trf.xlu0  ;;  %v564_v32 = vpop.trf.xlu1 }
  0xe3   :  { %4172 = vmatmul.mubr.msk.f32.gmra.mrb[6].mxu0 %vm122_vm0, %v113_v31 }
  0xe6   :  { %v114_v33 = vpop.trf.xlu0  ;;  %v565_v34 = vpop.trf.xlu1 }
  0xe7   :  { %4174 = vmatprep.mubr.msk.f32.mxu0 %vm122_vm0, %v114_v33 }
  0xea   :  { %v115_v35 = vpop.trf.xlu0  ;;  %v566_v36 = vpop.trf.xlu1 }
  0xeb   :  { %4175 = vmatmul.mubr.msk.f32.gmra.mrb[8].mxu0 %vm122_vm0, %v115_v35 }
  0xee   :  { %v116_v37 = vpop.trf.xlu0  ;;  %v567_v38 = vpop.trf.xlu1 }
  0xef   :  { %4177 = vmatprep.mubr.msk.f32.mxu0 %vm122_vm0, %v116_v37 }
  0xf2   :  { %v117_v39 = vpop.trf.xlu0  ;;  %v568_v40 = vpop.trf.xlu1 }
  0xf3   :  { %4178 = vmatmul.mubr.msk.f32.gmra.mrb[10].mxu0 %vm122_vm0, %v117_v39 }
  0xf6   :  { %v118_v41 = vpop.trf.xlu0  ;;  %v569_v42 = vpop.trf.xlu1 }
  0xf7   :  { %4180 = vmatprep.mubr.msk.f32.mxu0 %vm122_vm0, %v118_v41 }
  0xfa   :  { %v119_v45 = vpop.trf.xlu0  ;;  %v570_v47 = vpop.trf.xlu1 }
  0xfb   :  { %4181 = vmatmul.mubr.msk.f32.gmra.mrb[12].mxu0 %vm122_vm0, %v119_v45 }
  0xfe   :  { %v120_v49 = vpop.trf.xlu0  ;;  %1441 = vxpose.xlu0.b32.start.end [1/1] (short) %v72_v46, 128  ;;  %v571_v50 = vpop.trf.xlu1  ;;  %1666 = vxpose.xlu1.b32.start.end [1/1] (short) %v73_v48, 128 }
  0xff   :  { %4183 = vmatprep.mubr.msk.f32.mxu0 %vm122_vm0, %v120_v49 }
 0x102   :  { %v121_v51 = vpop.trf.xlu0  ;;  %v572_v52 = vpop.trf.xlu1 }
 0x103   :  { %4184 = vmatmul.mubr.msk.f32.gmra.mrb[14].mxu0 %vm122_vm0, %v121_v51 }
 0x104   :  { %4214 = vmatprep.mubr.msk.f32.mxu0 %vm122_vm0, %v557_v17 }
 0x106   :  { %v332_v53 = vpop.trf.xlu0  ;;  %v5573_v54 = vpop.trf.xlu1 }
 0x107   :  { %4188 = vmatprep.mubr.msk.f32.mxu1 %vm122_vm0, %v332_v53  ;;  %4215 = vmatmul.mubr.msk.f32.vlgmr.msra.gmra.mrb[16].mxu0 %vm122_vm0, %v558_v19 }
 0x108   :  { %4217 = vmatprep.mubr.msk.f32.mxu0 %vm122_vm0, %v559_v21  ;;  %4265 = vmatpush3.msra.mxu0 %v78_v24 }
 0x10a   :  { %v333_v55 = vpop.trf.xlu0  ;;  %v5578_v56 = vpop.trf.xlu1 }
 0x10b   :  { %4189 = vmatmul.mubr.msk.f32.vlgmr.msra.gmra.mrb[0].mxu1 %vm122_vm0, %v333_v55  ;;  %4218 = vmatmul.mubr.msk.f32.gmra.mrb[18].mxu0 %vm122_vm0, %v560_v23 }
 0x10c   :  { %4220 = vmatprep.mubr.msk.f32.mxu0 %vm122_vm0, %v561_v26  ;;  %4239 = vmatpush3.msra.mxu1 %v5553_v11 }
 0x10d   :  { %4290 = vmatprep.subr.mxu1 %v5580_v57 }
 0x10e   :  { %v334_v58 = vpop.trf.xlu0  ;;  %v784_v59 = vpop.trf.xlu1 }
 0x10f   :  { %4191 = vmatprep.mubr.msk.f32.mxu1 %vm122_vm0, %v334_v58  ;;  %4221 = vmatmul.mubr.msk.f32.gmra.mrb[20].mxu0 %vm122_vm0, %v562_v28 }
 0x110   :  { %4223 = vmatprep.mubr.msk.f32.mxu0 %vm122_vm0, %v563_v30 }
 0x112   :  { %v335_v60 = vpop.trf.xlu0  ;;  %v785_v61 = vpop.trf.xlu1 }
 0x113   :  { %4192 = vmatmul.mubr.msk.f32.gmra.mrb[2].mxu1 %vm122_vm0, %v335_v60  ;;  %4224 = vmatmul.mubr.msk.f32.gmra.mrb[22].mxu0 %vm122_vm0, %v564_v32 }
 0x114   :  { %4226 = vmatprep.mubr.msk.f32.mxu0 %vm122_vm0, %v565_v34 }
 0x116   :  { %v336_v62 = vpop.trf.xlu0  ;;  %v786_v63 = vpop.trf.xlu1 }
 0x117   :  { %4194 = vmatprep.mubr.msk.f32.mxu1 %vm122_vm0, %v336_v62  ;;  %4227 = vmatmul.mubr.msk.f32.gmra.mrb[24].mxu0 %vm122_vm0, %v566_v36  ;;  %v1891_v62 = vlaneseq }
 0x118   :  { %4229 = vmatprep.mubr.msk.f32.mxu0 %vm122_vm0, %v567_v38 }
 0x11a   :  { %v337_v0 = vpop.trf.xlu0  ;;  %v787_v1 = vpop.trf.xlu1 }
 0x11b   :  { %4195 = vmatmul.mubr.msk.f32.gmra.mrb[4].mxu1 %vm122_vm0, %v337_v0  ;;  %4230 = vmatmul.mubr.msk.f32.gmra.mrb[26].mxu0 %vm122_vm0, %v568_v40 }
 0x11c   :  { %4232 = vmatprep.mubr.msk.f32.mxu0 %vm122_vm0, %v569_v42 }
 0x11e   :  { %v338_v2 = vpop.trf.xlu0  ;;  %v788_v3 = vpop.trf.xlu1 }
 0x11f   :  { %4197 = vmatprep.mubr.msk.f32.mxu1 %vm122_vm0, %v338_v2  ;;  %4233 = vmatmul.mubr.msk.f32.gmra.mrb[28].mxu0 %vm122_vm0, %v570_v47  ;;  %v80_v2 = vld [vmem:[#allocation5 + $0x30] sm:$0xff] }
 0x120   :  { %4235 = vmatprep.mubr.msk.f32.mxu0 %vm122_vm0, %v571_v50  ;;  %4316 = vmatprep.subr.mxu0 %v80_v2 }
 0x122   :  { %v339_v4 = vpop.trf.xlu0  ;;  %v789_v5 = vpop.trf.xlu1 }
 0x123   :  { %4198 = vmatmul.mubr.msk.f32.gmra.mrb[6].mxu1 %vm122_vm0, %v339_v4  ;;  %4236 = vmatmul.mubr.msk.f32.gmra.mrb[30].mxu0 %vm122_vm0, %v572_v52 }
 0x126   :  { %v340_v6 = vpop.trf.xlu0  ;;  %v790_v7 = vpop.trf.xlu1 }
 0x127   :  { %4200 = vmatprep.mubr.msk.f32.mxu1 %vm122_vm0, %v340_v6 }
 0x12a   :  { %v341_v8 = vpop.trf.xlu0  ;;  %v791_v9 = vpop.trf.xlu1 }
 0x12b   :  { %4201 = vmatmul.mubr.msk.f32.gmra.mrb[8].mxu1 %vm122_vm0, %v341_v8 }
 0x12e   :  { %v342_v10 = vpop.trf.xlu0  ;;  %v792_v11 = vpop.trf.xlu1 }
 0x12f   :  { %4203 = vmatprep.mubr.msk.f32.mxu1 %vm122_vm0, %v342_v10 }
 0x132   :  { %v343_v12 = vpop.trf.xlu0  ;;  %v793_v13 = vpop.trf.xlu1 }
 0x133   :  { %4204 = vmatmul.mubr.msk.f32.gmra.mrb[10].mxu1 %vm122_vm0, %v343_v12 }
 0x136   :  { %v344_v14 = vpop.trf.xlu0  ;;  %v794_v15 = vpop.trf.xlu1 }
 0x137   :  { %4206 = vmatprep.mubr.msk.f32.mxu1 %vm122_vm0, %v344_v14 }
 0x13a   :  { %v345_v16 = vpop.trf.xlu0  ;;  %v795_v17 = vpop.trf.xlu1 }
 0x13b   :  { %4207 = vmatmul.mubr.msk.f32.gmra.mrb[12].mxu1 %vm122_vm0, %v345_v16 }
 0x13e   :  { %v346_v18 = vpop.trf.xlu0  ;;  %v796_v19 = vpop.trf.xlu1 }
 0x13f   :  { %4209 = vmatprep.mubr.msk.f32.mxu1 %vm122_vm0, %v346_v18 }
 0x142   :  { %v347_v20 = vpop.trf.xlu0  ;;  %v797_v21 = vpop.trf.xlu1 }
 0x143   :  { %4210 = vmatmul.mubr.msk.f32.gmra.mrb[14].mxu1 %vm122_vm0, %v347_v20 }
 0x144   :  { %4240 = vmatprep.mubr.msk.f32.mxu1 %vm122_vm0, %v5573_v54 }
 0x146   :  { %v1007_v22 = vpop.trf.xlu0  ;;  %v1232_v23 = vpop.trf.xlu1 }
 0x147   :  { %4241 = vmatmul.mubr.msk.f32.vlgmr.msra.gmra.mrb[16].mxu1 %vm122_vm0, %v5578_v56  ;;  %4266 = vmatprep.mubr.msk.f32.mxu0 %vm122_vm0, %v1007_v22 }
 0x148   :  { %4243 = vmatprep.mubr.msk.f32.mxu1 %vm122_vm0, %v784_v59  ;;  %4291 = vmatpush3.msra.mxu1 %v5580_v57 }
 0x14a   :  { %v1008_v24 = vpop.trf.xlu0  ;;  %v1233_v25 = vpop.trf.xlu1 }
 0x14b   :  { %4244 = vmatmul.mubr.msk.f32.gmra.mrb[18].mxu1 %vm122_vm0, %v785_v61  ;;  %4267 = vmatmul.mubr.msk.f32.vlgmr.msra.gmra.mrb[32].mxu0 %vm122_vm0, %v1008_v24 }
 0x14c   :  { %4246 = vmatprep.mubr.msk.f32.mxu1 %vm122_vm0, %v786_v63  ;;  %4317 = vmatpush3.msra.mxu0 %v80_v2 }
 0x14e   :  { %v1009_v26 = vpop.trf.xlu0  ;;  %v1234_v27 = vpop.trf.xlu1 }
 0x14f   :  { %4247 = vmatmul.mubr.msk.f32.gmra.mrb[20].mxu1 %vm122_vm0, %v787_v1  ;;  %4269 = vmatprep.mubr.msk.f32.mxu0 %vm122_vm0, %v1009_v26  ;;  %v5665_v1 = vand.u32 127, %v1891_v62 }
 0x150   :  { %4249 = vmatprep.mubr.msk.f32.mxu1 %vm122_vm0, %v788_v3 }
 0x151   :  { %vm1893_vm1 = vcmp.lt.s32.totalorder %v5665_v1, 16 }
 0x152   :  { %v1010_v28 = vpop.trf.xlu0  ;;  %v1235_v29 = vpop.trf.xlu1 }
 0x153   :  { %4250 = vmatmul.mubr.msk.f32.gmra.mrb[22].mxu1 %vm122_vm0, %v789_v5  ;;  %4270 = vmatmul.mubr.msk.f32.gmra.mrb[34].mxu0 %vm122_vm0, %v1010_v28  ;;  %v81_v5 = vld [vmem:[#allocation5 + $0x38] sm:$0xff] }
 0x154   :  { %4252 = vmatprep.mubr.msk.f32.mxu1 %vm122_vm0, %v790_v7  ;;  %4342 = vmatprep.subr.mxu1 %v81_v5 }
 0x156   :  { %v1011_v30 = vpop.trf.xlu0  ;;  %v1236_v31 = vpop.trf.xlu1 }
 0x157   :  { %4253 = vmatmul.mubr.msk.f32.gmra.mrb[24].mxu1 %vm122_vm0, %v791_v9  ;;  %4272 = vmatprep.mubr.msk.f32.mxu0 %vm122_vm0, %v1011_v30 }
 0x158   :  { %4255 = vmatprep.mubr.msk.f32.mxu1 %vm122_vm0, %v792_v11 }
 0x15a   :  { %v1012_v32 = vpop.trf.xlu0  ;;  %v1237_v33 = vpop.trf.xlu1 }
 0x15b   :  { %4256 = vmatmul.mubr.msk.f32.gmra.mrb[26].mxu1 %vm122_vm0, %v793_v13  ;;  %4273 = vmatmul.mubr.msk.f32.gmra.mrb[36].mxu0 %vm122_vm0, %v1012_v32 }
 0x15c   :  { %4258 = vmatprep.mubr.msk.f32.mxu1 %vm122_vm0, %v794_v15 }
 0x15e   :  { %v1013_v34 = vpop.trf.xlu0  ;;  %v1238_v35 = vpop.trf.xlu1 }
 0x15f   :  { %4259 = vmatmul.mubr.msk.f32.gmra.mrb[28].mxu1 %vm122_vm0, %v795_v17  ;;  %4275 = vmatprep.mubr.msk.f32.mxu0 %vm122_vm0, %v1013_v34 }
 0x160   :  { %4261 = vmatprep.mubr.msk.f32.mxu1 %vm122_vm0, %v796_v19 }
 0x162   :  { %v1014_v36 = vpop.trf.xlu0  ;;  %v1239_v37 = vpop.trf.xlu1 }
 0x163   :  { %4262 = vmatmul.mubr.msk.f32.gmra.mrb[30].mxu1 %vm122_vm0, %v797_v21  ;;  %4276 = vmatmul.mubr.msk.f32.gmra.mrb[38].mxu0 %vm122_vm0, %v1014_v36 }
 0x164   :  { %4292 = vmatprep.mubr.msk.f32.mxu1 %vm122_vm0, %v1232_v23 }
 0x166   :  { %v1240_v38 = vpop.trf.xlu1  ;;  %v1015_v39 = vpop.trf.xlu0 }
 0x167   :  { %4293 = vmatmul.mubr.msk.f32.vlgmr.msra.gmra.mrb[32].mxu1 %vm122_vm0, %v1233_v25  ;;  %4278 = vmatprep.mubr.msk.f32.mxu0 %vm122_vm0, %v1015_v39 }
 0x168   :  { %4295 = vmatprep.mubr.msk.f32.mxu1 %vm122_vm0, %v1234_v27  ;;  %4343 = vmatpush3.msra.mxu1 %v81_v5 }
 0x16a   :  { %v1241_v40 = vpop.trf.xlu1  ;;  %v1016_v41 = vpop.trf.xlu0 }
 0x16b   :  { %4296 = vmatmul.mubr.msk.f32.gmra.mrb[34].mxu1 %vm122_vm0, %v1235_v29  ;;  %4279 = vmatmul.mubr.msk.f32.gmra.mrb[40].mxu0 %vm122_vm0, %v1016_v41 }
 0x16c   :  { %4298 = vmatprep.mubr.msk.f32.mxu1 %vm122_vm0, %v1236_v31 }
 0x16e   :  { %v1242_v42 = vpop.trf.xlu1  ;;  %v1017_v43 = vpop.trf.xlu0 }
 0x16f   :  { %4299 = vmatmul.mubr.msk.f32.gmra.mrb[36].mxu1 %vm122_vm0, %v1237_v33  ;;  %4281 = vmatprep.mubr.msk.f32.mxu0 %vm122_vm0, %v1017_v43 }
 0x170   :  { %4301 = vmatprep.mubr.msk.f32.mxu1 %vm122_vm0, %v1238_v35 }
 0x172   :  { %v1243_v44 = vpop.trf.xlu1  ;;  %v1018_v45 = vpop.trf.xlu0 }
 0x173   :  { %4302 = vmatmul.mubr.msk.f32.gmra.mrb[38].mxu1 %vm122_vm0, %v1239_v37  ;;  %4282 = vmatmul.mubr.msk.f32.gmra.mrb[42].mxu0 %vm122_vm0, %v1018_v45 }
 0x174   :  { %4304 = vmatprep.mubr.msk.f32.mxu1 %vm122_vm0, %v1240_v38 }
 0x176   :  { %v1244_v46 = vpop.trf.xlu1  ;;  %v1019_v47 = vpop.trf.xlu0 }
 0x177   :  { %4305 = vmatmul.mubr.msk.f32.gmra.mrb[40].mxu1 %vm122_vm0, %v1241_v40  ;;  %4284 = vmatprep.mubr.msk.f32.mxu0 %vm122_vm0, %v1019_v47 }
 0x178   :  { %4307 = vmatprep.mubr.msk.f32.mxu1 %vm122_vm0, %v1242_v42 }
 0x17a   :  { %v1245_v48 = vpop.trf.xlu1  ;;  %v1020_v49 = vpop.trf.xlu0 }
 0x17b   :  { %4308 = vmatmul.mubr.msk.f32.gmra.mrb[42].mxu1 %vm122_vm0, %v1243_v44  ;;  %4285 = vmatmul.mubr.msk.f32.gmra.mrb[44].mxu0 %vm122_vm0, %v1020_v49 }
 0x17c   :  { %4310 = vmatprep.mubr.msk.f32.mxu1 %vm122_vm0, %v1244_v46 }
 0x17e   :  { %v1246_v50 = vpop.trf.xlu1  ;;  %v1021_v51 = vpop.trf.xlu0 }
 0x17f   :  { %4311 = vmatmul.mubr.msk.f32.gmra.mrb[44].mxu1 %vm122_vm0, %v1245_v48  ;;  %4287 = vmatprep.mubr.msk.f32.mxu0 %vm122_vm0, %v1021_v51 }
 0x180   :  { %4313 = vmatprep.mubr.msk.f32.mxu1 %vm122_vm0, %v1246_v50 }
 0x182   :  { %v1247_v52 = vpop.trf.xlu1  ;;  %v1022_v53 = vpop.trf.xlu0 }
 0x183   :  { %4314 = vmatmul.mubr.msk.f32.gmra.mrb[46].mxu1 %vm122_vm0, %v1247_v52  ;;  %4288 = vmatmul.mubr.msk.f32.gmra.mrb[46].mxu0 %vm122_vm0, %v1022_v53 }
 0x186   :  { %v1682_v54 = vpop.trf.xlu1  ;;  %v1457_v55 = vpop.trf.xlu0 }
 0x187   :  { %4344 = vmatprep.mubr.msk.f32.mxu1 %vm122_vm0, %v1682_v54  ;;  %4318 = vmatprep.mubr.msk.f32.mxu0 %vm122_vm0, %v1457_v55 }
 0x18a   :  { %v1683_v56 = vpop.trf.xlu1  ;;  %v1458_v57 = vpop.trf.xlu0 }
 0x18b   :  { %4319 = vmatmul.mubr.msk.f32.vlgmr.msra.gmra.mrb[48].mxu0 %vm122_vm0, %v1458_v57  ;;  %4345 = vmatmul.mubr.msk.f32.vlgmr.msra.gmra.mrb[48].mxu1 %vm122_vm0, %v1683_v56 }
 0x18e   :  { %v1684_v58 = vpop.trf.xlu1  ;;  %v1459_v59 = vpop.trf.xlu0 }
 0x18f   :  { %4321 = vmatprep.mubr.msk.f32.mxu0 %vm122_vm0, %v1459_v59  ;;  %4347 = vmatprep.mubr.msk.f32.mxu1 %vm122_vm0, %v1684_v58 }
 0x192   :  { %v1685_v60 = vpop.trf.xlu1  ;;  %v1460_v61 = vpop.trf.xlu0 }
 0x193   :  { %4322 = vmatmul.mubr.msk.f32.gmra.mrb[50].mxu0 %vm122_vm0, %v1460_v61  ;;  %4348 = vmatmul.mubr.msk.f32.gmra.mrb[50].mxu1 %vm122_vm0, %v1685_v60 }
 0x196   :  { %v1686_v63 = vpop.trf.xlu1  ;;  %v1461_v0 = vpop.trf.xlu0 }
 0x197   :  { %4324 = vmatprep.mubr.msk.f32.mxu0 %vm122_vm0, %v1461_v0  ;;  %4350 = vmatprep.mubr.msk.f32.mxu1 %vm122_vm0, %v1686_v63 }
 0x19a   :  { %v1687_v3 = vpop.trf.xlu1  ;;  %v1462_v4 = vpop.trf.xlu0 }
 0x19b   :  { %4325 = vmatmul.mubr.msk.f32.gmra.mrb[52].mxu0 %vm122_vm0, %v1462_v4  ;;  %4351 = vmatmul.mubr.msk.f32.gmra.mrb[52].mxu1 %vm122_vm0, %v1687_v3 }
 0x19e   :  { %v4164_v6 = vpop.f32.mrb[0].mxu0  ;;  %v1688_v7 = vpop.trf.xlu1 }
 0x19f   :  { %v5672_v8 = vsel %vm1893_vm1, %v4164_v6, -1e+30  ;;  %v237_v9 = vpop.f32.mrb[1].mxu0  ;;  %v1463_v10 = vpop.trf.xlu0  ;;  %4353 = vmatprep.mubr.msk.f32.mxu1 %vm122_vm0, %v1688_v7 }
 0x1a0   :  { %v5676_v11 = vsel %vm1893_vm1, %v237_v9, -1e+30  ;;  %2024 = vmax.xlane.f32.xlu1 %v5672_v8  ;;  %4327 = vmatprep.mubr.msk.f32.mxu0 %vm122_vm0, %v1463_v10 }
 0x1a1   :  { %2022 = vmax.xlane.f32.xlu0 %v5676_v11 }
 0x1a2   :  { %v1689_v12 = vpop.trf.xlu1 }
 0x1a3   :  { %v1464_v13 = vpop.trf.xlu0  ;;  %4354 = vmatmul.mubr.msk.f32.gmra.mrb[54].mxu1 %vm122_vm0, %v1689_v12 }
 0x1a4   :  { %4328 = vmatmul.mubr.msk.f32.gmra.mrb[54].mxu0 %vm122_vm0, %v1464_v13 }
 0x1a6   :  { %v5686_v14 = vpop.f32.mrb[2].mxu0  ;;  %v1690_v15 = vpop.trf.xlu1 }
 0x1a7   :  { %v247_v16 = vpop.f32.mrb[3].mxu0  ;;  %v1465_v17 = vpop.trf.xlu0  ;;  %4356 = vmatprep.mubr.msk.f32.mxu1 %vm122_vm0, %v1690_v15  ;;  %v5762_v57 = vsel %vm1893_vm1, %v5686_v14, -1e+30 }
 0x1a8   :  { %v5692_v18 = vsel %vm1893_vm1, %v247_v16, -1e+30  ;;  %4330 = vmatprep.mubr.msk.f32.mxu0 %vm122_vm0, %v1465_v17 }
 0x1a9   :  { %2026 = vmax.xlane.f32.xlu0 %v5692_v18 }
 0x1aa   :  { %v1691_v19 = vpop.trf.xlu1 }
 0x1ab   :  { %v1466_v20 = vpop.trf.xlu0  ;;  %4357 = vmatmul.mubr.msk.f32.gmra.mrb[56].mxu1 %vm122_vm0, %v1691_v19 }
 0x1ac   :  { %4331 = vmatmul.mubr.msk.f32.gmra.mrb[56].mxu0 %vm122_vm0, %v1466_v20 }
 0x1ae   :  { %v5701_v21 = vpop.f32.mrb[4].mxu0  ;;  %v1692_v22 = vpop.trf.xlu1 }
 0x1af   :  { %v257_v23 = vpop.f32.mrb[5].mxu0  ;;  %v1467_v24 = vpop.trf.xlu0  ;;  %4359 = vmatprep.mubr.msk.f32.mxu1 %vm122_vm0, %v1692_v22  ;;  %v5791_v4 = vsel %vm1893_vm1, %v5701_v21, -1e+30 }
 0x1b0   :  { %4333 = vmatprep.mubr.msk.f32.mxu0 %vm122_vm0, %v1467_v24  ;;  %v5782_v0 = vsel %vm1893_vm1, %v257_v23, -1e+30 }
 0x1b2   :  { %v1693_v25 = vpop.trf.xlu1 }
 0x1b3   :  { %v1468_v26 = vpop.trf.xlu0  ;;  %4360 = vmatmul.mubr.msk.f32.gmra.mrb[58].mxu1 %vm122_vm0, %v1693_v25 }
 0x1b4   :  { %4334 = vmatmul.mubr.msk.f32.gmra.mrb[58].mxu0 %vm122_vm0, %v1468_v26 }
 0x1b6   :  { %v5709_v27 = vpop.f32.mrb[6].mxu0  ;;  %v1694_v28 = vpop.trf.xlu1 }
 0x1b7   :  { %v267_v29 = vpop.f32.mrb[7].mxu0  ;;  %v1469_v30 = vpop.trf.xlu0  ;;  %4362 = vmatprep.mubr.msk.f32.mxu1 %vm122_vm0, %v1694_v28  ;;  %v5820_v16 = vsel %vm1893_vm1, %v5709_v27, -1e+30 }
 0x1b8   :  { %4336 = vmatprep.mubr.msk.f32.mxu0 %vm122_vm0, %v1469_v30  ;;  %v5811_v13 = vsel %vm1893_vm1, %v267_v29, -1e+30 }
 0x1ba   :  { %v1695_v31 = vpop.trf.xlu1 }
 0x1bb   :  { %v1470_v32 = vpop.trf.xlu0  ;;  %4363 = vmatmul.mubr.msk.f32.gmra.mrb[60].mxu1 %vm122_vm0, %v1695_v31 }
 0x1bc   :  { %4337 = vmatmul.mubr.msk.f32.gmra.mrb[60].mxu0 %vm122_vm0, %v1470_v32 }
 0x1be   :  { %v5715_v33 = vpop.f32.mrb[8].mxu0  ;;  %v1696_v34 = vpop.trf.xlu1 }
 0x1bf   :  { %v5717_v35 = vpop.f32.mrb[9].mxu0  ;;  %v1471_v36 = vpop.trf.xlu0  ;;  %4365 = vmatprep.mubr.msk.f32.mxu1 %vm122_vm0, %v1696_v34  ;;  %v5844_v24 = vsel %vm1893_vm1, %v5715_v33, -1e+30 }
 0x1c0   :  { %4339 = vmatprep.mubr.msk.f32.mxu0 %vm122_vm0, %v1471_v36  ;;  %v5837_v22 = vsel %vm1893_vm1, %v5717_v35, -1e+30 }
 0x1c2   :  { %v1697_v37 = vpop.trf.xlu1 }
 0x1c3   :  { %v1472_v38 = vpop.trf.xlu0  ;;  %4366 = vmatmul.mubr.msk.f32.gmra.mrb[62].mxu1 %vm122_vm0, %v1697_v37 }
 0x1c4   :  { %4340 = vmatmul.mubr.msk.f32.gmra.mrb[62].mxu0 %vm122_vm0, %v1472_v38 }
 0x1c6   :  { %v5723_v39 = vpop.f32.mrb[10].mxu0 }
 0x1c7   :  { %v5725_v40 = vpop.f32.mrb[11].mxu0  ;;  %v5866_v30 = vsel %vm1893_vm1, %v5723_v39, -1e+30 }
 0x1c8   :  { %v5859_v28 = vsel %vm1893_vm1, %v5725_v40, -1e+30 }
 0x1ce   :  { %v5727_v41 = vpop.f32.mrb[12].mxu0 }
 0x1cf   :  { %v5729_v42 = vpop.f32.mrb[13].mxu0  ;;  %v5888_v36 = vsel %vm1893_vm1, %v5727_v41, -1e+30 }
 0x1d0   :  { %v5881_v34 = vsel %vm1893_vm1, %v5729_v42, -1e+30 }
 0x1d6   :  { %v5731_v43 = vpop.f32.mrb[14].mxu0 }
 0x1d7   :  { %v5733_v44 = vpop.f32.mrb[15].mxu0  ;;  %v5910_v42 = vsel %vm1893_vm1, %v5731_v43, -1e+30 }
 0x1d8   :  { %v5903_v40 = vsel %vm1893_vm1, %v5733_v44, -1e+30 }
 0x1da   :  { %v5735_v45 = vpop.f32.mrb[16].mxu0 }
 0x1db   :  { %v5737_v46 = vpop.f32.mrb[17].mxu0 }
 0x1dc   :  { %v5925_v43 = vsel %vm1893_vm1, %v5737_v46, -1e+30 }
 0x1dd   :  { %7561 = vst [vmem:[#allocation13_spill] sm:$0xff] %v5925_v43 }
 0x1de   :  { %v4190_v47 = vpop.f32.mrb[0].mxu1  ;;  %v5739_v48 = vpop.f32.mrb[18].mxu0 }
 0x1df   :  { %v5743_v49 = vsel %vm1893_vm1, %v4190_v47, -1e+30  ;;  %v462_v50 = vpop.f32.mrb[1].mxu1  ;;  %v5745_v51 = vpop.f32.mrb[19].mxu0 }
 0x1e0   :  { %2056 = vmax.xlane.f32.xlu1 %v5743_v49  ;;  %v5752_v53 = vsel %vm1893_vm1, %v462_v50, -1e+30 }
 0x1e2   :  { %v5748_v52 = vpop.f32.mrb[20].mxu0 }
 0x1e3   :  { %v5754_v54 = vpop.f32.mrb[21].mxu0 }
 0x1e4   :  { %2054 = vmax.xlane.f32.xlu1 %v5752_v53 }
 0x1e6   :  { %v4193_v55 = vpop.f32.mrb[2].mxu1  ;;  %v5757_v56 = vpop.f32.mrb[22].mxu0 }
 0x1e7   :  { %v472_v58 = vpop.f32.mrb[3].mxu1  ;;  %v5764_v59 = vpop.f32.mrb[23].mxu0  ;;  %v5773_v61 = vsel %vm1893_vm1, %v4193_v55, -1e+30 }
 0x1e8   :  { %v5768_v60 = vsel %vm1893_vm1, %v472_v58, -1e+30  ;;  %2028 = vmax.xlane.f32.xlu1 %v5762_v57 }
 0x1e9   :  { %2058 = vmax.xlane.f32.xlu0 %v5768_v60 }
 0x1ea   :  { %v5776_v62 = vpop.f32.mrb[24].mxu0 }
 0x1eb   :  { %v5778_v63 = vpop.f32.mrb[25].mxu0 }
 0x1ec   :  { %2060 = vmax.xlane.f32.xlu1 %v5773_v61 }
 0x1ed   :  { %2030 = vmax.xlane.f32.xlu0 %v5782_v0 }
 0x1ee   :  { %v4196_v2 = vpop.f32.mrb[4].mxu1  ;;  %v5786_v3 = vpop.f32.mrb[26].mxu0 }
 0x1ef   :  { %v482_v5 = vpop.f32.mrb[5].mxu1  ;;  %v5793_v6 = vpop.f32.mrb[27].mxu0  ;;  %v5802_v9 = vsel %vm1893_vm1, %v4196_v2, -1e+30 }
 0x1f0   :  { %v5797_v7 = vsel %vm1893_vm1, %v482_v5, -1e+30  ;;  %2032 = vmax.xlane.f32.xlu1 %v5791_v4 }
 0x1f1   :  { %2062 = vmax.xlane.f32.xlu0 %v5797_v7 }
 0x1f2   :  { %v5805_v10 = vpop.f32.mrb[28].mxu0 }
 0x1f3   :  { %v5807_v12 = vpop.f32.mrb[29].mxu0 }
 0x1f4   :  { %2064 = vmax.xlane.f32.xlu1 %v5802_v9 }
 0x1f5   :  { %2034 = vmax.xlane.f32.xlu0 %v5811_v13 }
 0x1f6   :  { %v4199_v14 = vpop.f32.mrb[6].mxu1  ;;  %v5815_v15 = vpop.f32.mrb[30].mxu0 }
 0x1f7   :  { %v492_v17 = vpop.f32.mrb[7].mxu1  ;;  %v5822_v19 = vpop.f32.mrb[31].mxu0  ;;  %v5831_v21 = vsel %vm1893_vm1, %v4199_v14, -1e+30 }
 0x1f8   :  { %v5826_v20 = vsel %vm1893_vm1, %v492_v17, -1e+30  ;;  %2036 = vmax.xlane.f32.xlu1 %v5820_v16  ;;  %v5938_v17 = vsel %vm1893_vm1, %v5735_v45, -1e+30 }
 0x1f9   :  { %2066 = vmax.xlane.f32.xlu0 %v5826_v20  ;;  %7563 = vst [vmem:[#allocation15_spill] sm:$0xff] %v5938_v17 }
 0x1fc   :  { %2068 = vmax.xlane.f32.xlu1 %v5831_v21 }
 0x1fd   :  { %2038 = vmax.xlane.f32.xlu0 %v5837_v22 }
 0x1fe   :  { %v4202_v23 = vpop.f32.mrb[8].mxu1 }
 0x1ff   :  { %v502_v25 = vpop.f32.mrb[9].mxu1  ;;  %v5853_v27 = vsel %vm1893_vm1, %v4202_v23, -1e+30 }
 0x200   :  { %v5848_v26 = vsel %vm1893_vm1, %v502_v25, -1e+30  ;;  %2040 = vmax.xlane.f32.xlu1 %v5844_v24 }
 0x201   :  { %2070 = vmax.xlane.f32.xlu0 %v5848_v26 }
 0x204   :  { %2072 = vmax.xlane.f32.xlu1 %v5853_v27 }
 0x205   :  { %2042 = vmax.xlane.f32.xlu0 %v5859_v28 }
 0x206   :  { %v4205_v29 = vpop.f32.mrb[10].mxu1 }
 0x207   :  { %v512_v31 = vpop.f32.mrb[11].mxu1  ;;  %v5875_v33 = vsel %vm1893_vm1, %v4205_v29, -1e+30 }
 0x208   :  { %v5870_v32 = vsel %vm1893_vm1, %v512_v31, -1e+30  ;;  %2044 = vmax.xlane.f32.xlu1 %v5866_v30 }
 0x209   :  { %2074 = vmax.xlane.f32.xlu0 %v5870_v32 }
 0x20c   :  { %2076 = vmax.xlane.f32.xlu1 %v5875_v33 }
 0x20d   :  { %2046 = vmax.xlane.f32.xlu0 %v5881_v34 }
 0x20e   :  { %v4208_v35 = vpop.f32.mrb[12].mxu1 }
 0x20f   :  { %v522_v37 = vpop.f32.mrb[13].mxu1  ;;  %v5897_v39 = vsel %vm1893_vm1, %v4208_v35, -1e+30  ;;  %v5951_v35 = vsel %vm1893_vm1, %v5745_v51, -1e+30 }
 0x210   :  { %v5892_v38 = vsel %vm1893_vm1, %v522_v37, -1e+30  ;;  %2048 = vmax.xlane.f32.xlu1 %v5888_v36  ;;  %7565 = vst [vmem:[#allocation17_spill] sm:$0xff] %v5951_v35 }
 0x211   :  { %2078 = vmax.xlane.f32.xlu0 %v5892_v38 }
 0x214   :  { %2080 = vmax.xlane.f32.xlu1 %v5897_v39 }
 0x215   :  { %2050 = vmax.xlane.f32.xlu0 %v5903_v40 }
 0x216   :  { %v4211_v41 = vpop.f32.mrb[14].mxu1 }
 0x217   :  { %v532_v47 = vpop.f32.mrb[15].mxu1  ;;  %v5919_v44 = vsel %vm1893_vm1, %v4211_v41, -1e+30 }
 0x218   :  { %v5914_v50 = vsel %vm1893_vm1, %v532_v47, -1e+30  ;;  %2052 = vmax.xlane.f32.xlu1 %v5910_v42  ;;  %7560 = vst [vmem:[#allocation12_spill] sm:$0xff] %v5919_v44  ;;  %v5964_v47 = vsel %vm1893_vm1, %v5739_v48, -1e+30 }
 0x219   :  { %2082 = vmax.xlane.f32.xlu0 %v5914_v50  ;;  %7567 = vst [vmem:[#allocation19_spill] sm:$0xff] %v5964_v47 }
 0x21a   :  { %v4242_v55 = vpop.f32.mrb[16].mxu1 }
 0x21b   :  { %v912_v58 = vpop.f32.mrb[17].mxu1  ;;  %v5945_v46 = vsel %vm1893_vm1, %v4242_v55, -1e+30 }
 0x21c   :  { %2084 = vmax.xlane.f32.xlu1 %v5919_v44  ;;  %v5931_v2 = vsel %vm1893_vm1, %v912_v58, -1e+30  ;;  %7564 = vst [vmem:[#allocation16_spill] sm:$0xff] %v5945_v46 }
 0x21d   :  { %2086 = vmax.xlane.f32.xlu0 %v5925_v43  ;;  %7562 = vst [vmem:[#allocation14_spill] sm:$0xff] %v5931_v2 }
 0x21e   :  { %v4245_v5 = vpop.f32.mrb[18].mxu1  ;;  %v5933_v14 = vpop.f32.mrb[32].mxu0 }
 0x21f   :  { %v922_v23 = vpop.f32.mrb[19].mxu1  ;;  %v5940_v25 = vpop.f32.mrb[33].mxu0  ;;  %v5971_v51 = vsel %vm1893_vm1, %v4245_v5, -1e+30  ;;  %v5988_v5 = vsel %vm1893_vm1, %v5748_v52, -1e+30 }
 0x220   :  { %2088 = vmax.xlane.f32.xlu1 %v5938_v17  ;;  %v5957_v45 = vsel %vm1893_vm1, %v922_v23, -1e+30  ;;  %7568 = vst [vmem:[#allocation20_spill] sm:$0xff] %v5971_v51  ;;  %7571 = vst [vmem:[#allocation23_spill] sm:$0xff] %v5988_v5  ;;  %v6003_v52 = vsel %vm1893_vm1, %v5764_v59, -1e+30 }
 0x221   :  { %2118 = vmax.xlane.f32.xlu0 %v5931_v2  ;;  %7566 = vst [vmem:[#allocation18_spill] sm:$0xff] %v5957_v45  ;;  %7573 = vst [vmem:[#allocation25_spill] sm:$0xff] %v6003_v52 }
 0x222   :  { %v4248_v29 = vpop.f32.mrb[20].mxu1 }
 0x223   :  { %v932_v31 = vpop.f32.mrb[21].mxu1 }
 0x224   :  { %2120 = vmax.xlane.f32.xlu1 %v5945_v46  ;;  %v5977_v46 = vsel %vm1893_vm1, %v5754_v54, -1e+30  ;;  %v5983_v48 = vsel %vm1893_vm1, %v932_v31, -1e+30  ;;  %v5995_v54 = vsel %vm1893_vm1, %v4248_v29, -1e+30 }
 0x225   :  { %2090 = vmax.xlane.f32.xlu0 %v5951_v35  ;;  %7569 = vst [vmem:[#allocation21_spill] sm:$0xff] %v5977_v46  ;;  %7570 = vst [vmem:[#allocation22_spill] sm:$0xff] %v5983_v48 }
 0x226   :  { %v4251_v37 = vpop.f32.mrb[22].mxu1  ;;  %v5959_v41 = vpop.f32.mrb[34].mxu0  ;;  %7572 = vst [vmem:[#allocation24_spill] sm:$0xff] %v5995_v54 }
 0x227   :  { %v942_v55 = vpop.f32.mrb[23].mxu1  ;;  %v5966_v58 = vpop.f32.mrb[35].mxu0 }
 0x228   :  { %2092 = vmax.xlane.f32.xlu1 %v5964_v47 }
 0x229   :  { %2122 = vmax.xlane.f32.xlu0 %v5957_v45 }
 0x22a   :  { %v4254_v23 = vpop.f32.mrb[24].mxu1 }
 0x22b   :  { %v952_v35 = vpop.f32.mrb[25].mxu1 }
 0x22c   :  { %2124 = vmax.xlane.f32.xlu1 %v5971_v51 }
 0x22d   :  { %2094 = vmax.xlane.f32.xlu0 %v5977_v46 }
 0x22e   :  { %v4257_v47 = vpop.f32.mrb[26].mxu1  ;;  %v5990_v2 = vpop.f32.mrb[36].mxu0 }
 0x22f   :  { %v962_v45 = vpop.f32.mrb[27].mxu1  ;;  %v5998_v46 = vpop.f32.mrb[37].mxu0 }
 0x230   :  { %2096 = vmax.xlane.f32.xlu1 %v5988_v5  ;;  %v6009_v5 = vsel %vm1893_vm1, %v942_v55, -1e+30 }
 0x231   :  { %2126 = vmax.xlane.f32.xlu0 %v5983_v48  ;;  %7574 = vst [vmem:[#allocation26_spill] sm:$0xff] %v6009_v5  ;;  %v6014_v48 = vsel %vm1893_vm1, %v5757_v56, -1e+30  ;;  %v6029_v56 = vsel %vm1893_vm1, %v5778_v63, -1e+30 }
 0x232   :  { %v4260_v31 = vpop.f32.mrb[28].mxu1  ;;  %7575 = vst [vmem:[#allocation27_spill] sm:$0xff] %v6014_v48  ;;  %7577 = vst [vmem:[#allocation29_spill] sm:$0xff] %v6029_v56  ;;  %v6045_v63 = vsel %vm1893_vm1, %v4254_v23, -1e+30 }
 0x233   :  { %v972_v51 = vpop.f32.mrb[29].mxu1  ;;  %7580 = vst [vmem:[#allocation32_spill] sm:$0xff] %v6045_v63 }
 0x234   :  { %2128 = vmax.xlane.f32.xlu1 %v5995_v54 }
 0x235   :  { %2098 = vmax.xlane.f32.xlu0 %v6003_v52  ;;  %v6023_v52 = vsel %vm1893_vm1, %v4251_v37, -1e+30  ;;  %v6040_v37 = vsel %vm1893_vm1, %v5776_v62, -1e+30  ;;  %v6061_v62 = vsel %vm1893_vm1, %v962_v45, -1e+30 }
 0x236   :  { %v4263_v29 = vpop.f32.mrb[30].mxu1  ;;  %v6016_v43 = vpop.f32.mrb[38].mxu0  ;;  %7576 = vst [vmem:[#allocation28_spill] sm:$0xff] %v6023_v52  ;;  %7579 = vst [vmem:[#allocation31_spill] sm:$0xff] %v6040_v37 }
 0x237   :  { %v982_v17 = vpop.f32.mrb[31].mxu1  ;;  %v6019_v59 = vpop.f32.mrb[39].mxu0  ;;  %7582 = vst [vmem:[#allocation34_spill] sm:$0xff] %v6061_v62 }
 0x238   :  { %2100 = vmax.xlane.f32.xlu1 %v6014_v48  ;;  %v6035_v48 = vsel %vm1893_vm1, %v952_v35, -1e+30  ;;  %v6055_v35 = vsel %vm1893_vm1, %v5793_v6, -1e+30  ;;  %v6075_v6 = vsel %vm1893_vm1, %v4257_v47, -1e+30 }
 0x239   :  { %2130 = vmax.xlane.f32.xlu0 %v6009_v5  ;;  %7578 = vst [vmem:[#allocation30_spill] sm:$0xff] %v6035_v48  ;;  %7581 = vst [vmem:[#allocation33_spill] sm:$0xff] %v6055_v35 }
 0x23a   :  { %v4294_v55 = vpop.f32.mrb[32].mxu1 }
 0x23b   :  { %v1362_v54 = vpop.f32.mrb[33].mxu1 }
 0x23c   :  { %2132 = vmax.xlane.f32.xlu1 %v6023_v52 }
 0x23d   :  { %2102 = vmax.xlane.f32.xlu0 %v6029_v56 }
 0x23e   :  { %v4297_v44 = vpop.f32.mrb[34].mxu1 }
 0x23f   :  { %v1372_v5 = vpop.f32.mrb[35].mxu1 }
 0x240   :  { %2104 = vmax.xlane.f32.xlu1 %v6040_v37 }
 0x241   :  { %2134 = vmax.xlane.f32.xlu0 %v6035_v48  ;;  %v6068_v48 = vsel %vm1893_vm1, %v5786_v3, -1e+30  ;;  %v6091_v3 = vsel %vm1893_vm1, %v972_v51, -1e+30  ;;  %v6111_v51 = vsel %vm1893_vm1, %v5822_v19, -1e+30 }
 0x242   :  { %v6048_v56 = vpop.f32.mrb[36].mxu1  ;;  %7583 = vst [vmem:[#allocation35_spill] sm:$0xff] %v6068_v48  ;;  %7584 = vst [vmem:[#allocation36_spill] sm:$0xff] %v6091_v3  ;;  %v6133_v19 = vsel %vm1893_vm1, %v5940_v25, -1e+30 }
 0x243   :  { %v6050_v52 = vpop.f32.mrb[37].mxu1  ;;  %7585 = vst [vmem:[#allocation37_spill] sm:$0xff] %v6111_v51  ;;  %7588 = vst [vmem:[#allocation40_spill] sm:$0xff] %v6133_v19 }
 0x244   :  { %2136 = vmax.xlane.f32.xlu1 %v6045_v63  ;;  %v6085_v63 = vsel %vm1893_vm1, %v5807_v12, -1e+30  ;;  %v6105_v12 = vsel %vm1893_vm1, %v4260_v31, -1e+30  ;;  %v6122_v31 = vsel %vm1893_vm1, %v5815_v15, -1e+30 }
 0x245   :  { %2106 = vmax.xlane.f32.xlu0 %v6055_v35  ;;  %v6078_v35 = vpop.f32.mrb[40].mxu0  ;;  %v6143_v15 = vsel %vm1893_vm1, %v5933_v14, -1e+30  ;;  %v6163_v14 = vsel %vm1893_vm1, %v5966_v58, -1e+30 }
 0x246   :  { %v6063_v23 = vpop.f32.mrb[38].mxu1  ;;  %v6080_v45 = vpop.f32.mrb[41].mxu0  ;;  %7589 = vst [vmem:[#allocation41_spill] sm:$0xff] %v6143_v15  ;;  %7592 = vst [vmem:[#allocation44_spill] sm:$0xff] %v6163_v14 }
 0x247   :  { %v6070_v37 = vpop.f32.mrb[39].mxu1 }
 0x248   :  { %2108 = vmax.xlane.f32.xlu1 %v6068_v48 }
 0x249   :  { %2138 = vmax.xlane.f32.xlu0 %v6061_v62  ;;  %v6098_v62 = vsel %vm1893_vm1, %v5805_v10, -1e+30  ;;  %v6117_v10 = vsel %vm1893_vm1, %v982_v17, -1e+30  ;;  %v6135_v17 = vpop.f32.mrb[42].mxu0 }
 0x24a   :  { %v6093_v47 = vpop.f32.mrb[40].mxu1  ;;  %7586 = vst [vmem:[#allocation38_spill] sm:$0xff] %v6117_v10 }
 0x24b   :  { %v6100_v48 = vpop.f32.mrb[41].mxu1 }
 0x24c   :  { %2140 = vmax.xlane.f32.xlu1 %v6075_v6 }
 0x24d   :  { %2110 = vmax.xlane.f32.xlu0 %v6085_v63 }
 0x250   :  { %2112 = vmax.xlane.f32.xlu1 %v6098_v62 }
 0x251   :  { %2142 = vmax.xlane.f32.xlu0 %v6091_v3  ;;  %v6127_v3 = vsel %vm1893_vm1, %v4263_v29, -1e+30  ;;  %v6148_v29 = vsel %vm1893_vm1, %v1362_v54, -1e+30  ;;  %v6169_v54 = vsel %vm1893_vm1, %v5959_v41, -1e+30 }
 0x252   :  { %7587 = vst [vmem:[#allocation39_spill] sm:$0xff] %v6127_v3  ;;  %7590 = vst [vmem:[#allocation42_spill] sm:$0xff] %v6148_v29 }
 0x253   :  { %7593 = vst [vmem:[#allocation45_spill] sm:$0xff] %v6169_v54 }
 0x254   :  { %2144 = vmax.xlane.f32.xlu1 %v6105_v12 }
 0x255   :  { %2114 = vmax.xlane.f32.xlu0 %v6111_v51  ;;  %v6137_v51 = vpop.f32.mrb[43].mxu0 }
 0x258   :  { %2116 = vmax.xlane.f32.xlu1 %v6122_v31 }
 0x259   :  { %2146 = vmax.xlane.f32.xlu0 %v6117_v10  ;;  %v6150_v10 = vpop.f32.mrb[42].mxu1 }
 0x25a   :  { %v6152_v25 = vpop.f32.mrb[43].mxu1 }
 0x25c   :  { %2148 = vmax.xlane.f32.xlu1 %v6127_v3  ;;  %v6157_v3 = vsel %vm1893_vm1, %v4294_v55, -1e+30  ;;  %v6174_v55 = vsel %vm1893_vm1, %v1372_v5, -1e+30  ;;  %v6189_v5 = vpop.f32.mrb[44].mxu0 }
 0x25d   :  { %2150 = vmax.xlane.f32.xlu0 %v6133_v19  ;;  %7591 = vst [vmem:[#allocation43_spill] sm:$0xff] %v6157_v3  ;;  %7594 = vst [vmem:[#allocation46_spill] sm:$0xff] %v6174_v55  ;;  %v6191_v19 = vpop.f32.mrb[45].mxu0 }
 0x260   :  { %2152 = vmax.xlane.f32.xlu1 %v6143_v15  ;;  %v2025_v15 = vpop.xlane.xlu1 %2024 }
 0x261   :  { %2182 = vmax.xlane.f32.xlu0 %v6148_v29  ;;  %v2023_v29 = vpop.xlane.xlu0 %2022  ;;  %v2279_v58 = vsub.f32 %v5672_v8, %v2025_v15 }
 0x262   :  { %v2278_v41 = vsub.f32 %v5676_v11, %v2023_v29 }
 0x263   :  { %v2408_v8 = vmul.f32 1.442695, %v2279_v58 }
 0x264   :  { %2184 = vmax.xlane.f32.xlu1 %v6157_v3  ;;  %v6180_v3 = vsel %vm1893_vm1, %v4297_v44, -1e+30  ;;  %v6197_v44 = vsel %vm1893_vm1, %v5990_v2, -1e+30  ;;  %v2406_v11 = vmul.f32 1.442695, %v2278_v41 }
 0x265   :  { %2154 = vmax.xlane.f32.xlu0 %v6163_v14  ;;  %7595 = vst [vmem:[#allocation47_spill] sm:$0xff] %v6180_v3  ;;  %v6187_v14 = vsel %vm1893_vm1, %v5998_v46, -1e+30  ;;  %7597 = vst [vmem:[#allocation49_spill] sm:$0xff] %v6197_v44  ;;  %v2027_v29 = vpop.xlane.xlu0 %2026  ;;  %4850 = vpow2.f32 %v2408_v8  ;;  %v6215_v41 = vsel %vm1893_vm1, %v6048_v56, -1e+30 }
 0x266   :  { %7596 = vst [vmem:[#allocation48_spill] sm:$0xff] %v6187_v14  ;;  %v2280_v2 = vsub.f32 %v5692_v18, %v2027_v29  ;;  %7599 = vst [vmem:[#allocation51_spill] sm:$0xff] %v6215_v41  ;;  %4852 = vpow2.f32 %v2406_v11  ;;  %v6228_v56 = vsel %vm1893_vm1, %v6016_v43, -1e+30 }
 0x267   :  { %7601 = vst [vmem:[#allocation53_spill] sm:$0xff] %v6228_v56 }
 0x268   :  { %2156 = vmax.xlane.f32.xlu1 %v6169_v54  ;;  %v6206_v54 = vpop.f32.mrb[44].mxu1  ;;  %v2410_v18 = vmul.f32 1.442695, %v2280_v2 }
 0x269   :  { %2186 = vmax.xlane.f32.xlu0 %v6174_v55  ;;  %v6204_v55 = vsel %vm1893_vm1, %v6050_v52, -1e+30  ;;  %v6208_v58 = vpop.f32.mrb[45].mxu1 }
 0x26a   :  { %7598 = vst [vmem:[#allocation50_spill] sm:$0xff] %v6204_v55  ;;  %v6239_v2 = vpop.f32.mrb[46].mxu1 }
 0x26c   :  { %2188 = vmax.xlane.f32.xlu1 %v6180_v3 }
 0x26d   :  { %v2057_v15 = vpop.xlane.xlu1 %2056  ;;  %2158 = vmax.xlane.f32.xlu0 %v6187_v14 }
 0x26e   :  { %v2295_v46 = vsub.f32 %v5743_v49, %v2057_v15  ;;  %v6222_v15 = vsel %vm1893_vm1, %v6019_v59, -1e+30  ;;  %v6235_v59 = vsel %vm1893_vm1, %v6070_v37, -1e+30  ;;  %v6245_v37 = vpop.f32.mrb[46].mxu0 }
 0x26f   :  { %7600 = vst [vmem:[#allocation52_spill] sm:$0xff] %v6222_v15  ;;  %7602 = vst [vmem:[#allocation54_spill] sm:$0xff] %v6235_v59 }
 0x270   :  { %2160 = vmax.xlane.f32.xlu1 %v6197_v44  ;;  %v2440_v3 = vmul.f32 1.442695, %v2295_v46 }
 0x271   :  { %v2055_v49 = vpop.xlane.xlu1 %2054  ;;  %2190 = vmax.xlane.f32.xlu0 %v6204_v55 }
 0x272   :  { %v2294_v52 = vsub.f32 %v5752_v53, %v2055_v49  ;;  %4854 = vpow2.f32 %v2440_v3 }
 0x274   :  { %v2438_v8 = vmul.f32 1.442695, %v2294_v52  ;;  %2192 = vmax.xlane.f32.xlu1 %v6215_v41  ;;  %v6242_v52 = vpop.f32.mrb[47].mxu1 }
 0x275   :  { %v2029_v29 = vpop.xlane.xlu1 %2028  ;;  %2162 = vmax.xlane.f32.xlu0 %v6222_v15 }
 0x276   :  { %4856 = vpow2.f32 %v2438_v8  ;;  %v2281_v53 = vsub.f32 %v5762_v57, %v2029_v29  ;;  %v2059_v11 = vpop.xlane.xlu0 %2058  ;;  %v6247_v29 = vpop.eup %4850 }
 0x277   :  { %v2296_v46 = vsub.f32 %v5768_v60, %v2059_v11  ;;  %4858 = vpow2.f32 %v2410_v18  ;;  %v6252_v11 = vpop.eup %4852 }
 0x278   :  { %v2412_v3 = vmul.f32 1.442695, %v2281_v53  ;;  %2164 = vmax.xlane.f32.xlu1 %v6228_v56  ;;  %v6250_v53 = vpop.f32.mrb[47].mxu0 }
 0x279   :  { %v2442_v43 = vmul.f32 1.442695, %v2296_v46  ;;  %v2061_v49 = vpop.xlane.xlu1 %2060  ;;  %2194 = vmax.xlane.f32.xlu0 %v6235_v59 }
 0x27a   :  { %4860 = vpow2.f32 %v2412_v3  ;;  %v2297_v57 = vsub.f32 %v5773_v61, %v2061_v49  ;;  %v2031_v8 = vpop.xlane.xlu0 %2030 }
 0x27b   :  { %v2282_v60 = vsub.f32 %v5782_v0, %v2031_v8  ;;  %4862 = vpow2.f32 %v2442_v43 }
 0x27c   :  { %v2444_v18 = vmul.f32 1.442695, %v2297_v57  ;;  %2664 = vadd.xlane.f32.xlu1 %v6247_v29  ;;  %v6257_v49 = vpop.eup %4854  ;;  %v6263_v57 = vpop.f32.mrb[48].mxu1 }
 0x27d   :  { %v2414_v46 = vmul.f32 1.442695, %v2282_v60  ;;  %v2033_v59 = vpop.xlane.xlu1 %2032  ;;  %2662 = vadd.xlane.f32.xlu0 %v6252_v11 }
 0x27e   :  { %4864 = vpow2.f32 %v2444_v18  ;;  %v2283_v61 = vsub.f32 %v5791_v4, %v2033_v59  ;;  %v2063_v3 = vpop.xlane.xlu0 %2062  ;;  %v6266_v18 = vpop.f32.mrb[49].mxu1 }
 0x27f   :  { %v2298_v0 = vsub.f32 %v5797_v7, %v2063_v3  ;;  %4866 = vpow2.f32 %v2414_v46 }
 0x280   :  { %v6260_v8 = vpop.eup %4856  ;;  %v2416_v56 = vmul.f32 1.442695, %v2283_v61  ;;  %2696 = vadd.xlane.f32.xlu1 %v6257_v49 }
 0x281   :  { %v2446_v43 = vmul.f32 1.442695, %v2298_v0  ;;  %v2065_v60 = vpop.xlane.xlu1 %2064  ;;  %2694 = vadd.xlane.f32.xlu0 %v6260_v8  ;;  %v6269_v15 = vpop.eup %4858 }
 0x282   :  { %4868 = vpow2.f32 %v2416_v56  ;;  %v2299_v4 = vsub.f32 %v5802_v9, %v2065_v60  ;;  %v2035_v59 = vpop.xlane.xlu0 %2034 }
 0x283   :  { %v2284_v7 = vsub.f32 %v5811_v13, %v2035_v59  ;;  %4870 = vpow2.f32 %v2446_v43  ;;  %v6282_v59 = vpop.f32.mrb[48].mxu0  ;;  %v6284_v43 = vpop.f32.mrb[50].mxu1 }
 0x284   :  { %v6272_v61 = vpop.eup %4860  ;;  %v2448_v3 = vmul.f32 1.442695, %v2299_v4  ;;  %7603 = vst [vmem:[#allocation55_spill] sm:$0xff] %v6284_v43 }
 0x285   :  { %v2418_v41 = vmul.f32 1.442695, %v2284_v7  ;;  %v2037_v46 = vpop.xlane.xlu1 %2036  ;;  %2668 = vadd.xlane.f32.xlu1 %v6272_v61  ;;  %2666 = vadd.xlane.f32.xlu0 %v6269_v15  ;;  %v6277_v9 = vpop.eup %4862 }
 0x286   :  { %4872 = vpow2.f32 %v2448_v3  ;;  %v2285_v56 = vsub.f32 %v5820_v16, %v2037_v46  ;;  %v2067_v0 = vpop.xlane.xlu0 %2066  ;;  %v6288_v16 = vpop.f32.mrb[51].mxu1 }
 0x287   :  { %v2300_v60 = vsub.f32 %v5826_v20, %v2067_v0  ;;  %4874 = vpow2.f32 %v2418_v41  ;;  %v6294_v0 = vpop.f32.mrb[49].mxu0  ;;  %v6306_v43 = vpop.f32.mrb[52].mxu1 }
 0x288   :  { %v6280_v55 = vpop.eup %4864  ;;  %v2420_v13 = vmul.f32 1.442695, %v2285_v56  ;;  %7606 = vst [vmem:[#allocation58_spill] sm:$0xff] %v6306_v43 }
 0x289   :  { %v2450_v4 = vmul.f32 1.442695, %v2300_v60  ;;  %v2069_v7 = vpop.xlane.xlu1 %2068  ;;  %2700 = vadd.xlane.f32.xlu1 %v6280_v55  ;;  %2698 = vadd.xlane.f32.xlu0 %v6277_v9  ;;  %v6291_v46 = vpop.eup %4866 }
 0x28a   :  { %4876 = vpow2.f32 %v2420_v13  ;;  %v2301_v3 = vsub.f32 %v5831_v21, %v2069_v7  ;;  %v2039_v20 = vpop.xlane.xlu0 %2038 }
 0x28b   :  { %v2286_v56 = vsub.f32 %v5837_v22, %v2039_v20  ;;  %4878 = vpow2.f32 %v2450_v4  ;;  %v6304_v20 = vpop.f32.mrb[50].mxu0 }
 0x28c   :  { %v6296_v44 = vpop.eup %4868  ;;  %v2452_v41 = vmul.f32 1.442695, %v2301_v3 }
 0x28d   :  { %7604 = vst [vmem:[#allocation56_spill] sm:$0xff] %v6296_v44  ;;  %v2422_v60 = vmul.f32 1.442695, %v2286_v56  ;;  %v2041_v14 = vpop.xlane.xlu1 %2040  ;;  %2672 = vadd.xlane.f32.xlu1 %v6296_v44  ;;  %2670 = vadd.xlane.f32.xlu0 %v6291_v46  ;;  %v6301_v7 = vpop.eup %4870 }
 0x28e   :  { %4880 = vpow2.f32 %v2452_v41  ;;  %v2287_v21 = vsub.f32 %v5844_v24, %v2041_v14  ;;  %v2071_v13 = vpop.xlane.xlu0 %2070  ;;  %7605 = vst [vmem:[#allocation57_spill] sm:$0xff] %v6301_v7  ;;  %v6312_v24 = vpop.f32.mrb[53].mxu1 }
 0x28f   :  { %v2302_v22 = vsub.f32 %v5848_v26, %v2071_v13  ;;  %4882 = vpow2.f32 %v2422_v60  ;;  %7608 = vst [vmem:[#allocation60_spill] sm:$0xff] %v6312_v24  ;;  %v6315_v41 = vpop.f32.mrb[51].mxu0 }
 0x290   :  { %v6308_v3 = vpop.eup %4872  ;;  %v2424_v4 = vmul.f32 1.442695, %v2287_v21 }
 0x291   :  { %7607 = vst [vmem:[#allocation59_spill] sm:$0xff] %v6308_v3  ;;  %v2454_v56 = vmul.f32 1.442695, %v2302_v22  ;;  %v2073_v44 = vpop.xlane.xlu1 %2072  ;;  %2704 = vadd.xlane.f32.xlu1 %v6308_v3  ;;  %2702 = vadd.xlane.f32.xlu0 %v6301_v7  ;;  %v6317_v13 = vpop.eup %4874 }
 0x292   :  { %4884 = vpow2.f32 %v2424_v4  ;;  %v2303_v14 = vsub.f32 %v5853_v27, %v2073_v44  ;;  %v2043_v26 = vpop.xlane.xlu0 %2042 }
 0x293   :  { %v2288_v43 = vsub.f32 %v5859_v28, %v2043_v26  ;;  %4886 = vpow2.f32 %v2454_v56  ;;  %v6330_v26 = vpop.f32.mrb[52].mxu0  ;;  %v6332_v56 = vpop.f32.mrb[54].mxu1 }
 0x294   :  { %v6320_v21 = vpop.eup %4876  ;;  %v2456_v60 = vmul.f32 1.442695, %v2303_v14  ;;  %7611 = vst [vmem:[#allocation63_spill] sm:$0xff] %v6332_v56 }
 0x295   :  { %v2426_v22 = vmul.f32 1.442695, %v2288_v43  ;;  %v2045_v3 = vpop.xlane.xlu1 %2044  ;;  %2676 = vadd.xlane.f32.xlu1 %v6320_v21  ;;  %2674 = vadd.xlane.f32.xlu0 %v6317_v13  ;;  %v6325_v4 = vpop.eup %4878 }
 0x296   :  { %4888 = vpow2.f32 %v2456_v60  ;;  %v2289_v27 = vsub.f32 %v5866_v30, %v2045_v3  ;;  %v2075_v44 = vpop.xlane.xlu0 %2074  ;;  %7609 = vst [vmem:[#allocation61_spill] sm:$0xff] %v6325_v4  ;;  %v6337_v60 = vpop.f32.mrb[55].mxu1 }
 0x297   :  { %v2304_v24 = vsub.f32 %v5870_v32, %v2075_v44  ;;  %4890 = vpow2.f32 %v2426_v22  ;;  %7612 = vst [vmem:[#allocation64_spill] sm:$0xff] %v6337_v60  ;;  %v7477_v32 = vmov 0.0|0.0   ;;  %v6344_v22 = vpop.f32.mrb[53].mxu0 }
 0x298   :  { %v6328_v7 = vpop.eup %4880  ;;  %v2428_v28 = vmul.f32 1.442695, %v2289_v27  ;;  %4648 = vmatprep.subr.bf16.mxu0 %v7477_v32  ;;  %4672 = vmatprep.subr.bf16.mxu1 %v7477_v32 }
 0x299   :  { %7610 = vst [vmem:[#allocation62_spill] sm:$0xff] %v6328_v7  ;;  %v2458_v43 = vmul.f32 1.442695, %v2304_v24  ;;  %v2077_v14 = vpop.xlane.xlu1 %2076  ;;  %2708 = vadd.xlane.f32.xlu1 %v6328_v7  ;;  %2706 = vadd.xlane.f32.xlu0 %v6325_v4  ;;  %v6341_v27 = vpop.eup %4882 }
 0x29a   :  { %4892 = vpow2.f32 %v2428_v28  ;;  %v2305_v30 = vsub.f32 %v5875_v33, %v2077_v14  ;;  %v2047_v3 = vpop.xlane.xlu0 %2046  ;;  %v6356_v7 = vpop.f32.mrb[54].mxu0 }
 0x29b   :  { %v2290_v24 = vsub.f32 %v5881_v34, %v2047_v3  ;;  %4894 = vpow2.f32 %v2458_v43  ;;  %7614 = vst [vmem:[#allocation66_spill] sm:$0xff] %v6356_v7  ;;  %v6358_v43 = vpop.f32.mrb[56].mxu1 }
 0x29c   :  { %v6346_v44 = vpop.eup %4884  ;;  %v2460_v56 = vmul.f32 1.442695, %v2305_v30  ;;  %7615 = vst [vmem:[#allocation67_spill] sm:$0xff] %v6358_v43 }
 0x29d   :  { %v2430_v28 = vmul.f32 1.442695, %v2290_v24  ;;  %v2049_v33 = vpop.xlane.xlu1 %2048  ;;  %2680 = vadd.xlane.f32.xlu1 %v6346_v44  ;;  %2678 = vadd.xlane.f32.xlu0 %v6341_v27  ;;  %v6351_v60 = vpop.eup %4886 }
 0x29e   :  { %4896 = vpow2.f32 %v2460_v56  ;;  %v2291_v14 = vsub.f32 %v5888_v36, %v2049_v33  ;;  %v2079_v32 = vpop.xlane.xlu0 %2078  ;;  %7613 = vst [vmem:[#allocation65_spill] sm:$0xff] %v6351_v60  ;;  %v6363_v33 = vpop.f32.mrb[57].mxu1 }
 0x29f   :  { %v2306_v34 = vsub.f32 %v5892_v38, %v2079_v32  ;;  %4898 = vpow2.f32 %v2430_v28  ;;  %7616 = vst [vmem:[#allocation68_spill] sm:$0xff] %v6363_v33 }
 0x2a0   :  { %v6354_v3 = vpop.eup %4888  ;;  %v2432_v4 = vmul.f32 1.442695, %v2291_v14  ;;  %v6368_v14 = vpop.f32.mrb[55].mxu0 }
 0x2a1   :  { %v2462_v30 = vmul.f32 1.442695, %v2306_v34  ;;  %v2081_v24 = vpop.xlane.xlu1 %2080  ;;  %2712 = vadd.xlane.f32.xlu1 %v6354_v3  ;;  %2710 = vadd.xlane.f32.xlu0 %v6351_v60  ;;  %v6365_v38 = vpop.eup %4890  ;;  %7618 = vst [vmem:[#allocation70_spill] sm:$0xff] %v6368_v14 }
 0x2a2   :  { %4900 = vpow2.f32 %v2432_v4  ;;  %v2307_v36 = vsub.f32 %v5897_v39, %v2081_v24  ;;  %v2051_v56 = vpop.xlane.xlu0 %2050  ;;  %7617 = vst [vmem:[#allocation69_spill] sm:$0xff] %v6365_v38  ;;  %v6380_v14 = vpop.f32.mrb[56].mxu0 }
 0x2a3   :  { %v2292_v32 = vsub.f32 %v5903_v40, %v2051_v56  ;;  %4902 = vpow2.f32 %v2462_v30  ;;  %7622 = vst [vmem:[#allocation74_spill] sm:$0xff] %v6380_v14  ;;  %v6382_v30 = vpop.f32.mrb[58].mxu1  ;;  %v6392_v14 = vpop.f32.mrb[57].mxu0 }
 0x2a4   :  { %v6370_v43 = vpop.eup %4892  ;;  %v2464_v28 = vmul.f32 1.442695, %v2307_v36  ;;  %7623 = vst [vmem:[#allocation75_spill] sm:$0xff] %v6382_v30 }
 0x2a5   :  { %7619 = vst [vmem:[#allocation71_spill] sm:$0xff] %v6370_v43  ;;  %v2434_v34 = vmul.f32 1.442695, %v2292_v32  ;;  %v2053_v7 = vpop.xlane.xlu1 %2052  ;;  %2684 = vadd.xlane.f32.xlu1 %v6370_v43  ;;  %2682 = vadd.xlane.f32.xlu0 %v6365_v38  ;;  %v6375_v24 = vpop.eup %4894 }
 0x2a6   :  { %4904 = vpow2.f32 %v2464_v28  ;;  %v2293_v39 = vsub.f32 %v5910_v42, %v2053_v7  ;;  %v2083_v4 = vpop.xlane.xlu0 %2082  ;;  %7620 = vst [vmem:[#allocation72_spill] sm:$0xff] %v6375_v24  ;;  %v7624_v42 = vld [vmem:[#allocation12_spill] sm:$0xff]  ;;  %v6387_v38 = vpop.f32.mrb[59].mxu1 }
 0x2a7   :  { %v2308_v40 = vsub.f32 %v5914_v50, %v2083_v4  ;;  %4906 = vpow2.f32 %v2434_v34  ;;  %7625 = vst [vmem:[#allocation12_spill] sm:$0xff] %v6387_v38  ;;  %v6404_v43 = vpop.f32.mrb[58].mxu0 }
 0x2a8   :  { %v6378_v56 = vpop.eup %4896  ;;  %v2436_v33 = vmul.f32 1.442695, %v2293_v39  ;;  %v7627_v39 = vld [vmem:[#allocation13_spill] sm:$0xff]  ;;  %7634 = vst [vmem:[#allocation78_spill] sm:$0xff] %v6404_v43  ;;  %v6416_v43 = vpop.f32.mrb[59].mxu0 }
 0x2a9   :  { %7621 = vst [vmem:[#allocation73_spill] sm:$0xff] %v6378_v56  ;;  %v2466_v36 = vmul.f32 1.442695, %v2308_v40  ;;  %v2085_v32 = vpop.xlane.xlu1 %2084  ;;  %2716 = vadd.xlane.f32.xlu1 %v6378_v56  ;;  %2714 = vadd.xlane.f32.xlu0 %v6375_v24  ;;  %v6389_v50 = vpop.eup %4898  ;;  %7628 = vst [vmem:[#allocation13_spill] sm:$0xff] %v6392_v14  ;;  %v7632_v24 = vld [vmem:[#allocation14_spill] sm:$0xff] }
 0x2aa   :  { %4908 = vpow2.f32 %v2436_v33  ;;  %v2309_v7 = vsub.f32 %v7624_v42, %v2085_v32  ;;  %v2087_v28 = vpop.xlane.xlu0 %2086  ;;  %7626 = vst [vmem:[#allocation76_spill] sm:$0xff] %v6389_v50  ;;  %v7630_v33 = vld [vmem:[#allocation15_spill] sm:$0xff] }
 0x2ab   :  { %v2310_v4 = vsub.f32 %v7627_v39, %v2087_v28  ;;  %4910 = vpow2.f32 %v2466_v36  ;;  %v6406_v36 = vpop.f32.mrb[60].mxu1 }
 0x2ac   :  { %v6394_v30 = vpop.eup %4900  ;;  %v2468_v34 = vmul.f32 1.442695, %v2309_v7  ;;  %7635 = vst [vmem:[#allocation79_spill] sm:$0xff] %v6406_v36 }
 0x2ad   :  { %7629 = vst [vmem:[#allocation77_spill] sm:$0xff] %v6394_v30  ;;  %v2470_v40 = vmul.f32 1.442695, %v2310_v4  ;;  %v2089_v56 = vpop.xlane.xlu1 %2088  ;;  %2688 = vadd.xlane.f32.xlu1 %v6394_v30  ;;  %2686 = vadd.xlane.f32.xlu0 %v6389_v50  ;;  %v6399_v38 = vpop.eup %4902 }
 0x2ae   :  { %4912 = vpow2.f32 %v2468_v34  ;;  %v2311_v32 = vsub.f32 %v7630_v33, %v2089_v56  ;;  %v2119_v42 = vpop.xlane.xlu0 %2118  ;;  %7631 = vst [vmem:[#allocation15_spill] sm:$0xff] %v6399_v38  ;;  %v7636_v56 = vld [vmem:[#allocation16_spill] sm:$0xff]  ;;  %v6411_v50 = vpop.f32.mrb[61].mxu1 }
 0x2af   :  { %v2326_v28 = vsub.f32 %v7632_v24, %v2119_v42  ;;  %4914 = vpow2.f32 %v2470_v40  ;;  %7637 = vst [vmem:[#allocation16_spill] sm:$0xff] %v6411_v50 }
 0x2b0   :  { %v6402_v39 = vpop.eup %4904  ;;  %v2472_v14 = vmul.f32 1.442695, %v2311_v32  ;;  %v7639_v32 = vld [vmem:[#allocation17_spill] sm:$0xff] }
 0x2b1   :  { %7633 = vst [vmem:[#allocation14_spill] sm:$0xff] %v6402_v39  ;;  %v2502_v7 = vmul.f32 1.442695, %v2326_v28  ;;  %v2121_v4 = vpop.xlane.xlu1 %2120  ;;  %2720 = vadd.xlane.f32.xlu1 %v6402_v39  ;;  %2718 = vadd.xlane.f32.xlu0 %v6399_v38  ;;  %v6413_v24 = vpop.eup %4906  ;;  %7640 = vst [vmem:[#allocation17_spill] sm:$0xff] %v6416_v43  ;;  %v7644_v39 = vld [vmem:[#allocation18_spill] sm:$0xff] }
 0x2b2   :  { %4916 = vpow2.f32 %v2472_v14  ;;  %v2327_v34 = vsub.f32 %v7636_v56, %v2121_v4  ;;  %v2091_v33 = vpop.xlane.xlu0 %2090  ;;  %7638 = vst [vmem:[#allocation80_spill] sm:$0xff] %v6413_v24  ;;  %v7642_v4 = vld [vmem:[#allocation19_spill] sm:$0xff]  ;;  %v6428_v43 = vpop.f32.mrb[60].mxu0 }
 0x2b3   :  { %v2312_v42 = vsub.f32 %v7639_v32, %v2091_v33  ;;  %4918 = vpow2.f32 %v2502_v7  ;;  %7646 = vst [vmem:[#allocation82_spill] sm:$0xff] %v6428_v43 }
 0x2b4   :  { %v6418_v36 = vpop.eup %4908  ;;  %v2504_v40 = vmul.f32 1.442695, %v2327_v34  ;;  %v6430_v34 = vpop.f32.mrb[62].mxu1 }
 0x2b5   :  { %7641 = vst [vmem:[#allocation81_spill] sm:$0xff] %v6418_v36  ;;  %v2093_v28 = vpop.xlane.xlu1 %2092  ;;  %2692 = vadd.xlane.f32.xlu1 %v6418_v36  ;;  %2690 = vadd.xlane.f32.xlu0 %v6413_v24  ;;  %v2474_v14 = vmul.f32 1.442695, %v2312_v42  ;;  %v6423_v38 = vpop.eup %4910  ;;  %7647 = vst [vmem:[#allocation83_spill] sm:$0xff] %v6430_v34 }
 0x2b6   :  { %4920 = vpow2.f32 %v2504_v40  ;;  %v2313_v56 = vsub.f32 %v7642_v4, %v2093_v28  ;;  %v2123_v50 = vpop.xlane.xlu0 %2122  ;;  %7643 = vst [vmem:[#allocation19_spill] sm:$0xff] %v6423_v38  ;;  %v7648_v40 = vld [vmem:[#allocation20_spill] sm:$0xff]  ;;  %v6435_v24 = vpop.f32.mrb[63].mxu1 }
 0x2b7   :  { %v2328_v33 = vsub.f32 %v7644_v39, %v2123_v50  ;;  %4922 = vpow2.f32 %v2474_v14  ;;  %7649 = vst [vmem:[#allocation20_spill] sm:$0xff] %v6435_v24  ;;  %v6439_v39 = vpop.f32.mrb[61].mxu0 }
 0x2b8   :  { %v6426_v32 = vpop.eup %4912  ;;  %v2476_v7 = vmul.f32 1.442695, %v2313_v56  ;;  %7651 = vst [vmem:[#allocation85_spill] sm:$0xff] %v6439_v39  ;;  %v7657_v39 = vld [vmem:[#allocation21_spill] sm:$0xff] }
 0x2b9   :  { %7645 = vst [vmem:[#allocation18_spill] sm:$0xff] %v6426_v32  ;;  %v2125_v30 = vpop.xlane.xlu1 %2124  ;;  %2724 = vadd.xlane.f32.xlu1 %v6426_v32  ;;  %2722 = vadd.xlane.f32.xlu0 %v6423_v38  ;;  %v2506_v42 = vmul.f32 1.442695, %v2328_v33  ;;  %v6437_v50 = vpop.eup %4914  ;;  %v7660_v38 = vld [vmem:[#allocation23_spill] sm:$0xff] }
 0x2ba   :  { %v2329_v28 = vsub.f32 %v7648_v40, %v2125_v30  ;;  %v2095_v4 = vpop.xlane.xlu0 %2094  ;;  %7650 = vst [vmem:[#allocation84_spill] sm:$0xff] %v6437_v50  ;;  %4924 = vpow2.f32 %v2476_v7  ;;  %v6449_v40 = vpop.f32.mrb[62].mxu0 }
 0x2bb   :  { %4926 = vpow2.f32 %v2506_v42  ;;  %7655 = vst [vmem:[#allocation89_spill] sm:$0xff] %v6449_v40  ;;  %v6453_v7 = vpop.f32.mrb[63].mxu0 }
 0x2bc   :  { %v6441_v43 = vpop.eup %4916  ;;  %v2508_v14 = vmul.f32 1.442695, %v2329_v28  ;;  %7656 = vst [vmem:[#allocation90_spill] sm:$0xff] %v6453_v7  ;;  %v6461_v28 = vsel %vm1893_vm1, %v6063_v23, -1e+30  ;;  %v7661_v7 = vld [vmem:[#allocation22_spill] sm:$0xff] }
 0x2bd   :  { %7652 = vst [vmem:[#allocation86_spill] sm:$0xff] %v6441_v43  ;;  %v2097_v56 = vpop.xlane.xlu1 %2096  ;;  %2728 = vadd.xlane.f32.xlu1 %v6441_v43  ;;  %2726 = vadd.xlane.f32.xlu0 %v6437_v50  ;;  %v6445_v34 = vpop.eup %4918  ;;  %v2314_v43 = vsub.f32 %v7657_v39, %v2095_v4  ;;  %7659 = vst [vmem:[#allocation91_spill] sm:$0xff] %v6461_v28 }
 0x2be   :  { %v2127_v33 = vpop.xlane.xlu0 %2126  ;;  %7653 = vst [vmem:[#allocation87_spill] sm:$0xff] %v6445_v34  ;;  %4928 = vpow2.f32 %v2508_v14  ;;  %v2315_v40 = vsub.f32 %v7660_v38, %v2097_v56  ;;  %v7664_v38 = vld [vmem:[#allocation24_spill] sm:$0xff] }
 0x2bf   :  { %v2330_v14 = vsub.f32 %v7661_v7, %v2127_v33 }
 0x2c0   :  { %v6447_v30 = vpop.eup %4920  ;;  %v2480_v36 = vmul.f32 1.442695, %v2315_v40 }
 0x2c1   :  { %7654 = vst [vmem:[#allocation88_spill] sm:$0xff] %v6447_v30  ;;  %v2129_v24 = vpop.xlane.xlu1 %2128  ;;  %2760 = vadd.xlane.f32.xlu1 %v6447_v30  ;;  %2758 = vadd.xlane.f32.xlu0 %v6445_v34  ;;  %v6456_v42 = vpop.eup %4922  ;;  %v2478_v34 = vmul.f32 1.442695, %v2314_v43  ;;  %v2510_v23 = vmul.f32 1.442695, %v2330_v14  ;;  %v7668_v14 = vld [vmem:[#allocation25_spill] sm:$0xff] }
 0x2c2   :  { %v2099_v50 = vpop.xlane.xlu0 %2098  ;;  %7658 = vst [vmem:[#allocation21_spill] sm:$0xff] %v6456_v42  ;;  %v2331_v56 = vsub.f32 %v7664_v38, %v2129_v24  ;;  %v6479_v43 = vsel %vm1893_vm1, %v6080_v45, -1e+30  ;;  %v6490_v24 = vsel %vm1893_vm1, %v6078_v35, -1e+30 }
 0x2c3   :  { %4930 = vpow2.f32 %v2478_v34  ;;  %7666 = vst [vmem:[#allocation92_spill] sm:$0xff] %v6490_v24  ;;  %v6497_v45 = vsel %vm1893_vm1, %v6100_v48, -1e+30  ;;  %v6507_v35 = vsel %vm1893_vm1, %v6093_v47, -1e+30  ;;  %v7671_v48 = vld [vmem:[#allocation27_spill] sm:$0xff] }
 0x2c4   :  { %v6467_v4 = vpop.eup %4924  ;;  %4932 = vpow2.f32 %v2480_v36  ;;  %v2512_v34 = vmul.f32 1.442695, %v2331_v56  ;;  %7667 = vst [vmem:[#allocation93_spill] sm:$0xff] %v6497_v45  ;;  %7669 = vst [vmem:[#allocation25_spill] sm:$0xff] %v6507_v35 }
 0x2c5   :  { %v2101_v32 = vpop.xlane.xlu1 %2100  ;;  %2196 = vmax.xlane.f32.xlu1 %v6461_v28  ;;  %2730 = vadd.xlane.f32.xlu0 %v6456_v42  ;;  %7662 = vst [vmem:[#allocation23_spill] sm:$0xff] %v6467_v4  ;;  %v6469_v39 = vpop.eup %4926  ;;  %4934 = vpow2.f32 %v2510_v23  ;;  %v2316_v23 = vsub.f32 %v7668_v14, %v2099_v50 }
 0x2c6   :  { %v2131_v30 = vpop.xlane.xlu0 %2130  ;;  %7663 = vst [vmem:[#allocation22_spill] sm:$0xff] %v6469_v39  ;;  %4936 = vpow2.f32 %v2512_v34 }
 0x2c7   :  { %v2482_v34 = vmul.f32 1.442695, %v2316_v23 }
 0x2c8   :  { %v6481_v33 = vpop.eup %4928 }
 0x2c9   :  { %v2133_v60 = vpop.xlane.xlu1 %2132  ;;  %2732 = vadd.xlane.f32.xlu1 %v6467_v4  ;;  %2762 = vadd.xlane.f32.xlu0 %v6469_v39  ;;  %7665 = vst [vmem:[#allocation24_spill] sm:$0xff] %v6481_v33  ;;  %4938 = vpow2.f32 %v2482_v34 }
 0x2ca   :  { %v6474_v28 = vpop.xlane.xlu0 %2102 }
 0x2cd   :  { %v6483_v40 = vpop.xlane.xlu1 %2104  ;;  %2764 = vadd.xlane.f32.xlu1 %v6481_v33  ;;  %2166 = vmax.xlane.f32.xlu0 %v6479_v43  ;;  %v6511_v56 = vpop.eup %4930  ;;  %v2317_v33 = vsub.f32 %v7671_v48, %v2101_v32  ;;  %v7675_v48 = vld [vmem:[#allocation28_spill] sm:$0xff] }
 0x2ce   :  { %v6492_v7 = vpop.xlane.xlu0 %2134  ;;  %7670 = vst [vmem:[#allocation94_spill] sm:$0xff] %v6511_v56 }
 0x2cf   :  { %v2484_v4 = vmul.f32 1.442695, %v2317_v33 }
 0x2d1   :  { %v6499_v36 = vpop.xlane.xlu1 %2136  ;;  %2168 = vmax.xlane.f32.xlu1 %v6490_v24  ;;  %2198 = vmax.xlane.f32.xlu0 %v6497_v45  ;;  %v7672_v45 = vld [vmem:[#allocation26_spill] sm:$0xff]  ;;  %v6521_v24 = vpop.eup %4932  ;;  %4940 = vpow2.f32 %v2484_v4 }
 0x2d2   :  { %v6509_v38 = vpop.xlane.xlu0 %2106  ;;  %v2332_v50 = vsub.f32 %v7672_v45, %v2131_v30  ;;  %7673 = vst [vmem:[#allocation27_spill] sm:$0xff] %v6521_v24  ;;  %v6523_v47 = vpop.eup %4934  ;;  %v6535_v30 = vsel %vm1893_vm1, %v6137_v51, -1e+30  ;;  %v7506_v45 = vmov 0.0  }
 0x2d3   :  { %7674 = vst [vmem:[#allocation26_spill] sm:$0xff] %v6523_v47  ;;  %7676 = vst [vmem:[#allocation28_spill] sm:$0xff] %v6535_v30  ;;  %4400 = vmatprep.mubr.msk.f32.mxu0 %vm5469_vm2, %v7506_v45  ;;  %4435 = vmatprep.mubr.msk.f32.mxu1 %vm5469_vm2, %v7506_v45  ;;  %v6541_v33 = vpop.eup %4936 }
 0x2d4   :  { %v2514_v32 = vmul.f32 1.442695, %v2332_v50  ;;  %7677 = vst [vmem:[#allocation95_spill] sm:$0xff] %v6541_v33 }
 0x2d5   :  { %v6514_v39 = vpop.xlane.xlu1 %2108  ;;  %2200 = vmax.xlane.f32.xlu1 %v6507_v35  ;;  %2734 = vadd.xlane.f32.xlu0 %v6511_v56  ;;  %v2333_v56 = vsub.f32 %v7675_v48, %v2133_v60  ;;  %v6550_v60 = vsel %vm1893_vm1, %v6135_v17, -1e+30  ;;  %v6557_v48 = vsel %vm1893_vm1, %v6152_v25, -1e+30  ;;  %v6568_v17 = vsel %vm1893_vm1, %v6150_v10, -1e+30 }
 0x2d6   :  { %v6519_v14 = vpop.xlane.xlu0 %2138  ;;  %4942 = vpow2.f32 %v2514_v32  ;;  %7678 = vst [vmem:[#allocation96_spill] sm:$0xff] %v6550_v60  ;;  %7679 = vst [vmem:[#allocation97_spill] sm:$0xff] %v6557_v48  ;;  %v7683_v25 = vld [vmem:[#allocation31_spill] sm:$0xff] }
 0x2d7   :  { %v2516_v51 = vmul.f32 1.442695, %v2333_v56  ;;  %v7680_v56 = vld [vmem:[#allocation29_spill] sm:$0xff] }
 0x2d8   :  { %v2318_v32 = vsub.f32 %v7680_v56, %v6474_v28  ;;  %7681 = vst [vmem:[#allocation29_spill] sm:$0xff] %v6568_v17  ;;  %v7684_v28 = vld [vmem:[#allocation30_spill] sm:$0xff] }
 0x2d9   :  { %v6525_v42 = vpop.xlane.xlu1 %2140  ;;  %2736 = vadd.xlane.f32.xlu1 %v6521_v24  ;;  %2766 = vadd.xlane.f32.xlu0 %v6523_v47  ;;  %4944 = vpow2.f32 %v2516_v51  ;;  %v2319_v47 = vsub.f32 %v7683_v25, %v6483_v40  ;;  %v2334_v56 = vsub.f32 %v7684_v28, %v6492_v7  ;;  %v6599_v7 = vsel %vm1893_vm1, %v6191_v19, -1e+30 }
 0x2da   :  { %v6530_v23 = vpop.xlane.xlu0 %2110  ;;  %v2486_v51 = vmul.f32 1.442695, %v2318_v32  ;;  %v7687_v32 = vld [vmem:[#allocation32_spill] sm:$0xff]  ;;  %v6617_v19 = vsel %vm1893_vm1, %v6208_v58, -1e+30  ;;  %v7693_v58 = vld [vmem:[#allocation35_spill] sm:$0xff] }
 0x2db   :  { %v2518_v40 = vmul.f32 1.442695, %v2334_v56  ;;  %v2335_v25 = vsub.f32 %v7687_v32, %v6499_v36  ;;  %7688 = vst [vmem:[#allocation32_spill] sm:$0xff] %v6599_v7  ;;  %v6610_v36 = vsel %vm1893_vm1, %v6189_v5, -1e+30  ;;  %7691 = vst [vmem:[#allocation101_spill] sm:$0xff] %v6617_v19 }
 0x2dc   :  { %4946 = vpow2.f32 %v2486_v51  ;;  %7690 = vst [vmem:[#allocation100_spill] sm:$0xff] %v6610_v36 }
 0x2dd   :  { %v6543_v34 = vpop.xlane.xlu1 %2112  ;;  %2768 = vadd.xlane.f32.xlu1 %v6541_v33  ;;  %2170 = vmax.xlane.f32.xlu0 %v6535_v30  ;;  %v6572_v33 = vpop.eup %4938  ;;  %v2488_v30 = vmul.f32 1.442695, %v2319_v47  ;;  %v2520_v51 = vmul.f32 1.442695, %v2335_v25 }
 0x2de   :  { %v6552_v50 = vpop.xlane.xlu0 %2142  ;;  %7682 = vst [vmem:[#allocation98_spill] sm:$0xff] %v6572_v33  ;;  %v6584_v10 = vpop.eup %4940 }
 0x2df   :  { %7685 = vst [vmem:[#allocation31_spill] sm:$0xff] %v6584_v10  ;;  %4948 = vpow2.f32 %v2488_v30 }
 0x2e0   :  { %4950 = vpow2.f32 %v2518_v40  ;;  %v7692_v40 = vld [vmem:[#allocation33_spill] sm:$0xff] }
 0x2e1   :  { %v6559_v4 = vpop.xlane.xlu1 %2144  ;;  %2172 = vmax.xlane.f32.xlu1 %v6550_v60  ;;  %2202 = vmax.xlane.f32.xlu0 %v6557_v48  ;;  %v6586_v60 = vpop.eup %4942  ;;  %4952 = vpow2.f32 %v2520_v51  ;;  %v2320_v32 = vsub.f32 %v7692_v40, %v6509_v38  ;;  %v7694_v38 = vld [vmem:[#allocation34_spill] sm:$0xff] }
 0x2e2   :  { %v6570_v45 = vpop.xlane.xlu0 %2114  ;;  %7686 = vst [vmem:[#allocation30_spill] sm:$0xff] %v6586_v60  ;;  %v2336_v40 = vsub.f32 %v7694_v38, %v6519_v14  ;;  %v6659_v14 = vsel %vm1893_vm1, %v6250_v53, -1e+30  ;;  %v6677_v53 = vsel %vm1893_vm1, %v6242_v52, -1e+30 }
 0x2e3   :  { %v6601_v28 = vpop.eup %4944  ;;  %v2490_v51 = vmul.f32 1.442695, %v2320_v32  ;;  %v2337_v32 = vsub.f32 %v6075_v6, %v6525_v42  ;;  %v6670_v6 = vsel %vm1893_vm1, %v6245_v37, -1e+30  ;;  %v2323_v37 = vsub.f32 %v6098_v62, %v6543_v34 }
 0x2e4   :  { %7689 = vst [vmem:[#allocation99_spill] sm:$0xff] %v6601_v28 }
 0x2e5   :  { %v6576_v24 = vpop.xlane.xlu1 %2116  ;;  %2204 = vmax.xlane.f32.xlu1 %v6568_v17  ;;  %2738 = vadd.xlane.f32.xlu0 %v6572_v33  ;;  %4954 = vpow2.f32 %v2490_v51  ;;  %v2524_v51 = vmul.f32 1.442695, %v2337_v32  ;;  %v7698_v32 = vld [vmem:[#allocation36_spill] sm:$0xff]  ;;  %v2496_v62 = vmul.f32 1.442695, %v2323_v37 }
 0x2e6   :  { %v6582_v48 = vpop.xlane.xlu0 %2146  ;;  %v6627_v5 = vpop.eup %4946 }
 0x2e9   :  { %v6588_v35 = vpop.xlane.xlu1 %2148  ;;  %2740 = vadd.xlane.f32.xlu1 %v6584_v10  ;;  %2770 = vadd.xlane.f32.xlu0 %v6586_v60  ;;  %v2321_v60 = vsub.f32 %v7693_v58, %v6514_v39  ;;  %v2522_v39 = vmul.f32 1.442695, %v2336_v40  ;;  %v2322_v40 = vsub.f32 %v6085_v63, %v6530_v23  ;;  %v6696_v63 = vsel %vm1893_vm1, %v6239_v2, -1e+30 }
 0x2ea   :  { %v6594_v33 = vpop.xlane.xlu0 %2150  ;;  %v2339_v2 = vsub.f32 %v6105_v12, %v6559_v4  ;;  %v6724_v12 = vsel %vm1893_vm1, %v6266_v18, -1e+30  ;;  %v7704_v4 = vld [vmem:[#allocation37_spill] sm:$0xff] }
 0x2eb   :  { %v2494_v23 = vmul.f32 1.442695, %v2322_v40  ;;  %7703 = vst [vmem:[#allocation105_spill] sm:$0xff] %v6724_v12 }
 0x2ed   :  { %v6603_v47 = vpop.xlane.xlu1 %2152  ;;  %2772 = vadd.xlane.f32.xlu1 %v6601_v28  ;;  %2174 = vmax.xlane.f32.xlu0 %v6599_v7  ;;  %v6632_v28 = vsel %vm1893_vm1, %v6206_v54, -1e+30  ;;  %v2492_v54 = vmul.f32 1.442695, %v2321_v60 }
 0x2ee   :  { %v6612_v56 = vpop.xlane.xlu0 %2182 }
 0x2ef   :  { %4956 = vpow2.f32 %v2492_v54 }
 0x2f0   :  { %4958 = vpow2.f32 %v2522_v39 }
 0x2f1   :  { %v6619_v30 = vpop.xlane.xlu1 %2184  ;;  %2176 = vmax.xlane.f32.xlu1 %v6610_v36  ;;  %2206 = vmax.xlane.f32.xlu0 %v6617_v19  ;;  %v6644_v36 = vpop.eup %4948  ;;  %4960 = vpow2.f32 %v2524_v51 }
 0x2f2   :  { %v6625_v25 = vpop.xlane.xlu0 %2154  ;;  %7695 = vst [vmem:[#allocation33_spill] sm:$0xff] %v6644_v36  ;;  %v6646_v7 = vpop.eup %4950  ;;  %4962 = vpow2.f32 %v2494_v23 }
 0x2f3   :  { %7696 = vst [vmem:[#allocation35_spill] sm:$0xff] %v6646_v7  ;;  %v6661_v38 = vpop.eup %4952  ;;  %4964 = vpow2.f32 %v2496_v62  ;;  %v2528_v62 = vmul.f32 1.442695, %v2339_v2 }
 0x2f4   :  { %7697 = vst [vmem:[#allocation34_spill] sm:$0xff] %v6661_v38  ;;  %v6691_v52 = vpop.eup %4954 }
 0x2f5   :  { %v6636_v10 = vpop.xlane.xlu1 %2156  ;;  %2208 = vmax.xlane.f32.xlu1 %v6632_v28  ;;  %2742 = vadd.xlane.f32.xlu0 %v6627_v5  ;;  %7699 = vst [vmem:[#allocation36_spill] sm:$0xff] %v6691_v52 }
 0x2f6   :  { %v6642_v19 = vpop.xlane.xlu0 %2186 }
 0x2f9   :  { %v6648_v17 = vpop.xlane.xlu1 %2188  ;;  %2744 = vadd.xlane.f32.xlu1 %v6644_v36  ;;  %2774 = vadd.xlane.f32.xlu0 %v6646_v7  ;;  %v6704_v51 = vpop.eup %4956 }
 0x2fa   :  { %v6654_v58 = vpop.xlane.xlu0 %2158  ;;  %7700 = vst [vmem:[#allocation102_spill] sm:$0xff] %v6704_v51 }
 0x2fd   :  { %v6663_v60 = vpop.xlane.xlu1 %2160  ;;  %2776 = vadd.xlane.f32.xlu1 %v6661_v38  ;;  %2178 = vmax.xlane.f32.xlu0 %v6659_v14  ;;  %v2338_v38 = vsub.f32 %v7698_v32, %v6552_v50  ;;  %v6706_v32 = vpop.eup %4958 }
 0x2fe   :  { %v6672_v42 = vpop.xlane.xlu0 %2190  ;;  %7701 = vst [vmem:[#allocation103_spill] sm:$0xff] %v6706_v32  ;;  %v6712_v37 = vpop.eup %4960 }
 0x2ff   :  { %v2526_v50 = vmul.f32 1.442695, %v2338_v38  ;;  %7702 = vst [vmem:[#allocation104_spill] sm:$0xff] %v6712_v37  ;;  %v6717_v38 = vsel %vm1893_vm1, %v6294_v0, -1e+30  ;;  %v6735_v2 = vpop.eup %4962 }
 0x300   :  { %v6729_v0 = vsel %vm1893_vm1, %v6282_v59, -1e+30  ;;  %7705 = vst [vmem:[#allocation37_spill] sm:$0xff] %v6735_v2  ;;  %v6737_v18 = vpop.eup %4964  ;;  %v6742_v59 = vsel %vm1893_vm1, %v6263_v57, -1e+30 }
 0x301   :  { %v6681_v54 = vpop.xlane.xlu1 %2192  ;;  %2180 = vmax.xlane.f32.xlu1 %v6670_v6  ;;  %2210 = vmax.xlane.f32.xlu0 %v6677_v53  ;;  %4966 = vpow2.f32 %v2526_v50  ;;  %7706 = vst [vmem:[#allocation106_spill] sm:$0xff] %v6742_v59 }
 0x302   :  { %v6687_v39 = vpop.xlane.xlu0 %2162 }
 0x305   :  { %v6698_v7 = vpop.xlane.xlu1 %2164  ;;  %2212 = vmax.xlane.f32.xlu1 %v6696_v63  ;;  %2746 = vadd.xlane.f32.xlu0 %v6691_v52 }
 0x306   :  { %v6702_v34 = vpop.xlane.xlu0 %2194 }
 0x309   :  { %v2665_v36 = vpop.xlane.xlu1 %2664  ;;  %2748 = vadd.xlane.f32.xlu1 %v6704_v51  ;;  %2778 = vadd.xlane.f32.xlu0 %v6706_v32 }
 0x30a   :  { %v2663_v40 = vpop.xlane.xlu0 %2662  ;;  %4968 = vrcp.f32 %v2665_v36  ;;  %v2324_v36 = vsub.f32 %v7704_v4, %v6570_v45  ;;  %v7707_v4 = vld [vmem:[#allocation38_spill] sm:$0xff] }
 0x30b   :  { %4970 = vrcp.f32 %v2663_v40  ;;  %v6744_v40 = vpop.eup %4966 }
 0x30c   :  { %v2498_v45 = vmul.f32 1.442695, %v2324_v36 }
 0x30d   :  { %v2697_v23 = vpop.xlane.xlu1 %2696  ;;  %2780 = vadd.xlane.f32.xlu1 %v6712_v37  ;;  %2214 = vmax.xlane.f32.xlu0 %v6717_v38 }
 0x30e   :  { %4972 = vrcp.f32 %v2697_v23  ;;  %v2695_v32 = vpop.xlane.xlu0 %2694  ;;  %v2325_v23 = vsub.f32 %v6122_v31, %v6576_v24 }
 0x30f   :  { %4974 = vrcp.f32 %v2695_v32 }
 0x310   :  { %4976 = vpow2.f32 %v2528_v62  ;;  %v2500_v31 = vmul.f32 1.442695, %v2325_v23 }
 0x311   :  { %2216 = vmax.xlane.f32.xlu1 %v6729_v0  ;;  %2246 = vmax.xlane.f32.xlu0 %v6724_v12 }
 0x312   :  { %v2669_v50 = vpop.xlane.xlu1 %2668  ;;  %v2667_v32 = vpop.xlane.xlu0 %2666 }
 0x313   :  { %4978 = vrcp.f32 %v2669_v50  ;;  %v2340_v50 = vsub.f32 %v7707_v4, %v6582_v48  ;;  %v7708_v4 = vld [vmem:[#allocation39_spill] sm:$0xff] }
 0x314   :  { %4980 = vrcp.f32 %v2667_v32  ;;  %v4969_v62 = vpop.eup %4968 }
 0x315   :  { %2248 = vmax.xlane.f32.xlu1 %v6742_v59  ;;  %2750 = vadd.xlane.f32.xlu0 %v6735_v2  ;;  %v4971_v52 = vpop.eup %4970  ;;  %v3047_v57 = vmul.f32 %v4969_v62, %v6247_v29  ;;  %v2530_v48 = vmul.f32 1.442695, %v2340_v50  ;;  %v2341_v2 = vsub.f32 %v7708_v4, %v6588_v35  ;;  %v7709_v62 = vmov 0.0|0.0   ;;  %v7711_v4 = vld [vmem:[#allocation55_spill] sm:$0xff] }
 0x316   :  { %v2701_v37 = vpop.xlane.xlu1 %2700  ;;  %v2699_v51 = vpop.xlane.xlu0 %2698  ;;  %v3046_v36 = vmul.f32 %v4971_v52, %v6252_v11  ;;  %v6765_v52 = vsel %vm1893_vm1, %v6315_v41, -1e+30  ;;  %v6776_v50 = vsel %vm1893_vm1, %v6288_v16, -1e+30 }
 0x317   :  { %4982 = vrcp.f32 %v2701_v37 }
 0x318   :  { %v4973_v32 = vpop.eup %4972  ;;  %4984 = vrcp.f32 %v2699_v51  ;;  %v4649_v59 = vpack.c.bf16 %v3047_v57, %v3046_v36 }
 0x319   :  { %v4975_v12 = vpop.eup %4974  ;;  %4986 = vpow2.f32 %v2498_v45  ;;  %2752 = vadd.xlane.f32.xlu1 %v6737_v18  ;;  %2782 = vadd.xlane.f32.xlu0 %v6744_v40  ;;  %v3063_v24 = vmul.f32 %v4973_v32, %v6257_v49  ;;  %v7710_v32 = vld [vmem:[#allocation40_spill] sm:$0xff] }
 0x31a   :  { %v2673_v37 = vpop.xlane.xlu1 %2672  ;;  %v2671_v29 = vpop.xlane.xlu0 %2670  ;;  %v3062_v51 = vmul.f32 %v4975_v12, %v6260_v8  ;;  %4650 = vmatpush3.bf16.xpose.msra.mxu0 %v4649_v59  ;;  %v2532_v8 = vmul.f32 1.442695, %v2341_v2  ;;  %v6781_v2 = vsel %vm1893_vm1, %v6304_v20, -1e+30  ;;  %v2342_v36 = vsub.f32 %v7710_v32, %v6594_v33 }
 0x31b   :  { %4988 = vrcp.f32 %v2673_v37  ;;  %v6760_v11 = vpop.eup %4976  ;;  %4651 = vmatprep.subr.bf16.mxu0 %v7709_v62  ;;  %v6794_v37 = vsel %vm1893_vm1, %v7711_v4, -1e+30 }
 0x31c   :  { %4990 = vrcp.f32 %v2671_v29  ;;  %v4673_v49 = vpack.c.bf16 %v3063_v24, %v3062_v51  ;;  %v7712_v51 = vld [vmem:[#allocation41_spill] sm:$0xff] }
 0x31d   :  { %v4979_v45 = vpop.eup %4978  ;;  %4992 = vpow2.f32 %v2500_v31  ;;  %2784 = vadd.xlane.f32.xlu1 %v6760_v11  ;;  %2218 = vmax.xlane.f32.xlu0 %v6765_v52  ;;  %v2343_v33 = vsub.f32 %v7712_v51, %v6603_v47 }
 0x31e   :  { %v4981_v35 = vpop.eup %4980  ;;  %4994 = vpow2.f32 %v2530_v48  ;;  %v2705_v12 = vpop.xlane.xlu1 %2704  ;;  %4674 = vmatpush3.bf16.xpose.msra.mxu1 %v4673_v49  ;;  %v3049_v41 = vmul.f32 %v4979_v45, %v6272_v61  ;;  %v2534_v45 = vmul.f32 1.442695, %v2342_v36 }
 0x31f   :  { %v2703_v23 = vpop.xlane.xlu0 %2702  ;;  %4996 = vrcp.f32 %v2705_v12  ;;  %v3048_v59 = vmul.f32 %v4981_v35, %v6269_v15  ;;  %4675 = vmatprep.subr.bf16.mxu1 %v7709_v62 }
 0x320   :  { %4998 = vrcp.f32 %v2703_v23  ;;  %v7714_v23 = vld [vmem:[#allocation56_spill] sm:$0xff] }
 0x321   :  { %v4983_v57 = vpop.eup %4982  ;;  %2220 = vmax.xlane.f32.xlu1 %v6781_v2  ;;  %2250 = vmax.xlane.f32.xlu0 %v6776_v50  ;;  %v4652_v61 = vpack.c.bf16 %v3049_v41, %v3048_v59  ;;  %5000 = vpow2.f32 %v2532_v8 }
 0x322   :  { %v4985_v15 = vpop.eup %4984  ;;  %v2677_v31 = vpop.xlane.xlu1 %2676  ;;  %v3065_v24 = vmul.f32 %v4983_v57, %v6280_v55 }
 0x323   :  { %v2675_v16 = vpop.xlane.xlu0 %2674  ;;  %v6788_v48 = vpop.eup %4986  ;;  %5002 = vrcp.f32 %v2677_v31  ;;  %v3064_v20 = vmul.f32 %v4985_v15, %v6277_v9  ;;  %4653 = vmatpush3.bf16.xpose.msra.mxu0 %v4652_v61  ;;  %v7713_v9 = vld [vmem:[#allocation42_spill] sm:$0xff]  ;;  %v2536_v15 = vmul.f32 1.442695, %v2343_v33  ;;  %v7715_v31 = vld [vmem:[#allocation43_spill] sm:$0xff]  ;;  %v6821_v33 = vsel %vm1893_vm1, %v6344_v22, -1e+30 }
 0x324   :  { %5004 = vrcp.f32 %v2675_v16  ;;  %v2358_v35 = vsub.f32 %v7713_v9, %v6612_v56  ;;  %4654 = vmatprep.subr.bf16.mxu0 %v7709_v62  ;;  %v2359_v16 = vsub.f32 %v7715_v31, %v6619_v30  ;;  %v7720_v31 = vld [vmem:[#allocation62_spill] sm:$0xff] }
 0x325   :  { %v4989_v29 = vpop.eup %4988  ;;  %2252 = vmax.xlane.f32.xlu1 %v6794_v37  ;;  %2754 = vadd.xlane.f32.xlu0 %v6788_v48  ;;  %v4676_v55 = vpack.c.bf16 %v3065_v24, %v3064_v20  ;;  %v7716_v20 = vld [vmem:[#allocation59_spill] sm:$0xff] }
 0x326   :  { %v4991_v49 = vpop.eup %4990  ;;  %v2709_v8 = vpop.xlane.xlu1 %2708  ;;  %v3051_v41 = vmul.f32 %v4989_v29, %v7714_v23  ;;  %v2566_v36 = vmul.f32 1.442695, %v2358_v35  ;;  %v7717_v29 = vld [vmem:[#allocation57_spill] sm:$0xff]  ;;  %v2568_v9 = vmul.f32 1.442695, %v2359_v16  ;;  %v7718_v23 = vld [vmem:[#allocation60_spill] sm:$0xff] }
 0x327   :  { %v2707_v12 = vpop.xlane.xlu0 %2706  ;;  %v6804_v59 = vpop.eup %4992  ;;  %5006 = vrcp.f32 %v2709_v8  ;;  %4677 = vmatpush3.bf16.xpose.msra.mxu1 %v4676_v55  ;;  %v3050_v47 = vmul.f32 %v4991_v49, %v6291_v46 }
 0x328   :  { %v6807_v57 = vpop.eup %4994  ;;  %5008 = vrcp.f32 %v2707_v12  ;;  %4678 = vmatprep.subr.bf16.mxu1 %v7709_v62 }
 0x329   :  { %v4997_v61 = vpop.eup %4996  ;;  %2756 = vadd.xlane.f32.xlu1 %v6804_v59  ;;  %2786 = vadd.xlane.f32.xlu0 %v6807_v57  ;;  %v4655_v56 = vpack.c.bf16 %v3051_v41, %v3050_v47  ;;  %5010 = vpow2.f32 %v2534_v45  ;;  %v6831_v41 = vsel %vm1893_vm1, %v7718_v23, -1e+30  ;;  %v6836_v47 = vsel %vm1893_vm1, %v6330_v26, -1e+30  ;;  %v7721_v26 = vld [vmem:[#allocation61_spill] sm:$0xff] }
 0x32a   :  { %v4999_v32 = vpop.eup %4998  ;;  %v2681_v24 = vpop.xlane.xlu1 %2680  ;;  %v3067_v4 = vmul.f32 %v4997_v61, %v7716_v20  ;;  %v7722_v20 = vld [vmem:[#allocation58_spill] sm:$0xff] }
 0x32b   :  { %v2679_v46 = vpop.xlane.xlu0 %2678  ;;  %5012 = vrcp.f32 %v2681_v24  ;;  %v3066_v51 = vmul.f32 %v4999_v32, %v7717_v29  ;;  %v6816_v55 = vpop.eup %5000  ;;  %4656 = vmatpush3.bf16.xpose.msra.mxu0 %v4655_v56 }
 0x32c   :  { %5014 = vrcp.f32 %v2679_v46  ;;  %4657 = vmatprep.subr.bf16.mxu0 %v7709_v62 }
 0x32d   :  { %v5003_v49 = vpop.eup %5002  ;;  %5016 = vpow2.f32 %v2536_v15  ;;  %2788 = vadd.xlane.f32.xlu1 %v6816_v55  ;;  %2222 = vmax.xlane.f32.xlu0 %v6821_v33  ;;  %v4679_v30 = vpack.c.bf16 %v3067_v4, %v3066_v51  ;;  %v7719_v15 = vld [vmem:[#allocation44_spill] sm:$0xff]  ;;  %v6850_v4 = vsel %vm1893_vm1, %v7722_v20, -1e+30  ;;  %v7723_v51 = vld [vmem:[#allocation45_spill] sm:$0xff]  ;;  %v7727_v20 = vld [vmem:[#allocation70_spill] sm:$0xff] }
 0x32e   :  { %v5005_v45 = vpop.eup %5004  ;;  %5018 = vpow2.f32 %v2566_v36  ;;  %v2713_v35 = vpop.xlane.xlu1 %2712  ;;  %v3053_v12 = vmul.f32 %v5003_v49, %v6320_v21  ;;  %v2344_v56 = vsub.f32 %v7719_v15, %v6625_v25  ;;  %v2345_v25 = vsub.f32 %v7723_v51, %v6636_v10 }
 0x32f   :  { %v2711_v8 = vpop.xlane.xlu0 %2710  ;;  %5020 = vrcp.f32 %v2713_v35  ;;  %4680 = vmatpush3.bf16.xpose.msra.mxu1 %v4679_v30  ;;  %v3052_v22 = vmul.f32 %v5005_v45, %v6317_v13 }
 0x330   :  { %5022 = vrcp.f32 %v2711_v8  ;;  %4681 = vmatprep.subr.bf16.mxu1 %v7709_v62  ;;  %v2538_v45 = vmul.f32 1.442695, %v2344_v56  ;;  %v7725_v56 = vld [vmem:[#allocation47_spill] sm:$0xff] }
 0x331   :  { %v5007_v61 = vpop.eup %5006  ;;  %2224 = vmax.xlane.f32.xlu1 %v6836_v47  ;;  %2254 = vmax.xlane.f32.xlu0 %v6831_v41  ;;  %v4658_v21 = vpack.c.bf16 %v3053_v12, %v3052_v22  ;;  %5024 = vpow2.f32 %v2568_v9  ;;  %v7724_v9 = vld [vmem:[#allocation46_spill] sm:$0xff] }
 0x332   :  { %v5009_v13 = vpop.eup %5008  ;;  %v2685_v32 = vpop.xlane.xlu1 %2684  ;;  %v3069_v16 = vmul.f32 %v5007_v61, %v7720_v31  ;;  %v2360_v35 = vsub.f32 %v7724_v9, %v6642_v19 }
 0x333   :  { %v2683_v36 = vpop.xlane.xlu0 %2682  ;;  %5026 = vrcp.f32 %v2685_v32  ;;  %v3068_v24 = vmul.f32 %v5009_v13, %v7721_v26  ;;  %v6845_v46 = vpop.eup %5010  ;;  %4659 = vmatpush3.bf16.xpose.msra.mxu0 %v4658_v21  ;;  %v2540_v13 = vmul.f32 1.442695, %v2345_v25  ;;  %v2361_v32 = vsub.f32 %v7725_v56, %v6648_v17 }
 0x334   :  { %5028 = vrcp.f32 %v2683_v36  ;;  %4660 = vmatprep.subr.bf16.mxu0 %v7709_v62 }
 0x335   :  { %v5013_v29 = vpop.eup %5012  ;;  %2256 = vmax.xlane.f32.xlu1 %v6850_v4  ;;  %2790 = vadd.xlane.f32.xlu0 %v6845_v46  ;;  %v4682_v49 = vpack.c.bf16 %v3069_v16, %v3068_v24  ;;  %v7726_v16 = vld [vmem:[#allocation65_spill] sm:$0xff]  ;;  %v2572_v25 = vmul.f32 1.442695, %v2361_v32 }
 0x336   :  { %v5015_v30 = vpop.eup %5014  ;;  %v2717_v8 = vpop.xlane.xlu1 %2716  ;;  %v3055_v22 = vmul.f32 %v5013_v29, %v6346_v44  ;;  %v2570_v44 = vmul.f32 1.442695, %v2360_v35  ;;  %v6877_v29 = vsel %vm1893_vm1, %v7727_v20, -1e+30  ;;  %v7729_v35 = vld [vmem:[#allocation69_spill] sm:$0xff] }
 0x337   :  { %v2715_v12 = vpop.xlane.xlu0 %2714  ;;  %v6860_v23 = vpop.eup %5016  ;;  %5030 = vrcp.f32 %v2717_v8  ;;  %4683 = vmatpush3.bf16.xpose.msra.mxu1 %v4682_v49  ;;  %v3054_v10 = vmul.f32 %v5015_v30, %v6341_v27 }
 0x338   :  { %v6863_v61 = vpop.eup %5018  ;;  %5032 = vrcp.f32 %v2715_v12  ;;  %4684 = vmatprep.subr.bf16.mxu1 %v7709_v62  ;;  %v7730_v12 = vld [vmem:[#allocation64_spill] sm:$0xff] }
 0x339   :  { %v5021_v21 = vpop.eup %5020  ;;  %2792 = vadd.xlane.f32.xlu1 %v6860_v23  ;;  %2822 = vadd.xlane.f32.xlu0 %v6863_v61  ;;  %v4661_v19 = vpack.c.bf16 %v3055_v22, %v3054_v10  ;;  %5034 = vpow2.f32 %v2538_v45  ;;  %v7728_v45 = vld [vmem:[#allocation71_spill] sm:$0xff]  ;;  %v6887_v22 = vsel %vm1893_vm1, %v7730_v12, -1e+30  ;;  %v7731_v10 = vld [vmem:[#allocation66_spill] sm:$0xff] }
 0x33a   :  { %v5023_v15 = vpop.eup %5022  ;;  %v2689_v36 = vpop.xlane.xlu1 %2688  ;;  %v3071_v31 = vmul.f32 %v5021_v21, %v6354_v3  ;;  %v6892_v21 = vsel %vm1893_vm1, %v7731_v10, -1e+30  ;;  %v7738_v10 = vld [vmem:[#allocation77_spill] sm:$0xff] }
 0x33b   :  { %v2687_v27 = vpop.xlane.xlu0 %2686  ;;  %5036 = vrcp.f32 %v2689_v36  ;;  %v3070_v26 = vmul.f32 %v5023_v15, %v7726_v16  ;;  %v6872_v24 = vpop.eup %5024  ;;  %4662 = vmatpush3.bf16.xpose.msra.mxu0 %v4661_v19  ;;  %v7734_v16 = vld [vmem:[#allocation72_spill] sm:$0xff] }
 0x33c   :  { %5038 = vrcp.f32 %v2687_v27  ;;  %4663 = vmatprep.subr.bf16.mxu0 %v7709_v62  ;;  %v7733_v27 = vld [vmem:[#allocation73_spill] sm:$0xff] }
 0x33d   :  { %v5027_v51 = vpop.eup %5026  ;;  %5040 = vpow2.f32 %v2540_v13  ;;  %2824 = vadd.xlane.f32.xlu1 %v6872_v24  ;;  %2226 = vmax.xlane.f32.xlu0 %v6877_v29  ;;  %v4685_v17 = vpack.c.bf16 %v3071_v31, %v3070_v26 }
 0x33e   :  { %v5029_v3 = vpop.eup %5028  ;;  %5042 = vpow2.f32 %v2570_v44  ;;  %v2721_v49 = vpop.xlane.xlu1 %2720  ;;  %v3057_v9 = vmul.f32 %v5027_v51, %v7728_v45  ;;  %v7732_v44 = vld [vmem:[#allocation48_spill] sm:$0xff]  ;;  %v7735_v51 = vld [vmem:[#allocation63_spill] sm:$0xff] }
 0x33f   :  { %v2719_v30 = vpop.xlane.xlu0 %2718  ;;  %5044 = vrcp.f32 %v2721_v49  ;;  %4686 = vmatpush3.bf16.xpose.msra.mxu1 %v4685_v17  ;;  %v3056_v8 = vmul.f32 %v5029_v3, %v7729_v35  ;;  %v2346_v56 = vsub.f32 %v7732_v44, %v6654_v58  ;;  %v6906_v17 = vsel %vm1893_vm1, %v7735_v51, -1e+30 }
 0x340   :  { %5046 = vrcp.f32 %v2719_v30  ;;  %4687 = vmatprep.subr.bf16.mxu1 %v7709_v62 }
 0x341   :  { %v5031_v13 = vpop.eup %5030  ;;  %2228 = vmax.xlane.f32.xlu1 %v6892_v21  ;;  %2258 = vmax.xlane.f32.xlu0 %v6887_v22  ;;  %v4664_v19 = vpack.c.bf16 %v3057_v9, %v3056_v8  ;;  %5048 = vpow2.f32 %v2572_v25  ;;  %v7736_v25 = vld [vmem:[#allocation49_spill] sm:$0xff]  ;;  %v2542_v45 = vmul.f32 1.442695, %v2346_v56  ;;  %v7737_v9 = vld [vmem:[#allocation50_spill] sm:$0xff] }
 0x342   :  { %v5033_v15 = vpop.eup %5032  ;;  %v2693_v32 = vpop.xlane.xlu1 %2692  ;;  %v3073_v31 = vmul.f32 %v5031_v13, %v7733_v27  ;;  %v2347_v58 = vsub.f32 %v7736_v25, %v6663_v60  ;;  %v2362_v35 = vsub.f32 %v7737_v9, %v6672_v42  ;;  %v7739_v60 = vld [vmem:[#allocation76_spill] sm:$0xff] }
 0x343   :  { %v2691_v36 = vpop.xlane.xlu0 %2690  ;;  %5050 = vrcp.f32 %v2693_v32  ;;  %v3072_v26 = vmul.f32 %v5033_v15, %v7734_v16  ;;  %v6901_v20 = vpop.eup %5034  ;;  %4665 = vmatpush3.bf16.xpose.msra.mxu0 %v4664_v19 }
 0x344   :  { %5052 = vrcp.f32 %v2691_v36  ;;  %4666 = vmatprep.subr.bf16.mxu0 %v7709_v62  ;;  %v2544_v32 = vmul.f32 1.442695, %v2347_v58  ;;  %v2574_v27 = vmul.f32 1.442695, %v2362_v35  ;;  %v7745_v58 = vld [vmem:[#allocation13_spill] sm:$0xff] }
 0x345   :  { %v5037_v3 = vpop.eup %5036  ;;  %2260 = vmax.xlane.f32.xlu1 %v6906_v17  ;;  %2794 = vadd.xlane.f32.xlu0 %v6901_v20  ;;  %v4688_v49 = vpack.c.bf16 %v3073_v31, %v3072_v26  ;;  %v7741_v31 = vld [vmem:[#allocation51_spill] sm:$0xff] }
 0x346   :  { %v5039_v30 = vpop.eup %5038  ;;  %v2725_v8 = vpop.xlane.xlu1 %2724  ;;  %v3059_v13 = vmul.f32 %v5037_v3, %v7738_v10  ;;  %v2363_v16 = vsub.f32 %v7741_v31, %v6681_v54  ;;  %v7742_v3 = vld [vmem:[#allocation14_spill] sm:$0xff] }
 0x347   :  { %v2723_v12 = vpop.xlane.xlu0 %2722  ;;  %v6916_v19 = vpop.eup %5040  ;;  %5054 = vrcp.f32 %v2725_v8  ;;  %4689 = vmatpush3.bf16.xpose.msra.mxu1 %v4688_v49  ;;  %v3058_v15 = vmul.f32 %v5039_v30, %v7739_v60  ;;  %v7743_v49 = vld [vmem:[#allocation15_spill] sm:$0xff]  ;;  %v6933_v8 = vsel %vm1893_vm1, %v7745_v58, -1e+30  ;;  %v7746_v60 = vld [vmem:[#allocation81_spill] sm:$0xff]  ;;  %v7749_v31 = vld [vmem:[#allocation74_spill] sm:$0xff] }
 0x348   :  { %v6919_v44 = vpop.eup %5042  ;;  %5056 = vrcp.f32 %v2723_v12  ;;  %4690 = vmatprep.subr.bf16.mxu1 %v7709_v62  ;;  %v2576_v12 = vmul.f32 1.442695, %v2363_v16  ;;  %v7751_v58 = vld [vmem:[#allocation18_spill] sm:$0xff] }
 0x349   :  { %7740 = vst [vmem:[#allocation38_spill] sm:$0xff] %v6919_v44  ;;  %v5045_v56 = vpop.eup %5044  ;;  %2796 = vadd.xlane.f32.xlu1 %v6916_v19  ;;  %2826 = vadd.xlane.f32.xlu0 %v6919_v44  ;;  %v4667_v42 = vpack.c.bf16 %v3059_v13, %v3058_v15  ;;  %5058 = vpow2.f32 %v2542_v45 }
 0x34a   :  { %v5047_v36 = vpop.eup %5046  ;;  %v2729_v26 = vpop.xlane.xlu1 %2728  ;;  %v3075_v25 = vmul.f32 %v5045_v56, %v7742_v3  ;;  %v7747_v56 = vld [vmem:[#allocation80_spill] sm:$0xff] }
 0x34b   :  { %v2727_v51 = vpop.xlane.xlu0 %2726  ;;  %5060 = vrcp.f32 %v2729_v26  ;;  %v3074_v30 = vmul.f32 %v5047_v36, %v7743_v49  ;;  %v6928_v9 = vpop.eup %5048  ;;  %4668 = vmatpush3.bf16.xpose.msra.mxu0 %v4667_v42  ;;  %v7748_v36 = vld [vmem:[#allocation68_spill] sm:$0xff] }
 0x34c   :  { %7744 = vst [vmem:[#allocation39_spill] sm:$0xff] %v6928_v9  ;;  %5062 = vrcp.f32 %v2727_v51  ;;  %4669 = vmatprep.subr.bf16.mxu0 %v7709_v62  ;;  %v7750_v3 = vld [vmem:[#allocation52_spill] sm:$0xff] }
 0x34d   :  { %v5051_v45 = vpop.eup %5050  ;;  %5064 = vpow2.f32 %v2544_v32  ;;  %2828 = vadd.xlane.f32.xlu1 %v6928_v9  ;;  %2230 = vmax.xlane.f32.xlu0 %v6933_v8  ;;  %v4691_v54 = vpack.c.bf16 %v3075_v25, %v3074_v30  ;;  %v6943_v32 = vsel %vm1893_vm1, %v7748_v36, -1e+30  ;;  %v2348_v25 = vsub.f32 %v7750_v3, %v6687_v39  ;;  %v7763_v9 = vld [vmem:[#allocation87_spill] sm:$0xff] }
 0x34e   :  { %v5053_v35 = vpop.eup %5052  ;;  %5066 = vpow2.f32 %v2574_v27  ;;  %v2761_v10 = vpop.xlane.xlu1 %2760  ;;  %v3061_v15 = vmul.f32 %v5051_v45, %v7746_v60  ;;  %v6948_v27 = vsel %vm1893_vm1, %v7749_v31, -1e+30  ;;  %v7756_v31 = vld [vmem:[#allocation54_spill] sm:$0xff] }
 0x34f   :  { %v2759_v13 = vpop.xlane.xlu0 %2758  ;;  %5068 = vrcp.f32 %v2761_v10  ;;  %4692 = vmatpush3.bf16.xpose.msra.mxu1 %v4691_v54  ;;  %v3060_v42 = vmul.f32 %v5053_v35, %v7747_v56  ;;  %v7752_v54 = vld [vmem:[#allocation19_spill] sm:$0xff]  ;;  %v2546_v36 = vmul.f32 1.442695, %v2348_v25 }
 0x350   :  { %5070 = vrcp.f32 %v2759_v13  ;;  %4693 = vmatprep.subr.bf16.mxu1 %v7709_v62  ;;  %v7754_v13 = vld [vmem:[#allocation67_spill] sm:$0xff] }
 0x351   :  { %v5055_v16 = vpop.eup %5054  ;;  %2232 = vmax.xlane.f32.xlu1 %v6948_v27  ;;  %2262 = vmax.xlane.f32.xlu0 %v6943_v32  ;;  %v4670_v26 = vpack.c.bf16 %v3061_v15, %v3060_v42  ;;  %5072 = vpow2.f32 %v2576_v12  ;;  %v6962_v60 = vsel %vm1893_vm1, %v7754_v13, -1e+30  ;;  %v7755_v12 = vld [vmem:[#allocation53_spill] sm:$0xff] }
 0x352   :  { %v5057_v51 = vpop.eup %5056  ;;  %v2197_v49 = vpop.xlane.xlu1 %2196  ;;  %v3077_v45 = vmul.f32 %v5055_v16, %v7751_v58  ;;  %v2349_v56 = vsub.f32 %v7755_v12, %v6698_v7  ;;  %v2364_v16 = vsub.f32 %v7756_v31, %v6702_v34  ;;  %v7759_v7 = vld [vmem:[#allocation84_spill] sm:$0xff] }
 0x353   :  { %v2731_v30 = vpop.xlane.xlu0 %2730  ;;  %v3076_v35 = vmul.f32 %v5057_v51, %v7752_v54  ;;  %v6957_v10 = vpop.eup %5058  ;;  %4671 = vmatpush3.bf16.xpose.msra.mxu0 %v4670_v26  ;;  %v7757_v26 = vld [vmem:[#allocation86_spill] sm:$0xff] }
 0x354   :  { %7753 = vst [vmem:[#allocation40_spill] sm:$0xff] %v6957_v10  ;;  %5074 = vrcp.f32 %v2731_v30  ;;  %4696 = vmatprep.subr.bf16.mxu0 %v7709_v62  ;;  %v2548_v34 = vmul.f32 1.442695, %v2349_v56 }
 0x355   :  { %v5061_v15 = vpop.eup %5060  ;;  %2264 = vmax.xlane.f32.xlu1 %v6962_v60  ;;  %2798 = vadd.xlane.f32.xlu0 %v6957_v10  ;;  %v4694_v39 = vpack.c.bf16 %v3077_v45, %v3076_v35  ;;  %v82_v45 = vld [vmem:[#allocation7] sm:$0xff]  ;;  %v83_v10 = vld [vmem:[#allocation7 + $0x8] sm:$0xff] }
 0x356   :  { %v5063_v42 = vpop.eup %5062  ;;  %v2733_v51 = vpop.xlane.xlu1 %2732  ;;  %v3079_v58 = vmul.f32 %v5061_v15, %v7757_v26  ;;  %v2578_v15 = vmul.f32 1.442695, %v2364_v16 }
 0x357   :  { %v2763_v3 = vpop.xlane.xlu0 %2762  ;;  %v6972_v54 = vpop.eup %5064  ;;  %4695 = vmatpush3.bf16.xpose.msra.mxu1 %v4694_v39  ;;  %v3078_v13 = vmul.f32 %v5063_v42, %v7759_v7  ;;  %5076 = vrcp.f32 %v2733_v51  ;;  %v7761_v39 = vld [vmem:[#allocation91_spill] sm:$0xff]  ;;  %v7762_v7 = vld [vmem:[#allocation88_spill] sm:$0xff] }
 0x358   :  { %7758 = vst [vmem:[#allocation55_spill] sm:$0xff] %v6972_v54  ;;  %v6975_v12 = vpop.eup %5066  ;;  %4720 = vmatprep.subr.bf16.mxu1 %v7709_v62  ;;  %5078 = vrcp.f32 %v2763_v3  ;;  %v2365_v31 = vsub.f32 %v7761_v39, %v2197_v49 }
 0x359   :  { %7760 = vst [vmem:[#allocation41_spill] sm:$0xff] %v6975_v12  ;;  %v5069_v25 = vpop.eup %5068  ;;  %2800 = vadd.xlane.f32.xlu1 %v6972_v54  ;;  %2830 = vadd.xlane.f32.xlu0 %v6975_v12  ;;  %v4697_v30 = vpack.c.bf16 %v3079_v58, %v3078_v13  ;;  %5080 = vpow2.f32 %v2546_v36  ;;  %v7765_v54 = vld [vmem:[#allocation17_spill] sm:$0xff]  ;;  %v7767_v36 = vmov 0.0  }
 0x35a   :  { %v5071_v35 = vpop.eup %5070  ;;  %v2765_v42 = vpop.xlane.xlu1 %2764  ;;  %v3095_v51 = vmul.f32 %v5069_v25, %v7762_v7  ;;  %4401 = vmatmul.mubr.f32.vlgmr.msra.gmra.mrb[64].mxu0 %v82_v45  ;;  %v6988_v58 = vsel %vm1893_vm1, %v7765_v54, -1e+30  ;;  %v2580_v16 = vmul.f32 1.442695, %v2365_v31  ;;  %v7768_v45 = vld [vmem:[#allocation12_spill] sm:$0xff] }
 0x35b   :  { %v2167_v26 = vpop.xlane.xlu0 %2166  ;;  %5082 = vrcp.f32 %v2765_v42  ;;  %v3094_v56 = vmul.f32 %v5071_v35, %v7763_v9  ;;  %v6983_v3 = vpop.eup %5072  ;;  %7766 = vst [vmem:[#allocation56_spill] sm:$0xff] %v6988_v58  ;;  %4698 = vmatpush3.bf16.xpose.msra.mxu0 %v4697_v30  ;;  %4470 = vmatprep.mubr.msk.f32.mxu0 %vm5469_vm2, %v7767_v36  ;;  %v7000_v25 = vsel %vm1893_vm1, %v7768_v45, -1e+30  ;;  %v7772_v42 = vld [vmem:[#allocation21_spill] sm:$0xff]  ;;  %v7775_v45 = vld [vmem:[#allocation75_spill] sm:$0xff] }
 0x35c   :  { %7764 = vst [vmem:[#allocation42_spill] sm:$0xff] %v6983_v3  ;;  %5084 = vpow2.f32 %v2548_v34  ;;  %4699 = vmatprep.subr.bf16.mxu0 %v7709_v62  ;;  %7769 = vst [vmem:[#allocation43_spill] sm:$0xff] %v7000_v25  ;;  %v7770_v34 = vld [vmem:[#allocation78_spill] sm:$0xff] }
 0x35d   :  { %2832 = vadd.xlane.f32.xlu1 %v6983_v3  ;;  %2234 = vmax.xlane.f32.xlu0 %v6988_v58  ;;  %v4721_v49 = vpack.c.bf16 %v3095_v51, %v3094_v56  ;;  %5086 = vpow2.f32 %v2578_v15  ;;  %v7005_v30 = vsel %vm1893_vm1, %v7770_v34, -1e+30  ;;  %v7773_v51 = vld [vmem:[#allocation23_spill] sm:$0xff]  ;;  %v7018_v34 = vsel %vm1893_vm1, %v7775_v45, -1e+30  ;;  %v7777_v3 = vld [vmem:[#allocation92_spill] sm:$0xff] }
 0x35e   :  { %v2169_v9 = vpop.xlane.xlu1 %2168  ;;  %4436 = vmatmul.mubr.f32.vlgmr.msra.gmra.mrb[64].mxu1 %v83_v10  ;;  %v5075_v54 = vpop.eup %5074  ;;  %7771 = vst [vmem:[#allocation59_spill] sm:$0xff] %v7005_v30  ;;  %v2350_v10 = vsub.f32 %v6479_v43, %v2167_v26  ;;  %5088 = vpow2.f32 %v2580_v16  ;;  %7776 = vst [vmem:[#allocation60_spill] sm:$0xff] %v7018_v34  ;;  %v7780_v58 = vld [vmem:[#allocation24_spill] sm:$0xff] }
 0x35f   :  { %v2199_v13 = vpop.xlane.xlu0 %2198  ;;  %4722 = vmatpush3.bf16.xpose.msra.mxu1 %v4721_v49  ;;  %4505 = vmatprep.mubr.msk.f32.mxu1 %vm5469_vm2, %v7767_v36  ;;  %v3080_v7 = vmul.f32 %v5075_v54, %v7772_v42  ;;  %v2351_v12 = vsub.f32 %v7777_v3, %v2169_v9 }
 0x360   :  { %4723 = vmatprep.subr.bf16.mxu1 %v7709_v62  ;;  %v2550_v26 = vmul.f32 1.442695, %v2350_v10 }
 0x361   :  { %2236 = vmax.xlane.f32.xlu1 %v7005_v30  ;;  %2266 = vmax.xlane.f32.xlu0 %v7000_v25  ;;  %v5077_v35 = vpop.eup %5076  ;;  %v7778_v25 = vld [vmem:[#allocation93_spill] sm:$0xff]  ;;  %v2552_v9 = vmul.f32 1.442695, %v2351_v12 }
 0x362   :  { %v2201_v15 = vpop.xlane.xlu1 %2200  ;;  %v5079_v31 = vpop.eup %5078  ;;  %v3081_v56 = vmul.f32 %v5077_v35, %v7773_v51  ;;  %v2366_v54 = vsub.f32 %v7778_v25, %v2199_v13  ;;  %v7779_v51 = vld [vmem:[#allocation22_spill] sm:$0xff]  ;;  %v7783_v25 = vld [vmem:[#allocation25_spill] sm:$0xff] }
 0x363   :  { %v2735_v39 = vpop.xlane.xlu0 %2734  ;;  %v7013_v49 = vpop.eup %5080  ;;  %v3096_v30 = vmul.f32 %v5079_v31, %v7779_v51 }
 0x364   :  { %7774 = vst [vmem:[#allocation57_spill] sm:$0xff] %v7013_v49  ;;  %v4700_v16 = vpack.c.bf16 %v3081_v56, %v3080_v7  ;;  %5090 = vrcp.f32 %v2735_v39  ;;  %v2582_v13 = vmul.f32 1.442695, %v2366_v54  ;;  %v2367_v39 = vsub.f32 %v7783_v25, %v2201_v15  ;;  %v7789_v54 = vld [vmem:[#allocation82_spill] sm:$0xff] }
 0x365   :  { %v5083_v43 = vpop.eup %5082  ;;  %2268 = vmax.xlane.f32.xlu1 %v7018_v34  ;;  %2802 = vadd.xlane.f32.xlu0 %v7013_v49 }
 0x366   :  { %v2737_v35 = vpop.xlane.xlu1 %2736  ;;  %v3097_v44 = vmul.f32 %v5083_v43, %v7780_v58  ;;  %v7026_v45 = vpop.eup %5084  ;;  %4701 = vmatpush3.bf16.xpose.msra.mxu0 %v4700_v16 }
 0x367   :  { %v2767_v42 = vpop.xlane.xlu0 %2766  ;;  %7781 = vst [vmem:[#allocation44_spill] sm:$0xff] %v7026_v45  ;;  %v7028_v10 = vpop.eup %5086  ;;  %5092 = vrcp.f32 %v2737_v35  ;;  %4702 = vmatprep.subr.bf16.mxu0 %v7709_v62  ;;  %v7052_v35 = vsel %vm1893_vm1, %v7789_v54, -1e+30 }
 0x368   :  { %7782 = vst [vmem:[#allocation62_spill] sm:$0xff] %v7028_v10  ;;  %v4724_v3 = vpack.c.bf16 %v3097_v44, %v3096_v30  ;;  %5094 = vrcp.f32 %v2767_v42  ;;  %v7035_v7 = vpop.eup %5088  ;;  %v7785_v44 = vld [vmem:[#allocation85_spill] sm:$0xff]  ;;  %v2584_v30 = vmul.f32 1.442695, %v2367_v39  ;;  %7790 = vst [vmem:[#allocation46_spill] sm:$0xff] %v7052_v35  ;;  %v7791_v42 = vld [vmem:[#allocation28_spill] sm:$0xff] }
 0x369   :  { %2804 = vadd.xlane.f32.xlu1 %v7026_v45  ;;  %2834 = vadd.xlane.f32.xlu0 %v7028_v10  ;;  %5096 = vpow2.f32 %v2550_v26  ;;  %7784 = vst [vmem:[#allocation61_spill] sm:$0xff] %v7035_v7  ;;  %v7040_v12 = vsel %vm1893_vm1, %v7785_v44, -1e+30  ;;  %v7787_v26 = vld [vmem:[#allocation16_spill] sm:$0xff]  ;;  %v7792_v39 = vld [vmem:[#allocation94_spill] sm:$0xff]  ;;  %v7793_v44 = vld [vmem:[#allocation27_spill] sm:$0xff] }
 0x36a   :  { %v2769_v58 = vpop.xlane.xlu1 %2768  ;;  %4725 = vmatpush3.bf16.xpose.msra.mxu1 %v4724_v3  ;;  %7786 = vst [vmem:[#allocation58_spill] sm:$0xff] %v7040_v12  ;;  %v7047_v16 = vsel %vm1893_vm1, %v7787_v26, -1e+30  ;;  %v7794_v10 = vld [vmem:[#allocation79_spill] sm:$0xff]  ;;  %v7795_v45 = vld [vmem:[#allocation96_spill] sm:$0xff] }
 0x36b   :  { %v2171_v31 = vpop.xlane.xlu0 %2170  ;;  %5098 = vrcp.f32 %v2769_v58  ;;  %4726 = vmatprep.subr.bf16.mxu1 %v7709_v62  ;;  %7788 = vst [vmem:[#allocation45_spill] sm:$0xff] %v7047_v16  ;;  %v7064_v54 = vsel %vm1893_vm1, %v7794_v10, -1e+30 }
 0x36c   :  { %5100 = vpow2.f32 %v2552_v9  ;;  %v2352_v51 = vsub.f32 %v7791_v42, %v2171_v31 }
 0x36d   :  { %2836 = vadd.xlane.f32.xlu1 %v7035_v7  ;;  %2238 = vmax.xlane.f32.xlu0 %v7040_v12  ;;  %5102 = vpow2.f32 %v2582_v13  ;;  %v7798_v12 = vld [vmem:[#allocation95_spill] sm:$0xff] }
 0x36e   :  { %v2173_v15 = vpop.xlane.xlu1 %2172  ;;  %v5091_v43 = vpop.eup %5090  ;;  %5104 = vpow2.f32 %v2584_v30  ;;  %v2554_v42 = vmul.f32 1.442695, %v2352_v51 }
 0x36f   :  { %v2203_v56 = vpop.xlane.xlu0 %2202  ;;  %v3082_v58 = vmul.f32 %v5091_v43, %v7792_v39  ;;  %v2353_v49 = vsub.f32 %v7795_v45, %v2173_v15 }
 0x371   :  { %2240 = vmax.xlane.f32.xlu1 %v7052_v35  ;;  %2270 = vmax.xlane.f32.xlu0 %v7047_v16  ;;  %v5093_v3 = vpop.eup %5092  ;;  %v7796_v16 = vld [vmem:[#allocation97_spill] sm:$0xff]  ;;  %v2556_v15 = vmul.f32 1.442695, %v2353_v49  ;;  %v7804_v49 = vld [vmem:[#allocation90_spill] sm:$0xff] }
 0x372   :  { %v2205_v9 = vpop.xlane.xlu1 %2204  ;;  %v5095_v25 = vpop.eup %5094  ;;  %v3083_v26 = vmul.f32 %v5093_v3, %v7793_v44  ;;  %v2368_v43 = vsub.f32 %v7796_v16, %v2203_v56  ;;  %v7797_v44 = vld [vmem:[#allocation26_spill] sm:$0xff] }
 0x373   :  { %v2739_v13 = vpop.xlane.xlu0 %2738  ;;  %v7059_v7 = vpop.eup %5096  ;;  %v3098_v35 = vmul.f32 %v5095_v25, %v7797_v44 }
 0x374   :  { %v4703_v30 = vpack.c.bf16 %v3083_v26, %v3082_v58  ;;  %5106 = vrcp.f32 %v2739_v13  ;;  %v7801_v58 = vld [vmem:[#allocation29_spill] sm:$0xff]  ;;  %v2586_v56 = vmul.f32 1.442695, %v2368_v43  ;;  %v7802_v13 = vld [vmem:[#allocation32_spill] sm:$0xff] }
 0x375   :  { %v5099_v31 = vpop.eup %5098  ;;  %2272 = vmax.xlane.f32.xlu1 %v7064_v54  ;;  %2806 = vadd.xlane.f32.xlu0 %v7059_v7  ;;  %v2369_v26 = vsub.f32 %v7801_v58, %v2205_v9  ;;  %v7805_v43 = vld [vmem:[#allocation100_spill] sm:$0xff] }
 0x376   :  { %v2741_v3 = vpop.xlane.xlu1 %2740  ;;  %v3099_v34 = vmul.f32 %v5099_v31, %v7798_v12  ;;  %v7072_v10 = vpop.eup %5100  ;;  %4704 = vmatpush3.bf16.xpose.msra.mxu0 %v4703_v30  ;;  %v7807_v58 = vld [vmem:[#allocation20_spill] sm:$0xff] }
 0x377   :  { %v2771_v39 = vpop.xlane.xlu0 %2770  ;;  %7799 = vst [vmem:[#allocation47_spill] sm:$0xff] %v7072_v10  ;;  %v7074_v51 = vpop.eup %5102  ;;  %5108 = vrcp.f32 %v2741_v3  ;;  %4705 = vmatprep.subr.bf16.mxu0 %v7709_v62  ;;  %v2588_v9 = vmul.f32 1.442695, %v2369_v26 }
 0x378   :  { %7800 = vst [vmem:[#allocation65_spill] sm:$0xff] %v7074_v51  ;;  %v4727_v45 = vpack.c.bf16 %v3099_v34, %v3098_v35  ;;  %5110 = vrcp.f32 %v2771_v39  ;;  %v7082_v34 = vpop.eup %5104  ;;  %v7087_v35 = vsel %vm1893_vm1, %v7804_v49, -1e+30  ;;  %v7806_v39 = vld [vmem:[#allocation101_spill] sm:$0xff] }
 0x379   :  { %2808 = vadd.xlane.f32.xlu1 %v7072_v10  ;;  %2838 = vadd.xlane.f32.xlu0 %v7074_v51  ;;  %5112 = vpow2.f32 %v2554_v42  ;;  %7803 = vst [vmem:[#allocation70_spill] sm:$0xff] %v7082_v34 }
 0x37a   :  { %v2773_v12 = vpop.xlane.xlu1 %2772  ;;  %4728 = vmatpush3.bf16.xpose.msra.mxu1 %v4727_v45 }
 0x37b   :  { %v2175_v16 = vpop.xlane.xlu0 %2174  ;;  %5114 = vrcp.f32 %v2773_v12  ;;  %4729 = vmatprep.subr.bf16.mxu1 %v7709_v62  ;;  %v7096_v12 = vsel %vm1893_vm1, %v7807_v58, -1e+30  ;;  %v7810_v58 = vld [vmem:[#allocation31_spill] sm:$0xff] }
 0x37c   :  { %v2354_v25 = vsub.f32 %v7802_v13, %v2175_v16  ;;  %5116 = vpow2.f32 %v2556_v15  ;;  %v7808_v15 = vld [vmem:[#allocation89_spill] sm:$0xff] }
 0x37d   :  { %2840 = vadd.xlane.f32.xlu1 %v7082_v34  ;;  %2242 = vmax.xlane.f32.xlu0 %v7087_v35  ;;  %5118 = vpow2.f32 %v2586_v56  ;;  %v7101_v26 = vsel %vm1893_vm1, %v7808_v15, -1e+30 }
 0x37e   :  { %v2558_v31 = vmul.f32 1.442695, %v2354_v25  ;;  %v2177_v42 = vpop.xlane.xlu1 %2176  ;;  %v5107_v45 = vpop.eup %5106  ;;  %5120 = vpow2.f32 %v2588_v9  ;;  %v7811_v9 = vld [vmem:[#allocation83_spill] sm:$0xff] }
 0x37f   :  { %v2207_v30 = vpop.xlane.xlu0 %2206  ;;  %v2355_v3 = vsub.f32 %v7805_v43, %v2177_v42  ;;  %v7809_v43 = vld [vmem:[#allocation98_spill] sm:$0xff] }
 0x380   :  { %v2370_v44 = vsub.f32 %v7806_v39, %v2207_v30  ;;  %5122 = vpow2.f32 %v2558_v31  ;;  %v3084_v39 = vmul.f32 %v5107_v45, %v7809_v43 }
 0x381   :  { %v2560_v56 = vmul.f32 1.442695, %v2355_v3  ;;  %2244 = vmax.xlane.f32.xlu1 %v7101_v26  ;;  %2274 = vmax.xlane.f32.xlu0 %v7096_v12  ;;  %v5109_v13 = vpop.eup %5108  ;;  %v7113_v3 = vsel %vm1893_vm1, %v7811_v9, -1e+30 }
 0x382   :  { %v2590_v16 = vmul.f32 1.442695, %v2370_v44  ;;  %v2209_v25 = vpop.xlane.xlu1 %2208  ;;  %v5111_v42 = vpop.eup %5110  ;;  %v3085_v34 = vmul.f32 %v5109_v13, %v7810_v58  ;;  %v7812_v13 = vld [vmem:[#allocation30_spill] sm:$0xff]  ;;  %v7813_v58 = vld [vmem:[#allocation99_spill] sm:$0xff] }
 0x383   :  { %v2743_v49 = vpop.xlane.xlu0 %2742  ;;  %v2371_v30 = vsub.f32 %v6632_v28, %v2209_v25  ;;  %v7108_v15 = vpop.eup %5112  ;;  %5124 = vpow2.f32 %v2560_v56  ;;  %v3100_v43 = vmul.f32 %v5111_v42, %v7812_v13 }
 0x384   :  { %5126 = vpow2.f32 %v2590_v16  ;;  %v4706_v31 = vpack.c.bf16 %v3085_v34, %v3084_v39 }
 0x385   :  { %v5115_v44 = vpop.eup %5114  ;;  %2276 = vmax.xlane.f32.xlu1 %v7113_v3  ;;  %2810 = vadd.xlane.f32.xlu0 %v7108_v15  ;;  %v2592_v28 = vmul.f32 1.442695, %v2371_v30  ;;  %5128 = vrcp.f32 %v2743_v49 }
 0x386   :  { %v2745_v45 = vpop.xlane.xlu1 %2744  ;;  %v3101_v51 = vmul.f32 %v5115_v44, %v7813_v58  ;;  %v7119_v10 = vpop.eup %5116  ;;  %4707 = vmatpush3.bf16.xpose.msra.mxu0 %v4706_v31 }
 0x387   :  { %v2775_v25 = vpop.xlane.xlu0 %2774  ;;  %v7121_v1 = vpop.eup %5118  ;;  %5130 = vrcp.f32 %v2745_v45  ;;  %4708 = vmatprep.subr.bf16.mxu0 %v7709_v62 }
 0x388   :  { %v4730_v56 = vpack.c.bf16 %v3101_v51, %v3100_v43  ;;  %5132 = vrcp.f32 %v2775_v25  ;;  %v7126_v49 = vpop.eup %5120 }
 0x389   :  { %2812 = vadd.xlane.f32.xlu1 %v7119_v10  ;;  %2842 = vadd.xlane.f32.xlu0 %v7121_v1  ;;  %5134 = vpow2.f32 %v2592_v28  ;;  %7814 = vst [vmem:[#allocation71_spill] sm:$0xff] %v7126_v49 }
 0x38a   :  { %v2777_v34 = vpop.xlane.xlu1 %2776  ;;  %4731 = vmatpush3.bf16.xpose.msra.mxu1 %v4730_v56  ;;  %v7130_v30 = vpop.eup %5122 }
 0x38b   :  { %v2179_v16 = vpop.xlane.xlu0 %2178  ;;  %5136 = vrcp.f32 %v2777_v34  ;;  %4732 = vmatprep.subr.bf16.mxu1 %v7709_v62  ;;  %7815 = vst [vmem:[#allocation69_spill] sm:$0xff] %v7130_v30 }
 0x38c   :  { %v2356_v42 = vsub.f32 %v6659_v14, %v2179_v16 }
 0x38d   :  { %2844 = vadd.xlane.f32.xlu1 %v7126_v49  ;;  %2814 = vadd.xlane.f32.xlu0 %v7130_v30  ;;  %v7134_v39 = vpop.eup %5124 }
 0x38e   :  { %v2562_v51 = vmul.f32 1.442695, %v2356_v42  ;;  %7816 = vst [vmem:[#allocation64_spill] sm:$0xff] %v7134_v39  ;;  %v2181_v9 = vpop.xlane.xlu1 %2180  ;;  %v7136_v31 = vpop.eup %5126 }
 0x38f   :  { %v2211_v44 = vpop.xlane.xlu0 %2210  ;;  %7817 = vst [vmem:[#allocation66_spill] sm:$0xff] %v7136_v31  ;;  %v2357_v28 = vsub.f32 %v6670_v6, %v2181_v9  ;;  %v5129_v45 = vpop.eup %5128 }
 0x390   :  { %5138 = vpow2.f32 %v2562_v51  ;;  %v2372_v14 = vsub.f32 %v6677_v53, %v2211_v44  ;;  %v3086_v42 = vmul.f32 %v5129_v45, %v6627_v5  ;;  %v7818_v51 = vld [vmem:[#allocation33_spill] sm:$0xff] }
 0x391   :  { %v2564_v25 = vmul.f32 1.442695, %v2357_v28  ;;  %2816 = vadd.xlane.f32.xlu1 %v7134_v39  ;;  %2846 = vadd.xlane.f32.xlu0 %v7136_v31  ;;  %v5131_v43 = vpop.eup %5130  ;;  %v7819_v39 = vld [vmem:[#allocation35_spill] sm:$0xff] }
 0x392   :  { %v2594_v13 = vmul.f32 1.442695, %v2372_v14  ;;  %v2213_v58 = vpop.xlane.xlu1 %2212  ;;  %v5133_v34 = vpop.eup %5132  ;;  %v3087_v6 = vmul.f32 %v5131_v43, %v7818_v51 }
 0x393   :  { %v2747_v56 = vpop.xlane.xlu0 %2746  ;;  %5140 = vpow2.f32 %v2564_v25  ;;  %v2373_v16 = vsub.f32 %v6696_v63, %v2213_v58  ;;  %v7145_v9 = vpop.eup %5134  ;;  %v3102_v30 = vmul.f32 %v5133_v34, %v7819_v39  ;;  %v7820_v25 = vld [vmem:[#allocation34_spill] sm:$0xff]  ;;  %v7823_v34 = vld [vmem:[#allocation105_spill] sm:$0xff] }
 0x394   :  { %5142 = vpow2.f32 %v2594_v13  ;;  %v4709_v28 = vpack.c.bf16 %v3087_v6, %v3086_v42 }
 0x395   :  { %v5137_v53 = vpop.eup %5136  ;;  %v2596_v44 = vmul.f32 1.442695, %v2373_v16  ;;  %2848 = vadd.xlane.f32.xlu1 %v7145_v9  ;;  %5144 = vrcp.f32 %v2747_v56 }
 0x396   :  { %v2749_v14 = vpop.xlane.xlu1 %2748  ;;  %v3103_v49 = vmul.f32 %v5137_v53, %v7820_v25  ;;  %4710 = vmatpush3.bf16.xpose.msra.mxu0 %v4709_v28  ;;  %v7825_v25 = vld [vmem:[#allocation106_spill] sm:$0xff] }
 0x397   :  { %v2779_v31 = vpop.xlane.xlu0 %2778  ;;  %5146 = vpow2.f32 %v2596_v44  ;;  %4711 = vmatprep.subr.bf16.mxu0 %v7709_v62 }
 0x398   :  { %5148 = vrcp.f32 %v2749_v14  ;;  %v4733_v5 = vpack.c.bf16 %v3103_v49, %v3102_v30 }
 0x399   :  { %5150 = vrcp.f32 %v2779_v31 }
 0x39a   :  { %v7151_v63 = vpop.eup %5138  ;;  %v2781_v45 = vpop.xlane.xlu1 %2780  ;;  %4734 = vmatpush3.bf16.xpose.msra.mxu1 %v4733_v5 }
 0x39b   :  { %2818 = vadd.xlane.f32.xlu0 %v7151_v63  ;;  %v2215_v13 = vpop.xlane.xlu0 %2214  ;;  %5152 = vrcp.f32 %v2781_v45  ;;  %4735 = vmatprep.subr.bf16.mxu1 %v7709_v62  ;;  %v7826_v45 = vld [vmem:[#allocation36_spill] sm:$0xff] }
 0x39c   :  { %v2374_v43 = vsub.f32 %v6717_v38, %v2215_v13  ;;  %v7827_v13 = vld [vmem:[#allocation102_spill] sm:$0xff] }
 0x39d   :  { %v7156_v39 = vpop.eup %5140 }
 0x39e   :  { %7821 = vst [vmem:[#allocation48_spill] sm:$0xff] %v7156_v39  ;;  %v2598_v58 = vmul.f32 1.442695, %v2374_v43  ;;  %v7158_v56 = vpop.eup %5142  ;;  %v2217_v49 = vpop.xlane.xlu1 %2216  ;;  %2820 = vadd.xlane.f32.xlu1 %v7156_v39  ;;  %v7829_v39 = vld [vmem:[#allocation104_spill] sm:$0xff] }
 0x39f   :  { %7822 = vst [vmem:[#allocation73_spill] sm:$0xff] %v7158_v56  ;;  %v2247_v30 = vpop.xlane.xlu0 %2246  ;;  %v2375_v31 = vsub.f32 %v6729_v0, %v2217_v49  ;;  %2850 = vadd.xlane.f32.xlu0 %v7158_v56  ;;  %v5145_v42 = vpop.eup %5144 }
 0x3a0   :  { %5154 = vpow2.f32 %v2598_v58  ;;  %v2390_v16 = vsub.f32 %v7823_v34, %v2247_v30  ;;  %v3088_v0 = vmul.f32 %v5145_v42, %v7826_v45 }
 0x3a1   :  { %v7164_v38 = vpop.eup %5146  ;;  %v2600_v51 = vmul.f32 1.442695, %v2375_v31 }
 0x3a2   :  { %7824 = vst [vmem:[#allocation72_spill] sm:$0xff] %v7164_v38  ;;  %v2630_v6 = vmul.f32 1.442695, %v2390_v16  ;;  %v5149_v53 = vpop.eup %5148  ;;  %v2249_v44 = vpop.xlane.xlu1 %2248  ;;  %2852 = vadd.xlane.f32.xlu1 %v7164_v38  ;;  %v7828_v16 = vld [vmem:[#allocation103_spill] sm:$0xff] }
 0x3a3   :  { %v2751_v28 = vpop.xlane.xlu0 %2750  ;;  %v5151_v14 = vpop.eup %5150  ;;  %5156 = vpow2.f32 %v2600_v51  ;;  %v2391_v5 = vsub.f32 %v7825_v25, %v2249_v44  ;;  %v3089_v43 = vmul.f32 %v5149_v53, %v7827_v13 }
 0x3a4   :  { %5158 = vpow2.f32 %v2630_v6  ;;  %v3104_v56 = vmul.f32 %v5151_v14, %v7828_v16 }
 0x3a5   :  { %v5153_v58 = vpop.eup %5152  ;;  %v2632_v49 = vmul.f32 1.442695, %v2391_v5  ;;  %v4712_v30 = vpack.c.bf16 %v3089_v43, %v3088_v0  ;;  %5160 = vrcp.f32 %v2751_v28 }
 0x3a6   :  { %v2753_v31 = vpop.xlane.xlu1 %2752  ;;  %v3105_v38 = vmul.f32 %v5153_v58, %v7829_v39 }
 0x3a7   :  { %v2783_v34 = vpop.xlane.xlu0 %2782  ;;  %5162 = vpow2.f32 %v2632_v49  ;;  %4713 = vmatpush3.bf16.xpose.msra.mxu0 %v4712_v30 }
 0x3a8   :  { %5164 = vrcp.f32 %v2753_v31  ;;  %v4736_v51 = vpack.c.bf16 %v3105_v38, %v3104_v56  ;;  %4714 = vmatprep.subr.bf16.mxu0 %v7709_v62 }
 0x3a9   :  { %5166 = vrcp.f32 %v2783_v34  ;;  %v7830_v34 = vld [vmem:[#allocation37_spill] sm:$0xff] }
 0x3aa   :  { %v7173_v42 = vpop.eup %5154  ;;  %v2785_v6 = vpop.xlane.xlu1 %2784  ;;  %4737 = vmatpush3.bf16.xpose.msra.mxu1 %v4736_v51 }
 0x3ab   :  { %2854 = vadd.xlane.f32.xlu0 %v7173_v42  ;;  %v2219_v53 = vpop.xlane.xlu0 %2218  ;;  %5168 = vrcp.f32 %v2785_v6  ;;  %4738 = vmatprep.subr.bf16.mxu1 %v7709_v62 }
 0x3ac   :  { %v2376_v44 = vsub.f32 %v6765_v52, %v2219_v53 }
 0x3ad   :  { %v7178_v39 = vpop.eup %5156 }
 0x3ae   :  { %v2602_v28 = vmul.f32 1.442695, %v2376_v44  ;;  %v7180_v14 = vpop.eup %5158  ;;  %v2221_v56 = vpop.xlane.xlu1 %2220  ;;  %2856 = vadd.xlane.f32.xlu1 %v7178_v39 }
 0x3af   :  { %v2251_v38 = vpop.xlane.xlu0 %2250  ;;  %v2377_v25 = vsub.f32 %v6781_v2, %v2221_v56  ;;  %2886 = vadd.xlane.f32.xlu0 %v7180_v14  ;;  %v5161_v45 = vpop.eup %5160 }
 0x3b0   :  { %5170 = vpow2.f32 %v2602_v28  ;;  %v2392_v5 = vsub.f32 %v6776_v50, %v2251_v38  ;;  %v3090_v2 = vmul.f32 %v5161_v45, %v7830_v34 }
 0x3b1   :  { %v7186_v52 = vpop.eup %5162  ;;  %v2604_v0 = vmul.f32 1.442695, %v2377_v25 }
 0x3b2   :  { %v2634_v13 = vmul.f32 1.442695, %v2392_v5  ;;  %v5165_v43 = vpop.eup %5164  ;;  %v2253_v58 = vpop.xlane.xlu1 %2252  ;;  %2888 = vadd.xlane.f32.xlu1 %v7186_v52 }
 0x3b3   :  { %v2755_v49 = vpop.xlane.xlu0 %2754  ;;  %v5167_v30 = vpop.eup %5166  ;;  %5172 = vpow2.f32 %v2604_v0  ;;  %v2393_v31 = vsub.f32 %v6794_v37, %v2253_v58  ;;  %v3091_v16 = vmul.f32 %v5165_v43, %v6737_v18 }
 0x3b4   :  { %5174 = vpow2.f32 %v2634_v13  ;;  %v3106_v28 = vmul.f32 %v5167_v30, %v6744_v40 }
 0x3b5   :  { %v5169_v50 = vpop.eup %5168  ;;  %v2636_v51 = vmul.f32 1.442695, %v2393_v31  ;;  %v4715_v6 = vpack.c.bf16 %v3091_v16, %v3090_v2  ;;  %5176 = vrcp.f32 %v2755_v49 }
 0x3b6   :  { %v2757_v53 = vpop.xlane.xlu1 %2756  ;;  %v3107_v56 = vmul.f32 %v5169_v50, %v6760_v11 }
 0x3b7   :  { %v2787_v44 = vpop.xlane.xlu0 %2786  ;;  %5178 = vpow2.f32 %v2636_v51  ;;  %4716 = vmatpush3.bf16.xpose.msra.mxu0 %v4715_v6 }
 0x3b8   :  { %5180 = vrcp.f32 %v2757_v53  ;;  %v4739_v38 = vpack.c.bf16 %v3107_v56, %v3106_v28  ;;  %4717 = vmatprep.subr.bf16.mxu0 %v7709_v62 }
 0x3b9   :  { %5182 = vrcp.f32 %v2787_v44 }
 0x3ba   :  { %v7195_v37 = vpop.eup %5170  ;;  %v2789_v18 = vpop.xlane.xlu1 %2788  ;;  %4740 = vmatpush3.bf16.xpose.msra.mxu1 %v4739_v38 }
 0x3bb   :  { %2858 = vadd.xlane.f32.xlu0 %v7195_v37  ;;  %v2223_v25 = vpop.xlane.xlu0 %2222  ;;  %5184 = vrcp.f32 %v2789_v18  ;;  %4741 = vmatprep.subr.bf16.mxu1 %v7709_v62 }
 0x3bc   :  { %v2378_v5 = vsub.f32 %v6821_v33, %v2223_v25 }
 0x3bd   :  { %v7200_v40 = vpop.eup %5172 }
 0x3be   :  { %v2606_v11 = vmul.f32 1.442695, %v2378_v5  ;;  %v7202_v45 = vpop.eup %5174  ;;  %v2225_v0 = vpop.xlane.xlu1 %2224  ;;  %2860 = vadd.xlane.f32.xlu1 %v7200_v40 }
 0x3bf   :  { %v2255_v13 = vpop.xlane.xlu0 %2254  ;;  %v2379_v43 = vsub.f32 %v6836_v47, %v2225_v0  ;;  %2890 = vadd.xlane.f32.xlu0 %v7202_v45  ;;  %v5177_v49 = vpop.eup %5176 }
 0x3c0   :  { %5186 = vpow2.f32 %v2606_v11  ;;  %v2394_v58 = vsub.f32 %v6831_v41, %v2255_v13  ;;  %v3092_v47 = vmul.f32 %v5177_v49, %v6788_v48 }
 0x3c1   :  { %v7208_v33 = vpop.eup %5178  ;;  %v2608_v30 = vmul.f32 1.442695, %v2379_v43 }
 0x3c2   :  { %v2638_v31 = vmul.f32 1.442695, %v2394_v58  ;;  %v5181_v34 = vpop.eup %5180  ;;  %v2257_v2 = vpop.xlane.xlu1 %2256  ;;  %2892 = vadd.xlane.f32.xlu1 %v7208_v33  ;;  %v85_v58 = vld [vmem:[#allocation7 + $0x18] sm:$0xff] }
 0x3c3   :  { %v2791_v16 = vpop.xlane.xlu0 %2790  ;;  %v5183_v50 = vpop.eup %5182  ;;  %5188 = vpow2.f32 %v2608_v30  ;;  %v2395_v51 = vsub.f32 %v6850_v4, %v2257_v2  ;;  %v3093_v6 = vmul.f32 %v5181_v34, %v6804_v59 }
 0x3c4   :  { %5190 = vpow2.f32 %v2638_v31  ;;  %v3108_v38 = vmul.f32 %v5183_v50, %v6807_v57  ;;  %v84_v57 = vld [vmem:[#allocation7 + $0x10] sm:$0xff] }
 0x3c5   :  { %v5185_v41 = vpop.eup %5184  ;;  %v2640_v53 = vmul.f32 1.442695, %v2395_v51  ;;  %v4718_v44 = vpack.c.bf16 %v3093_v6, %v3092_v47  ;;  %5192 = vrcp.f32 %v2791_v16 }
 0x3c6   :  { %v2793_v28 = vpop.xlane.xlu1 %2792  ;;  %v3109_v18 = vmul.f32 %v5185_v41, %v6816_v55 }
 0x3c7   :  { %v2823_v56 = vpop.xlane.xlu0 %2822  ;;  %5194 = vpow2.f32 %v2640_v53  ;;  %4719 = vmatpush3.bf16.xpose.msra.mxu0 %v4718_v44 }
 0x3c8   :  { %5196 = vrcp.f32 %v2793_v28  ;;  %v4742_v25 = vpack.c.bf16 %v3109_v18, %v3108_v38  ;;  %4744 = vmatprep.subr.bf16.mxu0 %v7709_v62 }
 0x3c9   :  { %5198 = vrcp.f32 %v2823_v56 }
 0x3ca   :  { %v7217_v48 = vpop.eup %5186  ;;  %v2825_v59 = vpop.xlane.xlu1 %2824  ;;  %4743 = vmatpush3.bf16.xpose.msra.mxu1 %v4742_v25 }
 0x3cb   :  { %2862 = vadd.xlane.f32.xlu0 %v7217_v48  ;;  %v2227_v4 = vpop.xlane.xlu0 %2226  ;;  %5200 = vrcp.f32 %v2825_v59  ;;  %4768 = vmatprep.subr.bf16.mxu1 %v7709_v62 }
 0x3cc   :  { %v2380_v5 = vsub.f32 %v6877_v29, %v2227_v4 }
 0x3cd   :  { %v7222_v55 = vpop.eup %5188 }
 0x3ce   :  { %v2610_v11 = vmul.f32 1.442695, %v2380_v5  ;;  %v7224_v0 = vpop.eup %5190  ;;  %v2229_v13 = vpop.xlane.xlu1 %2228  ;;  %2864 = vadd.xlane.f32.xlu1 %v7222_v55  ;;  %4471 = vmatmul.mubr.f32.vlgmr.msra.gmra.mrb[66].mxu0 %v84_v57 }
 0x3cf   :  { %v2259_v43 = vpop.xlane.xlu0 %2258  ;;  %v2381_v49 = vsub.f32 %v6892_v21, %v2229_v13  ;;  %2894 = vadd.xlane.f32.xlu0 %v7224_v0  ;;  %4540 = vmatprep.mubr.msk.f32.mxu0 %vm5469_vm2, %v7767_v36  ;;  %v5193_v30 = vpop.eup %5192 }
 0x3d0   :  { %5202 = vpow2.f32 %v2610_v11  ;;  %v2396_v29 = vsub.f32 %v6887_v22, %v2259_v43  ;;  %v3110_v47 = vmul.f32 %v5193_v30, %v6845_v46 }
 0x3d1   :  { %v7232_v31 = vpop.eup %5194  ;;  %v2612_v34 = vmul.f32 1.442695, %v2381_v49  ;;  %4506 = vmatmul.mubr.f32.vlgmr.msra.gmra.mrb[66].mxu1 %v85_v58 }
 0x3d2   :  { %v2642_v2 = vmul.f32 1.442695, %v2396_v29  ;;  %v5197_v16 = vpop.eup %5196  ;;  %v2261_v50 = vpop.xlane.xlu1 %2260  ;;  %2896 = vadd.xlane.f32.xlu1 %v7232_v31  ;;  %4575 = vmatprep.mubr.msk.f32.mxu1 %vm5469_vm2, %v7767_v36 }
 0x3d3   :  { %v2795_v51 = vpop.xlane.xlu0 %2794  ;;  %v5199_v21 = vpop.eup %5198  ;;  %5204 = vpow2.f32 %v2612_v34  ;;  %v2397_v22 = vsub.f32 %v6906_v17, %v2261_v50  ;;  %v3111_v6 = vmul.f32 %v5197_v16, %v6860_v23 }
 0x3d4   :  { %5206 = vpow2.f32 %v2642_v2  ;;  %v3126_v38 = vmul.f32 %v5199_v21, %v6863_v61 }
 0x3d5   :  { %v5201_v41 = vpop.eup %5200  ;;  %v2644_v53 = vmul.f32 1.442695, %v2397_v22  ;;  %v4745_v44 = vpack.c.bf16 %v3111_v6, %v3110_v47  ;;  %5208 = vrcp.f32 %v2795_v51  ;;  %v7831_v6 = vld [vmem:[#allocation38_spill] sm:$0xff] }
 0x3d6   :  { %v2797_v28 = vpop.xlane.xlu1 %2796  ;;  %v3127_v18 = vmul.f32 %v5201_v41, %v6872_v24 }
 0x3d7   :  { %v2827_v56 = vpop.xlane.xlu0 %2826  ;;  %5210 = vpow2.f32 %v2644_v53  ;;  %4746 = vmatpush3.bf16.xpose.msra.mxu0 %v4745_v44  ;;  %v7832_v53 = vld [vmem:[#allocation39_spill] sm:$0xff] }
 0x3d8   :  { %5212 = vrcp.f32 %v2797_v28  ;;  %v4769_v25 = vpack.c.bf16 %v3127_v18, %v3126_v38  ;;  %4747 = vmatprep.subr.bf16.mxu0 %v7709_v62 }
 0x3d9   :  { %5214 = vrcp.f32 %v2827_v56  ;;  %v7833_v56 = vld [vmem:[#allocation56_spill] sm:$0xff] }
 0x3da   :  { %v7243_v46 = vpop.eup %5202  ;;  %v2829_v23 = vpop.xlane.xlu1 %2828  ;;  %4770 = vmatpush3.bf16.xpose.msra.mxu1 %v4769_v25 }
 0x3db   :  { %2866 = vadd.xlane.f32.xlu0 %v7243_v46  ;;  %v2231_v17 = vpop.xlane.xlu0 %2230  ;;  %5216 = vrcp.f32 %v2829_v23  ;;  %4771 = vmatprep.subr.bf16.mxu1 %v7709_v62 }
 0x3dc   :  { %v2382_v59 = vsub.f32 %v6933_v8, %v2231_v17 }
 0x3dd   :  { %v7248_v61 = vpop.eup %5204 }
 0x3de   :  { %v2614_v24 = vmul.f32 1.442695, %v2382_v59  ;;  %v7250_v4 = vpop.eup %5206  ;;  %v2233_v5 = vpop.xlane.xlu1 %2232  ;;  %2868 = vadd.xlane.f32.xlu1 %v7248_v61 }
 0x3df   :  { %v2263_v57 = vpop.xlane.xlu0 %2262  ;;  %v2383_v11 = vsub.f32 %v6948_v27, %v2233_v5  ;;  %2898 = vadd.xlane.f32.xlu0 %v7250_v4  ;;  %v5209_v43 = vpop.eup %5208 }
 0x3e0   :  { %5218 = vpow2.f32 %v2614_v24  ;;  %v2398_v13 = vsub.f32 %v6943_v32, %v2263_v57  ;;  %v3112_v27 = vmul.f32 %v5209_v43, %v6901_v20  ;;  %v7834_v24 = vld [vmem:[#allocation59_spill] sm:$0xff] }
 0x3e1   :  { %v7256_v8 = vpop.eup %5210  ;;  %v2616_v58 = vmul.f32 1.442695, %v2383_v11  ;;  %v7835_v57 = vld [vmem:[#allocation43_spill] sm:$0xff] }
 0x3e2   :  { %v2646_v49 = vmul.f32 1.442695, %v2398_v13  ;;  %v5213_v29 = vpop.eup %5212  ;;  %v2265_v30 = vpop.xlane.xlu1 %2264  ;;  %2900 = vadd.xlane.f32.xlu1 %v7256_v8 }
 0x3e3   :  { %v2799_v34 = vpop.xlane.xlu0 %2798  ;;  %v5215_v2 = vpop.eup %5214  ;;  %5220 = vpow2.f32 %v2616_v58  ;;  %v2399_v16 = vsub.f32 %v6962_v60, %v2265_v30  ;;  %v3113_v50 = vmul.f32 %v5213_v29, %v6916_v19 }
 0x3e4   :  { %5222 = vpow2.f32 %v2646_v49  ;;  %v3128_v41 = vmul.f32 %v5215_v2, %v7831_v6 }
 0x3e5   :  { %v5217_v32 = vpop.eup %5216  ;;  %v2648_v51 = vmul.f32 1.442695, %v2399_v16  ;;  %v4748_v21 = vpack.c.bf16 %v3113_v50, %v3112_v27  ;;  %5224 = vrcp.f32 %v2799_v34  ;;  %v7836_v16 = vld [vmem:[#allocation60_spill] sm:$0xff] }
 0x3e6   :  { %v2801_v22 = vpop.xlane.xlu1 %2800  ;;  %v3129_v44 = vmul.f32 %v5217_v32, %v7832_v53  ;;  %v7837_v50 = vld [vmem:[#allocation40_spill] sm:$0xff] }
 0x3e7   :  { %v2831_v47 = vpop.xlane.xlu0 %2830  ;;  %5226 = vpow2.f32 %v2648_v51  ;;  %4749 = vmatpush3.bf16.xpose.msra.mxu0 %v4748_v21  ;;  %v7838_v51 = vld [vmem:[#allocation55_spill] sm:$0xff] }
 0x3e8   :  { %5228 = vrcp.f32 %v2801_v22  ;;  %v4772_v28 = vpack.c.bf16 %v3129_v44, %v3128_v41  ;;  %4750 = vmatprep.subr.bf16.mxu0 %v7709_v62  ;;  %v7839_v44 = vld [vmem:[#allocation41_spill] sm:$0xff] }
 0x3e9   :  { %5230 = vrcp.f32 %v2831_v47 }
 0x3ea   :  { %v7265_v20 = vpop.eup %5218  ;;  %v2833_v19 = vpop.xlane.xlu1 %2832  ;;  %4773 = vmatpush3.bf16.xpose.msra.mxu1 %v4772_v28 }
 0x3eb   :  { %2870 = vadd.xlane.f32.xlu0 %v7265_v20  ;;  %v2235_v60 = vpop.xlane.xlu0 %2234  ;;  %5232 = vrcp.f32 %v2833_v19  ;;  %4774 = vmatprep.subr.bf16.mxu1 %v7709_v62  ;;  %v7840_v19 = vld [vmem:[#allocation42_spill] sm:$0xff] }
 0x3ec   :  { %v2384_v38 = vsub.f32 %v7833_v56, %v2235_v60 }
 0x3ed   :  { %v7270_v18 = vpop.eup %5220 }
 0x3ee   :  { %v2618_v25 = vmul.f32 1.442695, %v2384_v38  ;;  %v7272_v23 = vpop.eup %5222  ;;  %v2237_v17 = vpop.xlane.xlu1 %2236  ;;  %2872 = vadd.xlane.f32.xlu1 %v7270_v18 }
 0x3ef   :  { %v2267_v59 = vpop.xlane.xlu0 %2266  ;;  %v2385_v5 = vsub.f32 %v7834_v24, %v2237_v17  ;;  %2902 = vadd.xlane.f32.xlu0 %v7272_v23  ;;  %v5225_v13 = vpop.eup %5224 }
 0x3f0   :  { %5234 = vpow2.f32 %v2618_v25  ;;  %v2400_v11 = vsub.f32 %v7835_v57, %v2267_v59  ;;  %v3114_v32 = vmul.f32 %v5225_v13, %v7837_v50  ;;  %v7841_v59 = vld [vmem:[#allocation58_spill] sm:$0xff] }
 0x3f1   :  { %v7278_v43 = vpop.eup %5226  ;;  %v2620_v58 = vmul.f32 1.442695, %v2385_v5 }
 0x3f2   :  { %v2650_v49 = vmul.f32 1.442695, %v2400_v11  ;;  %v5229_v29 = vpop.eup %5228  ;;  %v2269_v30 = vpop.xlane.xlu1 %2268  ;;  %2904 = vadd.xlane.f32.xlu1 %v7278_v43 }
 0x3f3   :  { %v2803_v34 = vpop.xlane.xlu0 %2802  ;;  %v5231_v2 = vpop.eup %5230  ;;  %5236 = vpow2.f32 %v2620_v58  ;;  %v2401_v27 = vsub.f32 %v7836_v16, %v2269_v30  ;;  %v3115_v21 = vmul.f32 %v5229_v29, %v7838_v51  ;;  %v7843_v30 = vld [vmem:[#allocation45_spill] sm:$0xff] }
 0x3f4   :  { %5238 = vpow2.f32 %v2650_v49  ;;  %v3130_v28 = vmul.f32 %v5231_v2, %v7839_v44  ;;  %v7842_v49 = vld [vmem:[#allocation46_spill] sm:$0xff] }
 0x3f5   :  { %v5233_v22 = vpop.eup %5232  ;;  %v2652_v47 = vmul.f32 1.442695, %v2401_v27  ;;  %v4751_v6 = vpack.c.bf16 %v3115_v21, %v3114_v32  ;;  %5240 = vrcp.f32 %v2803_v34 }
 0x3f6   :  { %v2805_v41 = vpop.xlane.xlu1 %2804  ;;  %v3131_v60 = vmul.f32 %v5233_v22, %v7840_v19 }
 0x3f7   :  { %v2835_v53 = vpop.xlane.xlu0 %2834  ;;  %5242 = vpow2.f32 %v2652_v47  ;;  %4752 = vmatpush3.bf16.xpose.msra.mxu0 %v4751_v6  ;;  %v7844_v6 = vld [vmem:[#allocation57_spill] sm:$0xff] }
 0x3f8   :  { %5244 = vrcp.f32 %v2805_v41  ;;  %v4775_v56 = vpack.c.bf16 %v3131_v60, %v3130_v28  ;;  %4753 = vmatprep.subr.bf16.mxu0 %v7709_v62 }
 0x3f9   :  { %5246 = vrcp.f32 %v2835_v53  ;;  %v7845_v53 = vld [vmem:[#allocation44_spill] sm:$0xff] }
 0x3fa   :  { %v7287_v38 = vpop.eup %5234  ;;  %v2837_v25 = vpop.xlane.xlu1 %2836  ;;  %4776 = vmatpush3.bf16.xpose.msra.mxu1 %v4775_v56 }
 0x3fb   :  { %2874 = vadd.xlane.f32.xlu0 %v7287_v38  ;;  %v2239_v17 = vpop.xlane.xlu0 %2238  ;;  %5248 = vrcp.f32 %v2837_v25  ;;  %4777 = vmatprep.subr.bf16.mxu1 %v7709_v62 }
 0x3fc   :  { %v2386_v24 = vsub.f32 %v7841_v59, %v2239_v17  ;;  %v7846_v17 = vld [vmem:[#allocation62_spill] sm:$0xff] }
 0x3fd   :  { %v7292_v5 = vpop.eup %5236 }
 0x3fe   :  { %v2622_v57 = vmul.f32 1.442695, %v2386_v24  ;;  %v7294_v11 = vpop.eup %5238  ;;  %v2241_v13 = vpop.xlane.xlu1 %2240  ;;  %2876 = vadd.xlane.f32.xlu1 %v7292_v5  ;;  %v7847_v24 = vld [vmem:[#allocation61_spill] sm:$0xff] }
 0x3ff   :  { %v2271_v58 = vpop.xlane.xlu0 %2270  ;;  %v2387_v29 = vsub.f32 %v7842_v49, %v2241_v13  ;;  %2906 = vadd.xlane.f32.xlu0 %v7294_v11  ;;  %v5241_v2 = vpop.eup %5240 }
 0x400   :  { %5250 = vpow2.f32 %v2622_v57  ;;  %v2402_v34 = vsub.f32 %v7843_v30, %v2271_v58  ;;  %v3116_v41 = vmul.f32 %v5241_v2, %v7844_v6 }
 0x401   :  { %v7300_v16 = vpop.eup %5242  ;;  %v2624_v27 = vmul.f32 1.442695, %v2387_v29 }
 0x402   :  { %v2654_v50 = vmul.f32 1.442695, %v2402_v34  ;;  %v5245_v32 = vpop.eup %5244  ;;  %v2273_v51 = vpop.xlane.xlu1 %2272  ;;  %2908 = vadd.xlane.f32.xlu1 %v7300_v16 }
 0x403   :  { %v2807_v21 = vpop.xlane.xlu0 %2806  ;;  %v5247_v22 = vpop.eup %5246  ;;  %5252 = vpow2.f32 %v2624_v27  ;;  %v2403_v47 = vsub.f32 %v7064_v54, %v2273_v51  ;;  %v3117_v44 = vmul.f32 %v5245_v32, %v7845_v53 }
 0x404   :  { %5254 = vpow2.f32 %v2654_v50  ;;  %v3132_v59 = vmul.f32 %v5247_v22, %v7846_v17 }
 0x405   :  { %v5249_v28 = vpop.eup %5248  ;;  %v2656_v19 = vmul.f32 1.442695, %v2403_v47  ;;  %v4754_v60 = vpack.c.bf16 %v3117_v44, %v3116_v41  ;;  %5256 = vrcp.f32 %v2807_v21 }
 0x406   :  { %v2809_v56 = vpop.xlane.xlu1 %2808  ;;  %v3133_v57 = vmul.f32 %v5249_v28, %v7847_v24  ;;  %v7849_v24 = vld [vmem:[#allocation65_spill] sm:$0xff] }
 0x407   :  { %v2839_v25 = vpop.xlane.xlu0 %2838  ;;  %5258 = vpow2.f32 %v2656_v19  ;;  %4755 = vmatpush3.bf16.xpose.msra.mxu0 %v4754_v60  ;;  %v7848_v19 = vld [vmem:[#allocation47_spill] sm:$0xff] }
 0x408   :  { %5260 = vrcp.f32 %v2809_v56  ;;  %v4778_v13 = vpack.c.bf16 %v3133_v57, %v3132_v59  ;;  %4756 = vmatprep.subr.bf16.mxu0 %v7709_v62 }
 0x409   :  { %5262 = vrcp.f32 %v2839_v25 }
 0x40a   :  { %v7309_v54 = vpop.eup %5250  ;;  %v2841_v58 = vpop.xlane.xlu1 %2840  ;;  %4779 = vmatpush3.bf16.xpose.msra.mxu1 %v4778_v13  ;;  %v7850_v13 = vld [vmem:[#allocation70_spill] sm:$0xff] }
 0x40b   :  { %2878 = vadd.xlane.f32.xlu0 %v7309_v54  ;;  %v2243_v49 = vpop.xlane.xlu0 %2242  ;;  %5264 = vrcp.f32 %v2841_v58  ;;  %4780 = vmatprep.subr.bf16.mxu1 %v7709_v62 }
 0x40c   :  { %v2388_v29 = vsub.f32 %v7087_v35, %v2243_v49 }
 0x40d   :  { %v7314_v30 = vpop.eup %5252 }
 0x40e   :  { %v2626_v34 = vmul.f32 1.442695, %v2388_v29  ;;  %v7316_v2 = vpop.eup %5254  ;;  %2880 = vadd.xlane.f32.xlu1 %v7314_v30  ;;  %v2245_v27 = vpop.xlane.xlu1 %2244 }
 0x40f   :  { %v2275_v50 = vpop.xlane.xlu0 %2274  ;;  %v2389_v32 = vsub.f32 %v7101_v26, %v2245_v27  ;;  %2910 = vadd.xlane.f32.xlu0 %v7316_v2  ;;  %v5257_v21 = vpop.eup %5256 }
 0x410   :  { %5266 = vpow2.f32 %v2626_v34  ;;  %v2404_v51 = vsub.f32 %v7096_v12, %v2275_v50  ;;  %v3118_v26 = vmul.f32 %v5257_v21, %v7059_v7 }
 0x411   :  { %v7322_v35 = vpop.eup %5258  ;;  %v2628_v22 = vmul.f32 1.442695, %v2389_v32 }
 0x412   :  { %v2658_v47 = vmul.f32 1.442695, %v2404_v51  ;;  %v5261_v6 = vpop.eup %5260  ;;  %2912 = vadd.xlane.f32.xlu1 %v7322_v35  ;;  %v2277_v41 = vpop.xlane.xlu1 %2276 }
 0x413   :  { %v2811_v53 = vpop.xlane.xlu0 %2810  ;;  %v5263_v44 = vpop.eup %5262  ;;  %5268 = vpow2.f32 %v2628_v22  ;;  %v2405_v28 = vsub.f32 %v7113_v3, %v2277_v41  ;;  %v3119_v60 = vmul.f32 %v5261_v6, %v7848_v19  ;;  %v7851_v19 = vld [vmem:[#allocation71_spill] sm:$0xff] }
 0x414   :  { %5270 = vpow2.f32 %v2658_v47  ;;  %v3134_v57 = vmul.f32 %v5263_v44, %v7849_v24 }
 0x415   :  { %v5265_v12 = vpop.eup %5264  ;;  %v2660_v56 = vmul.f32 1.442695, %v2405_v28  ;;  %v4757_v25 = vpack.c.bf16 %v3119_v60, %v3118_v26  ;;  %5272 = vrcp.f32 %v2811_v53 }
 0x416   :  { %v2813_v17 = vpop.xlane.xlu1 %2812  ;;  %v3135_v58 = vmul.f32 %v5265_v12, %v7850_v13 }
 0x417   :  { %v2843_v59 = vpop.xlane.xlu0 %2842  ;;  %5274 = vpow2.f32 %v2660_v56  ;;  %4758 = vmatpush3.bf16.xpose.msra.mxu0 %v4757_v25 }
 0x418   :  { %5276 = vrcp.f32 %v2813_v17  ;;  %v4781_v49 = vpack.c.bf16 %v3135_v58, %v3134_v57  ;;  %4759 = vmatprep.subr.bf16.mxu0 %v7709_v62 }
 0x419   :  { %5278 = vrcp.f32 %v2843_v59  ;;  %v7852_v59 = vld [vmem:[#allocation69_spill] sm:$0xff] }
 0x41a   :  { %v7331_v7 = vpop.eup %5266  ;;  %v2845_v3 = vpop.xlane.xlu1 %2844  ;;  %4782 = vmatpush3.bf16.xpose.msra.mxu1 %v4781_v49 }
 0x41b   :  { %2882 = vadd.xlane.f32.xlu0 %v7331_v7  ;;  %v2815_v29 = vpop.xlane.xlu0 %2814  ;;  %5280 = vrcp.f32 %v2845_v3  ;;  %4783 = vmatprep.subr.bf16.mxu1 %v7709_v62  ;;  %v7854_v3 = vld [vmem:[#allocation66_spill] sm:$0xff] }
 0x41c   :  { %5282 = vrcp.f32 %v2815_v29 }
 0x41d   :  { %v7335_v34 = vpop.eup %5268 }
 0x41e   :  { %v7337_v27 = vpop.eup %5270  ;;  %2884 = vadd.xlane.f32.xlu1 %v7335_v34  ;;  %v2817_v50 = vpop.xlane.xlu1 %2816 }
 0x41f   :  { %v2847_v32 = vpop.xlane.xlu0 %2846  ;;  %5284 = vrcp.f32 %v2817_v50  ;;  %2914 = vadd.xlane.f32.xlu0 %v7337_v27  ;;  %v5273_v51 = vpop.eup %5272 }
 0x420   :  { %5286 = vrcp.f32 %v2847_v32  ;;  %v3120_v41 = vmul.f32 %v5273_v51, %v7108_v15  ;;  %v7853_v15 = vld [vmem:[#allocation64_spill] sm:$0xff] }
 0x421   :  { %v7341_v21 = vpop.eup %5274 }
 0x422   :  { %v5277_v22 = vpop.eup %5276  ;;  %2916 = vadd.xlane.f32.xlu1 %v7341_v21  ;;  %v2849_v47 = vpop.xlane.xlu1 %2848 }
 0x423   :  { %v5279_v6 = vpop.eup %5278  ;;  %5288 = vrcp.f32 %v2849_v47  ;;  %v3121_v53 = vmul.f32 %v5277_v22, %v7119_v10 }
 0x424   :  { %v3136_v26 = vmul.f32 %v5279_v6, %v7121_v1 }
 0x425   :  { %v5281_v44 = vpop.eup %5280  ;;  %v4760_v28 = vpack.c.bf16 %v3121_v53, %v3120_v41  ;;  %v7855_v53 = vld [vmem:[#allocation48_spill] sm:$0xff] }
 0x426   :  { %v3137_v60 = vmul.f32 %v5281_v44, %v7851_v19  ;;  %v5283_v12 = vpop.eup %5282 }
 0x427   :  { %4761 = vmatpush3.bf16.xpose.msra.mxu0 %v4760_v28  ;;  %v3122_v24 = vmul.f32 %v5283_v12, %v7852_v59 }
 0x428   :  { %v2819_v56 = vpop.xlane.xlu0 %2818  ;;  %v4784_v25 = vpack.c.bf16 %v3137_v60, %v3136_v26  ;;  %4762 = vmatprep.subr.bf16.mxu0 %v7709_v62  ;;  %v7856_v60 = vld [vmem:[#allocation73_spill] sm:$0xff] }
 0x429   :  { %v5285_v17 = vpop.eup %5284  ;;  %5290 = vrcp.f32 %v2819_v56  ;;  %v7857_v56 = vld [vmem:[#allocation72_spill] sm:$0xff] }
 0x42a   :  { %4785 = vmatpush3.bf16.xpose.msra.mxu1 %v4784_v25  ;;  %v3123_v57 = vmul.f32 %v5285_v17, %v7853_v15  ;;  %v5287_v10 = vpop.eup %5286  ;;  %v87_v15 = vld [vmem:[#allocation7 + $0x28] sm:$0xff] }
 0x42b   :  { %v2821_v13 = vpop.xlane.xlu1 %2820  ;;  %4786 = vmatprep.subr.bf16.mxu1 %v7709_v62  ;;  %v3138_v29 = vmul.f32 %v5287_v10, %v7854_v3 }
 0x42c   :  { %5292 = vrcp.f32 %v2821_v13  ;;  %v2851_v1 = vpop.xlane.xlu0 %2850  ;;  %v4763_v58 = vpack.c.bf16 %v3123_v57, %v3122_v24 }
 0x42d   :  { %v5289_v49 = vpop.eup %5288  ;;  %5294 = vrcp.f32 %v2851_v1  ;;  %v3240_v13 = vpop.f32.mrb[64].mxu0 }
 0x42e   :  { %v3139_v50 = vmul.f32 %v5289_v49, %v7145_v9  ;;  %3734 = vst [vmem:[#allocation8] sm:$0xff] %v3240_v13 }
 0x42f   :  { %4764 = vmatpush3.bf16.xpose.msra.mxu0 %v4763_v58  ;;  %v2853_v32 = vpop.xlane.xlu1 %2852 }
 0x430   :  { %5296 = vrcp.f32 %v2853_v32  ;;  %v4787_v51 = vpack.c.bf16 %v3139_v50, %v3138_v29  ;;  %4765 = vmatprep.subr.bf16.mxu0 %v7709_v62  ;;  %v4402_v29 = vpop.f32.mrb[65].mxu0 }
 0x431   :  { %v3310_v1 = vpop.f32.mrb[64].mxu1 }
 0x432   :  { %4788 = vmatpush3.bf16.xpose.msra.mxu1 %v4787_v51  ;;  %3735 = vst [vmem:[#allocation8 + $0x8] sm:$0xff] %v3310_v1  ;;  %v4437_v32 = vpop.f32.mrb[65].mxu1 }
 0x433   :  { %4789 = vmatprep.subr.bf16.mxu1 %v7709_v62  ;;  %v5291_v22 = vpop.eup %5290 }
 0x434   :  { %v3124_v41 = vmul.f32 %v5291_v22, %v7151_v63  ;;  %v86_v63 = vld [vmem:[#allocation7 + $0x20] sm:$0xff] }
 0x436   :  { %v5293_v47 = vpop.eup %5292 }
 0x437   :  { %v3125_v44 = vmul.f32 %v5293_v47, %v7855_v53  ;;  %v5295_v28 = vpop.eup %5294 }
 0x438   :  { %v2855_v6 = vpop.xlane.xlu0 %2854  ;;  %v3140_v12 = vmul.f32 %v5295_v28, %v7856_v60 }
 0x439   :  { %v4766_v26 = vpack.c.bf16 %v3125_v44, %v3124_v41  ;;  %5298 = vrcp.f32 %v2855_v6 }
 0x43a   :  { %v5297_v19 = vpop.eup %5296 }
 0x43b   :  { %v2857_v9 = vpop.xlane.xlu1 %2856  ;;  %4767 = vmatpush3.bf16.xpose.msra.mxu0 %v4766_v26  ;;  %v3141_v25 = vmul.f32 %v5297_v19, %v7857_v56 }
 0x43c   :  { %5300 = vrcp.f32 %v2857_v9  ;;  %v2887_v17 = vpop.xlane.xlu0 %2886  ;;  %4792 = vmatprep.subr.bf16.mxu0 %v7709_v62 }
 0x43d   :  { %v4790_v59 = vpack.c.bf16 %v3141_v25, %v3140_v12  ;;  %5302 = vrcp.f32 %v2887_v17 }
 0x43f   :  { %v2889_v24 = vpop.xlane.xlu1 %2888  ;;  %4791 = vmatpush3.bf16.xpose.msra.mxu1 %v4790_v59 }
 0x440   :  { %5304 = vrcp.f32 %v2889_v24  ;;  %4816 = vmatprep.subr.bf16.mxu1 %v7709_v62 }
 0x442   :  { %4541 = vmatmul.mubr.f32.vlgmr.msra.gmra.mrb[68].mxu0 %v86_v63 }
 0x443   :  { %4610 = vmatprep.mubr.msk.f32.mxu0 %vm5469_vm2, %v7767_v36  ;;  %v5299_v57 = vpop.eup %5298 }
 0x444   :  { %v3142_v49 = vmul.f32 %v5299_v57, %v7173_v42 }
 0x446   :  { %v5301_v10 = vpop.eup %5300  ;;  %4576 = vmatmul.mubr.f32.vlgmr.msra.gmra.mrb[68].mxu1 %v87_v15 }
 0x447   :  { %v3143_v3 = vmul.f32 %v5301_v10, %v7178_v39  ;;  %4645 = vmatprep.mubr.msk.f32.mxu1 %vm5469_vm2, %v7767_v36  ;;  %v5303_v50 = vpop.eup %5302 }
 0x448   :  { %v2859_v58 = vpop.xlane.xlu0 %2858  ;;  %v3158_v6 = vmul.f32 %v5303_v50, %v7180_v14 }
 0x449   :  { %v4793_v51 = vpack.c.bf16 %v3143_v3, %v3142_v49  ;;  %5306 = vrcp.f32 %v2859_v58 }
 0x44a   :  { %v5305_v22 = vpop.eup %5304 }
 0x44b   :  { %v2861_v47 = vpop.xlane.xlu1 %2860  ;;  %4794 = vmatpush3.bf16.xpose.msra.mxu0 %v4793_v51  ;;  %v3159_v41 = vmul.f32 %v5305_v22, %v7186_v52 }
 0x44c   :  { %5308 = vrcp.f32 %v2861_v47  ;;  %v2891_v42 = vpop.xlane.xlu0 %2890  ;;  %4795 = vmatprep.subr.bf16.mxu0 %v7709_v62 }
 0x44d   :  { %v4817_v39 = vpack.c.bf16 %v3159_v41, %v3158_v6  ;;  %5310 = vrcp.f32 %v2891_v42 }
 0x44f   :  { %v2893_v36 = vpop.xlane.xlu1 %2892  ;;  %4818 = vmatpush3.bf16.xpose.msra.mxu1 %v4817_v39 }
 0x450   :  { %5312 = vrcp.f32 %v2893_v36  ;;  %4819 = vmatprep.subr.bf16.mxu1 %v7709_v62 }
 0x453   :  { %v5307_v53 = vpop.eup %5306 }
 0x454   :  { %v3144_v26 = vmul.f32 %v5307_v53, %v7195_v37 }
 0x456   :  { %v5309_v44 = vpop.eup %5308 }
 0x457   :  { %v3145_v14 = vmul.f32 %v5309_v44, %v7200_v40  ;;  %v5311_v19 = vpop.eup %5310 }
 0x458   :  { %v2863_v28 = vpop.xlane.xlu0 %2862  ;;  %v3160_v12 = vmul.f32 %v5311_v19, %v7202_v45 }
 0x459   :  { %v4796_v52 = vpack.c.bf16 %v3145_v14, %v3144_v26  ;;  %5314 = vrcp.f32 %v2863_v28 }
 0x45a   :  { %v5313_v9 = vpop.eup %5312 }
 0x45b   :  { %v2865_v60 = vpop.xlane.xlu1 %2864  ;;  %4797 = vmatpush3.bf16.xpose.msra.mxu0 %v4796_v52  ;;  %v3161_v56 = vmul.f32 %v5313_v9, %v7208_v33 }
 0x45c   :  { %5316 = vrcp.f32 %v2865_v60  ;;  %v2895_v25 = vpop.xlane.xlu0 %2894  ;;  %4798 = vmatprep.subr.bf16.mxu0 %v7709_v62 }
 0x45d   :  { %v4820_v17 = vpack.c.bf16 %v3161_v56, %v3160_v12  ;;  %5318 = vrcp.f32 %v2895_v25 }
 0x45f   :  { %v2897_v59 = vpop.xlane.xlu1 %2896  ;;  %4821 = vmatpush3.bf16.xpose.msra.mxu1 %v4820_v17 }
 0x460   :  { %5320 = vrcp.f32 %v2897_v59  ;;  %4822 = vmatprep.subr.bf16.mxu1 %v7709_v62 }
 0x463   :  { %v5315_v37 = vpop.eup %5314 }
 0x464   :  { %v3146_v63 = vmul.f32 %v5315_v37, %v7217_v48 }
 0x466   :  { %v5317_v40 = vpop.eup %5316 }
 0x467   :  { %v3147_v45 = vmul.f32 %v5317_v40, %v7222_v55  ;;  %v5319_v15 = vpop.eup %5318 }
 0x468   :  { %v2867_v24 = vpop.xlane.xlu0 %2866  ;;  %v3162_v13 = vmul.f32 %v5319_v15, %v7224_v0 }
 0x469   :  { %v4799_v33 = vpack.c.bf16 %v3147_v45, %v3146_v63  ;;  %5322 = vrcp.f32 %v2867_v24 }
 0x46a   :  { %v5321_v57 = vpop.eup %5320 }
 0x46b   :  { %v2869_v10 = vpop.xlane.xlu1 %2868  ;;  %4800 = vmatpush3.bf16.xpose.msra.mxu0 %v4799_v33  ;;  %v3163_v1 = vmul.f32 %v5321_v57, %v7232_v31 }
 0x46c   :  { %5324 = vrcp.f32 %v2869_v10  ;;  %v2899_v58 = vpop.xlane.xlu0 %2898  ;;  %4801 = vmatprep.subr.bf16.mxu0 %v7709_v62 }
 0x46d   :  { %v4823_v49 = vpack.c.bf16 %v3163_v1, %v3162_v13  ;;  %5326 = vrcp.f32 %v2899_v58 }
 0x46f   :  { %v2901_v3 = vpop.xlane.xlu1 %2900  ;;  %4824 = vmatpush3.bf16.xpose.msra.mxu1 %v4823_v49 }
 0x470   :  { %5328 = vrcp.f32 %v2901_v3  ;;  %4825 = vmatprep.subr.bf16.mxu1 %v7709_v62 }
 0x473   :  { %v5323_v48 = vpop.eup %5322 }
 0x474   :  { %v3148_v50 = vmul.f32 %v5323_v48, %v7243_v46 }
 0x476   :  { %v5325_v55 = vpop.eup %5324 }
 0x477   :  { %v3149_v0 = vmul.f32 %v5325_v55, %v7248_v61  ;;  %v5327_v32 = vpop.eup %5326 }
 0x478   :  { %v2871_v29 = vpop.xlane.xlu0 %2870  ;;  %v3164_v47 = vmul.f32 %v5327_v32, %v7250_v4 }
 0x479   :  { %v4802_v31 = vpack.c.bf16 %v3149_v0, %v3148_v50  ;;  %5330 = vrcp.f32 %v2871_v29 }
 0x47a   :  { %v5329_v51 = vpop.eup %5328 }
 0x47b   :  { %v2873_v22 = vpop.xlane.xlu1 %2872  ;;  %4803 = vmatpush3.bf16.xpose.msra.mxu0 %v4802_v31  ;;  %v3165_v6 = vmul.f32 %v5329_v51, %v7256_v8 }
 0x47c   :  { %5332 = vrcp.f32 %v2873_v22  ;;  %v2903_v41 = vpop.xlane.xlu0 %2902  ;;  %4804 = vmatprep.subr.bf16.mxu0 %v7709_v62 }
 0x47d   :  { %v4826_v42 = vpack.c.bf16 %v3165_v6, %v3164_v47  ;;  %5334 = vrcp.f32 %v2903_v41  ;;  %v88_v41 = vld [vmem:[#allocation7 + $0x30] sm:$0xff] }
 0x47f   :  { %v2905_v39 = vpop.xlane.xlu1 %2904  ;;  %4827 = vmatpush3.bf16.xpose.msra.mxu1 %v4826_v42  ;;  %v89_v42 = vld [vmem:[#allocation7 + $0x38] sm:$0xff] }
 0x480   :  { %5336 = vrcp.f32 %v2905_v39  ;;  %4828 = vmatprep.subr.bf16.mxu1 %v7709_v62 }
 0x483   :  { %v5331_v46 = vpop.eup %5330 }
 0x484   :  { %v3150_v53 = vmul.f32 %v5331_v46, %v7265_v20 }
 0x486   :  { %v5333_v61 = vpop.eup %5332 }
 0x487   :  { %v3151_v4 = vmul.f32 %v5333_v61, %v7270_v18  ;;  %v5335_v44 = vpop.eup %5334 }
 0x488   :  { %v2875_v36 = vpop.xlane.xlu0 %2874  ;;  %v3166_v14 = vmul.f32 %v5335_v44, %v7272_v23 }
 0x489   :  { %v4805_v8 = vpack.c.bf16 %v3151_v4, %v3150_v53  ;;  %5338 = vrcp.f32 %v2875_v36 }
 0x48a   :  { %v5337_v28 = vpop.eup %5336 }
 0x48b   :  { %v2877_v26 = vpop.xlane.xlu1 %2876  ;;  %4806 = vmatpush3.bf16.xpose.msra.mxu0 %v4805_v8  ;;  %v3167_v19 = vmul.f32 %v5337_v28, %v7278_v43 }
 0x48c   :  { %5340 = vrcp.f32 %v2877_v26  ;;  %v2907_v52 = vpop.xlane.xlu0 %2906  ;;  %4807 = vmatprep.subr.bf16.mxu0 %v7709_v62 }
 0x48d   :  { %v4829_v9 = vpack.c.bf16 %v3167_v19, %v3166_v14  ;;  %5342 = vrcp.f32 %v2907_v52 }
 0x48f   :  { %v2909_v60 = vpop.xlane.xlu1 %2908  ;;  %4830 = vmatpush3.bf16.xpose.msra.mxu1 %v4829_v9 }
 0x490   :  { %5344 = vrcp.f32 %v2909_v60  ;;  %4831 = vmatprep.subr.bf16.mxu1 %v7709_v62 }
 0x493   :  { %v5339_v20 = vpop.eup %5338 }
 0x494   :  { %v3152_v56 = vmul.f32 %v5339_v20, %v7287_v38 }
 0x496   :  { %v5341_v18 = vpop.eup %5340 }
 0x497   :  { %v3153_v23 = vmul.f32 %v5341_v18, %v7292_v5  ;;  %v5343_v25 = vpop.eup %5342 }
 0x498   :  { %v2879_v12 = vpop.xlane.xlu0 %2878  ;;  %v3168_v37 = vmul.f32 %v5343_v25, %v7294_v11 }
 0x499   :  { %v4808_v43 = vpack.c.bf16 %v3153_v23, %v3152_v56  ;;  %5346 = vrcp.f32 %v2879_v12 }
 0x49a   :  { %v5345_v17 = vpop.eup %5344 }
 0x49b   :  { %v2881_v59 = vpop.xlane.xlu1 %2880  ;;  %4809 = vmatpush3.bf16.xpose.msra.mxu0 %v4808_v43  ;;  %v3169_v40 = vmul.f32 %v5345_v17, %v7300_v16 }
 0x49c   :  { %5348 = vrcp.f32 %v2881_v59  ;;  %v2911_v24 = vpop.xlane.xlu0 %2910  ;;  %4810 = vmatprep.subr.bf16.mxu0 %v7709_v62 }
 0x49d   :  { %v4832_v63 = vpack.c.bf16 %v3169_v40, %v3168_v37  ;;  %5350 = vrcp.f32 %v2911_v24 }
 0x49f   :  { %v2913_v45 = vpop.xlane.xlu1 %2912  ;;  %4833 = vmatpush3.bf16.xpose.msra.mxu1 %v4832_v63 }
 0x4a0   :  { %5352 = vrcp.f32 %v2913_v45  ;;  %4834 = vmatprep.subr.bf16.mxu1 %v7709_v62 }
 0x4a1   :  { %v3380_v38 = vpop.f32.mrb[66].mxu0 }
 0x4a2   :  { %3736 = vst [vmem:[#allocation8 + $0x10] sm:$0xff] %v3380_v38  ;;  %v4472_v5 = vpop.f32.mrb[67].mxu0 }
 0x4a3   :  { %v5347_v15 = vpop.eup %5346 }
 0x4a4   :  { %v3450_v33 = vpop.f32.mrb[66].mxu1  ;;  %v3154_v10 = vmul.f32 %v5347_v15, %v7309_v54 }
 0x4a5   :  { %3737 = vst [vmem:[#allocation8 + $0x18] sm:$0xff] %v3450_v33  ;;  %v4507_v11 = vpop.f32.mrb[67].mxu1 }
 0x4a6   :  { %v5349_v57 = vpop.eup %5348 }
 0x4a7   :  { %v3155_v13 = vmul.f32 %v5349_v57, %v7314_v30  ;;  %v5351_v1 = vpop.eup %5350 }
 0x4a8   :  { %v2883_v16 = vpop.xlane.xlu0 %2882  ;;  %v3170_v48 = vmul.f32 %v5351_v1, %v7316_v2 }
 0x4a9   :  { %v4811_v58 = vpack.c.bf16 %v3155_v13, %v3154_v10  ;;  %5354 = vrcp.f32 %v2883_v16 }
 0x4aa   :  { %v5353_v49 = vpop.eup %5352 }
 0x4ab   :  { %v2885_v3 = vpop.xlane.xlu1 %2884  ;;  %4812 = vmatpush3.bf16.xpose.msra.mxu0 %v4811_v58  ;;  %v3171_v55 = vmul.f32 %v5353_v49, %v7322_v35 }
 0x4ac   :  { %5356 = vrcp.f32 %v2885_v3  ;;  %v2915_v29 = vpop.xlane.xlu0 %2914  ;;  %4813 = vmatprep.subr.bf16.mxu0 %v7709_v62 }
 0x4ad   :  { %v4835_v50 = vpack.c.bf16 %v3171_v55, %v3170_v48  ;;  %5358 = vrcp.f32 %v2915_v29 }
 0x4af   :  { %v2917_v0 = vpop.xlane.xlu1 %2916  ;;  %4836 = vmatpush3.bf16.xpose.msra.mxu1 %v4835_v50 }
 0x4b0   :  { %5360 = vrcp.f32 %v2917_v0  ;;  %4837 = vmatprep.subr.bf16.mxu1 %v7709_v62 }
 0x4b3   :  { %v5355_v54 = vpop.eup %5354 }
 0x4b4   :  { %v3156_v32 = vmul.f32 %v5355_v54, %v7331_v7 }
 0x4b6   :  { %v5357_v30 = vpop.eup %5356 }
 0x4b7   :  { %v3157_v31 = vmul.f32 %v5357_v30, %v7335_v34  ;;  %v5359_v2 = vpop.eup %5358 }
 0x4b8   :  { %v3172_v22 = vmul.f32 %v5359_v2, %v7337_v27 }
 0x4b9   :  { %v4814_v51 = vpack.c.bf16 %v3157_v31, %v3156_v32 }
 0x4ba   :  { %v5361_v35 = vpop.eup %5360 }
 0x4bb   :  { %4815 = vmatpush3.bf16.xpose.msra.mxu0 %v4814_v51  ;;  %v3173_v47 = vmul.f32 %v5361_v35, %v7341_v21 }
 0x4bd   :  { %v4838_v6 = vpack.c.bf16 %v3173_v47, %v3172_v22 }
 0x4bf   :  { %4839 = vmatpush3.bf16.xpose.msra.mxu1 %v4838_v6 }
 0x4c2   :  { %4611 = vmatmul.mubr.f32.vlgmr.msra.gmra.mrb[70].mxu0 %v88_v41 }
 0x4c6   :  { %4646 = vmatmul.mubr.f32.vlgmr.msra.gmra.mrb[70].mxu1 %v89_v42 }
 0x515   :  { %v3520_v62 = vpop.f32.mrb[68].mxu0 }
 0x516   :  { %3738 = vst [vmem:[#allocation8 + $0x20] sm:$0xff] %v3520_v62  ;;  %v4542_v39 = vpop.f32.mrb[69].mxu0 }
 0x519   :  { %v3590_v7 = vpop.f32.mrb[68].mxu1 }
 0x51a   :  { %3739 = vst [vmem:[#allocation8 + $0x28] sm:$0xff] %v3590_v7  ;;  %v4577_v34 = vpop.f32.mrb[69].mxu1 }
 0x595   :  { %v3660_v46 = vpop.f32.mrb[70].mxu0 }
 0x596   :  { %3740 = vst [vmem:[#allocation8 + $0x30] sm:$0xff] %v3660_v46  ;;  %v4612_v61 = vpop.f32.mrb[71].mxu0 }
 0x599   :  { %v3730_v27 = vpop.f32.mrb[70].mxu1 }
 0x59a   :  { %3741 = vst [vmem:[#allocation8 + $0x38] sm:$0xff] %v3730_v27  ;;  %v4647_v21 = vpop.f32.mrb[71].mxu1 }
 0x59b   :  { %5445 = shalt.err (!%p5442_p10)
}
 0x59c   :  { %s5446_s7 = scalar_lea.hbm %s7430_s3, 1024 }
 0x59d   :  { %p5447_p11 = scmp.ne.s32.totalorder %s7430_s3, %s5446_s7  ;;  %p5450_p12 = scmp.lt.u32.totalorder %s5446_s7, %s7430_s3 }
 0x59f   :  { %p5452_p13 = pnand %p5450_p12, %p5447_p11 }
 0x5a1   :  { %5455 = shalt.err (!%p5452_p13)
}
 0x5a2   :  { %3753 = dma.vmem_to_hbm [thread:$0]  %s3748_s18, 1024, %s7430_s3, [#allocation4], %s5465_s29, %s5465_s29, %s5466_s30  }
 0x5a3   :  { %5460 = dma.done.wait [#allocation4], 1024  }
 0x5a4   :  { %5461 = vsyncadd [#allocation4], 4294966272 }
 0x5a5   :  { %3757 = vsyncpa [#allocation3], 1 }
 0x5a6   :  { %3758 = vsyncpa [#allocation6], 1 }
 0x5a7   :  { %3759 = vsyncpa [#allocation4], 1 }

</bundles_post_ra>
